<compile_context>
chip_gen: v7x
topology: tpu7x:2x2x1
jax: 0.10.0
libtpu: 0.0.40
codegen_flags: <defaults>
</compile_context>

<pallas_src>
import jax
import jax.numpy as jnp
from jax import lax
from jax.experimental import pallas as pl
from jax.experimental.pallas import tpu as pltpu

H = W = 16                        # spatial size of the test images
HP, WP = H + 2, W + 2             # padded spatial extent (conv padding = 1)
SROW = ((HP * WP + 7) // 8) * 8   # padded-position rows per image, rounded up (328)
PAD = 24                          # zero rows around f1 (>= max |tap row shift| = 19)
C_IN = 3
C_MID = 64
KH = KW = 3
K1 = KH * KW * C_IN               # 27 conv1 taps
K1E = K1 + 1                      # +1 bias-indicator column (folds b1 into the matmul)
LFLAT = C_IN * H * W              # 768 = lane-dense flat image width for the L1 term


def _loss_kernel(af_ref, bf_ref, p_ref, mask_ref, w1_ref, w2_ref, b2_ref, out_ref):
    bn = af_ref.shape[1]
    mp = p_ref.shape[1]                       # bn * SROW padded-position rows

    # ---- L1 on lane-dense flat raw images (exact f32) ----
    l1s = jnp.sum(jnp.abs(af_ref[0] - bf_ref[0]))

    # ---- conv1 (+bias via indicator column, +ReLU); a/b stacked along lanes ----
    # rows = padded positions, lanes = [a-features 0..63 | b-features 64..127];
    # padding-position rows of the patches are all-zero, so f1 is exactly zero
    # there (this *is* conv2's zero padding ring).
    f1 = jnp.dot(p_ref[0], w1_ref[...], preferred_element_type=jnp.float32)
    f1 = jnp.maximum(f1, 0.0)                 # (mp, 128)
    f1b = f1.astype(jnp.bfloat16)
    # NOTE(v5e): if bf16 odd-row tap slices below show pack/unpack overhead,
    # slice f1 (f32) instead and cast each slab just before its matmul.
    zpad = jnp.zeros((PAD, 2 * C_MID), jnp.bfloat16)
    f1e = jnp.concatenate([zpad, f1b, zpad], axis=0)     # rows padded for tap shifts

    # ---- conv2 = 3 accumulated matmuls (one per kh), K = 3*128, f32 acc ----
    # A tap (kh, kw) is a pure sublane-offset slice of f1e; the 3 kw taps are
    # concatenated on 128-lane boundaries (no lane shuffling, no K=576 tensor).
    acc = jnp.zeros((mp, 2 * C_MID), jnp.float32)
    for kh in range(KH):
        base = PAD + (kh - 1) * WP
        slab = jnp.concatenate(
            [f1e[base + (kw - 1): base + (kw - 1) + mp, :] for kw in range(KW)],
            axis=-1)                                     # (mp, 384) bf16
        acc = acc + jnp.dot(slab, w2_ref[kh], preferred_element_type=jnp.float32)
    f2 = jnp.maximum(acc + b2_ref[...], 0.0)             # (mp, 128)

    # ---- masked MSE: pair a/b lanes with an XLU roll, mask non-interior rows ----
    d = f2 - pltpu.roll(f2, 64, 1)                       # lanes = [a-b | b-a]
    sq = (d * d).reshape(bn, SROW, 2 * C_MID) * mask_ref[...]
    mses = 0.5 * jnp.sum(sq)

    out_ref[0] = jnp.concatenate(
        [l1s.reshape(1, 1), mses.reshape(1, 1),
         jnp.zeros((1, 2 * C_MID - 2), jnp.float32)], axis=1)


def _tpu_tuning():
    """(images per grid step, vmem limit bytes) -- generation aware."""
    block_n, vmem_mb = 8, 40            # conservative default (v7x: 64 MiB VMEM, 2 TCs)
    try:
        kind = jax.devices()[0].device_kind.lower()
    except Exception:
        return block_n, vmem_mb << 20
    if "v5" in kind or "v6" in kind:    # 128 MiB VMEM generations
        block_n, vmem_mb = 16, 64
    return block_n, vmem_mb << 20


def l1_plus_perceptual_loss(inputs, targets, params,
                            lambda_L1=1.0, lambda_perceptual=1.0):
    """inputs/targets: NCHW float32 in [-1, 1] (like the torch module)."""
    if lambda_L1 == 0 and lambda_perceptual == 0:
        z = jnp.zeros((1,), jnp.float32)
        return z, z, z

    w1, b1, w2, b2 = params
    N = inputs.shape[0]
    inputs = inputs.astype(jnp.float32)
    targets = targets.astype(jnp.float32)

    block_n, vmem_bytes = _tpu_tuning()
    # >=2 grid steps whenever N >= 2 so v7x can shard the grid across both TCs.
    bn = max(1, min(block_n, -(-N // 2)))
    num_blocks = -(-N // bn)
    n_pad = num_blocks * bn - N
    if n_pad:
        # a and b MUST be padded identically: zero images then give |a-b| = 0 and
        # identical features (d = 0), so the partial sums are unaffected.
        pz = ((0, n_pad), (0, 0), (0, 0), (0, 0))
        inputs = jnp.pad(inputs, pz)
        targets = jnp.pad(targets, pz)
    n_tot = num_blocks * bn

    mean = jnp.array([0.485, 0.456, 0.406], jnp.float32)
    std = jnp.array([0.229, 0.224, 0.225], jnp.float32)

    def build_patches(x_nchw):
        # ImageNet-normalize((x+1)/2), zero-pad, 3x3 im2col + bias-indicator
        # column, then spatially re-pad so padding-position rows are all-zero.
        x = jnp.transpose(x_nchw, (0, 2, 3, 1))                          # NHWC
        xn = ((x + 1.0) * 0.5 - mean) / std
        xp = jnp.pad(xn, ((0, 0), (1, 1), (1, 1), (0, 0)))
        cols = [xp[:, kh:kh + H, kw:kw + W, :]
                for kh in range(KH) for kw in range(KW)]
        ind = jnp.ones((n_tot, H, W, 1), jnp.float32)
        p = jnp.concatenate(cols + [ind], axis=-1)                       # (n,16,16,28)
        p = jnp.pad(p, ((0, 0), (1, 1), (1, 1), (0, 0)))                 # (n,18,18,28)
        p = p.reshape(n_tot, HP * WP, K1E)
        return jnp.pad(p, ((0, 0), (0, SROW - HP * WP), (0, 0)))         # (n,328,28)

    # a (inputs) in columns 0..27 -> lanes 0..63, b (targets) in the upper half.
    patches = jnp.concatenate([build_patches(inputs), build_patches(targets)],
                              axis=-1).astype(jnp.bfloat16)
    patches = patches.reshape(num_blocks, bn * SROW, 2 * K1E)

    af = inputs.reshape(num_blocks, bn, LFLAT)
    bf = targets.reshape(num_blocks, bn, LFLAT)

    # Block-diagonal weights so one matmul processes a and b together.
    def dup(wblk):
        z = jnp.zeros_like(wblk)
        return jnp.concatenate([jnp.concatenate([wblk, z], axis=1),
                                jnp.concatenate([z, wblk], axis=1)], axis=0)

    w1e = jnp.concatenate([w1.reshape(K1, C_MID), b1.reshape(1, C_MID)], axis=0)
    w1bd = dup(w1e).astype(jnp.bfloat16)                                 # (56, 128)
    w2bd = jnp.stack(
        [jnp.concatenate([dup(w2[kh, kw]) for kw in range(KW)], axis=0)
         for kh in range(KH)], axis=0).astype(jnp.bfloat16)              # (3, 384, 128)
    b2row = jnp.concatenate([b2, b2]).reshape(1, 2 * C_MID).astype(jnp.float32)

    # interior-position row mask (1 inside the 16x16 image, 0 on the padding
    # ring / row-rounding tail), pre-broadcast to the 128-lane width.
    m2 = jnp.pad(jnp.ones((H, W), jnp.float32), ((1, 1), (1, 1))).reshape(HP * WP, 1)
    mask = (jnp.pad(m2, ((0, SROW - HP * WP), (0, 0)))
            * jnp.ones((1, 2 * C_MID), jnp.float32))

    mp = bn * SROW
    parts = pl.pallas_call(
        _loss_kernel,
        out_shape=jax.ShapeDtypeStruct((num_blocks, 1, 2 * C_MID), jnp.float32),
        grid=(num_blocks,),
        in_specs=[
            pl.BlockSpec((1, bn, LFLAT), lambda n: (n, 0, 0)),           # a flat
            pl.BlockSpec((1, bn, LFLAT), lambda n: (n, 0, 0)),           # b flat
            pl.BlockSpec((1, mp, 2 * K1E), lambda n: (n, 0, 0)),         # conv1 patches
            pl.BlockSpec((SROW, 2 * C_MID), lambda n: (0, 0)),           # interior mask
            pl.BlockSpec((2 * K1E, 2 * C_MID), lambda n: (0, 0)),        # conv1 weight
            pl.BlockSpec((KH, KW * 2 * C_MID, 2 * C_MID),
                         lambda n: (0, 0, 0)),                           # conv2 weight
            pl.BlockSpec((1, 2 * C_MID), lambda n: (0, 0)),              # conv2 bias
        ],
        out_specs=pl.BlockSpec((1, 1, 2 * C_MID), lambda n: (n, 0, 0)),
        compiler_params=pltpu.CompilerParams(
            dimension_semantics=("parallel",),
            vmem_limit_bytes=vmem_bytes),
    )(af, bf, patches, mask, w1bd, w2bd, b2row)

    l1_sum = jnp.sum(parts[:, 0, 0])
    mse_sum = jnp.sum(parts[:, 0, 1])
    # Denominators use the ORIGINAL N (not the padded block count).
    loss_l1 = (l1_sum / (N * C_IN * H * W)) * lambda_L1
    loss_perceptual = (mse_sum / (N * C_MID * H * W)) * lambda_perceptual
    loss = loss_l1 + loss_perceptual
    return loss, loss_l1, loss_perceptual


def _reference(inputs, targets, params, lambda_L1, lambda_perceptual):
    """Pure-JAX reference matching the torch forward."""
    w1, b1, w2, b2 = params
    mean = jnp.array([0.485, 0.456, 0.406], jnp.float32).reshape(1, 3, 1, 1)
    std = jnp.array([0.229, 0.224, 0.225], jnp.float32).reshape(1, 3, 1, 1)
    loss_l1 = jnp.mean(jnp.abs(inputs - targets)) * lambda_L1

    def feats(x):
        xn = ((x + 1.0) / 2.0 - mean) / std
        xn = jnp.transpose(xn, (0, 2, 3, 1))
        y = lax.conv_general_dilated(
            xn, w1, (1, 1), "SAME",
            dimension_numbers=("NHWC", "HWIO", "NHWC"),
            precision=lax.Precision.HIGHEST) + b1
        y = jnp.maximum(y, 0.0)
        y = lax.conv_general_dilated(
            y, w2, (1, 1), "SAME",
            dimension_numbers=("NHWC", "HWIO", "NHWC"),
            precision=lax.Precision.HIGHEST) + b2
        return jnp.maximum(y, 0.0)

    fa, fb = feats(inputs), feats(targets)
    loss_p = jnp.mean((fa - fb) ** 2) * lambda_perceptual
    return loss_l1 + loss_p, loss_l1, loss_p


if __name__ == "__main__":
    key = jax.random.PRNGKey(0)
    k1, k2, k3, k4, k5, k6 = jax.random.split(key, 6)

    N = 2
    inputs = jax.random.uniform(k1, (N, C_IN, H, W), jnp.float32, -1.0, 1.0)
    targets = jax.random.uniform(k2, (N, C_IN, H, W), jnp.float32, -1.0, 1.0)

    # Deterministic synthetic "VGG19 features[0..3]" parameters (HWIO layout).
    # TODO(synk): real pretrained VGG19 weights cannot be loaded in-script.
    w1 = 0.10 * jax.random.normal(k3, (KH, KW, C_IN, C_MID), jnp.float32)
    b1 = 0.05 * jax.random.normal(k4, (C_MID,), jnp.float32)
    w2 = 0.05 * jax.random.normal(k5, (KH, KW, C_MID, C_MID), jnp.float32)
    b2 = 0.05 * jax.random.normal(k6, (C_MID,), jnp.float32)
    params = (w1, b1, w2, b2)

    lambda_L1, lambda_perceptual = 1.0, 1.0

    loss, loss_l1, loss_p = l1_plus_perceptual_loss(
        inputs, targets, params, lambda_L1, lambda_perceptual)
    jax.block_until_ready((loss, loss_l1, loss_p))

    ref_loss, ref_l1, ref_p = _reference(
        inputs, targets, params, lambda_L1, lambda_perceptual)

    def close(a, b, rtol, atol=1e-5):
        a, b = float(a), float(b)
        return abs(a - b) <= atol + rtol * abs(b)

    # L1 term is exact f32; perceptual term uses bf16 MXU operands (f32 accum).
    assert close(loss_l1, ref_l1, 1e-3), (float(loss_l1), float(ref_l1))
    assert close(loss_p, ref_p, 5e-3), (float(loss_p), float(ref_p))
    assert close(loss, ref_loss, 5e-3), (float(loss), float(ref_loss))

    print("KERNEL_OK")
</pallas_src>

<mosaic_0001>
module attributes {stable_mosaic.version = 11 : i64} {
  func.func @_loss_kernel(%arg0: i32, %arg1: memref<1x1x768xf32, #tpu.memory_space<vmem>>, %arg2: memref<1x1x768xf32, #tpu.memory_space<vmem>>, %arg3: memref<1x328x56xbf16, #tpu.memory_space<vmem>>, %arg4: memref<328x128xf32, #tpu.memory_space<vmem>>, %arg5: memref<56x128xbf16, #tpu.memory_space<vmem>>, %arg6: memref<3x384x128xbf16, #tpu.memory_space<vmem>>, %arg7: memref<1x128xf32, #tpu.memory_space<vmem>>, %arg8: memref<1x1x128xf32, #tpu.memory_space<vmem>>) attributes {dimension_semantics = [#tpu.dimension_semantics<parallel>], iteration_bounds = array<i64: 2>, scalar_prefetch = 0 : i64, scratch_operands = 0 : i64, tpu.core_type = #tpu.core_type<tc>, window_params = [{transform_indices = @transform_0, window_bounds = array<i64: 1, 1, 768>}, {transform_indices = @transform_1, window_bounds = array<i64: 1, 1, 768>}, {transform_indices = @transform_2, window_bounds = array<i64: 1, 328, 56>}, {pipeline_mode = #tpu.pipeline_mode<synchronous>, transform_indices = @transform_3, window_bounds = array<i64: 328, 128>}, {pipeline_mode = #tpu.pipeline_mode<synchronous>, transform_indices = @transform_4, window_bounds = array<i64: 56, 128>}, {pipeline_mode = #tpu.pipeline_mode<synchronous>, transform_indices = @transform_5, window_bounds = array<i64: 3, 384, 128>}, {pipeline_mode = #tpu.pipeline_mode<synchronous>, transform_indices = @transform_6, window_bounds = array<i64: 1, 128>}, {transform_indices = @transform_7, window_bounds = array<i64: 1, 1, 128>}]} {
    %c0 = arith.constant 0 : index
    %c0_0 = arith.constant 0 : index
    %c0_1 = arith.constant 0 : index
    %0 = vector.load %arg1[%c0, %c0_0, %c0_1] : memref<1x1x768xf32, #tpu.memory_space<vmem>>, vector<1x1x768xf32>
    %1 = vector.shape_cast %0 : vector<1x1x768xf32> to vector<1x768xf32>
    %c0_2 = arith.constant 0 : index
    %c0_3 = arith.constant 0 : index
    %c0_4 = arith.constant 0 : index
    %2 = vector.load %arg2[%c0_2, %c0_3, %c0_4] : memref<1x1x768xf32, #tpu.memory_space<vmem>>, vector<1x1x768xf32>
    %3 = vector.shape_cast %2 : vector<1x1x768xf32> to vector<1x768xf32>
    %4 = arith.subf %1, %3 : vector<1x768xf32>
    %5 = math.absf %4 : vector<1x768xf32>
    %6 = vector.shape_cast %5 : vector<1x768xf32> to vector<1x1x768xf32>
    %cst = arith.constant dense<0.000000e+00> : vector<1xf32>
    %7 = vector.multi_reduction <add>, %6, %cst [1, 2] : vector<1x1x768xf32> to vector<1xf32>
    %8 = vector.shape_cast %7 : vector<1xf32> to vector<1x1x1xf32>
    %9 = vector.extract %8[0, 0, 0] : f32 from vector<1x1x1xf32>
    %c0_5 = arith.constant 0 : index
    %c0_6 = arith.constant 0 : index
    %c0_7 = arith.constant 0 : index
    %10 = vector.load %arg3[%c0_5, %c0_6, %c0_7] : memref<1x328x56xbf16, #tpu.memory_space<vmem>>, vector<1x328x56xbf16>
    %11 = vector.shape_cast %10 : vector<1x328x56xbf16> to vector<328x56xbf16>
    %c0_8 = arith.constant 0 : index
    %c0_9 = arith.constant 0 : index
    %12 = vector.load %arg5[%c0_8, %c0_9] : memref<56x128xbf16, #tpu.memory_space<vmem>>, vector<56x128xbf16>
    %cst_10 = arith.constant dense<0.000000e+00> : vector<328x128xf32>
    %13 = tpu.matmul %11, %12, %cst_10 {dimension_numbers = #tpu.dot_dimension_numbers<[1], [0], [0], [1], [0, 0, 1, 1], [], []>} : vector<328x56xbf16>, vector<56x128xbf16>, vector<328x128xf32> -> vector<328x128xf32>
    %cst_11 = arith.constant 0.000000e+00 : f32
    %14 = vector.broadcast %cst_11 : f32 to vector<328x128xf32>
    %15 = arith.maximumf %13, %14 : vector<328x128xf32>
    %16 = arith.truncf %15 : vector<328x128xf32> to vector<328x128xbf16>
    %cst_12 = arith.constant 0.000000e+00 : bf16
    %17 = vector.broadcast %cst_12 : bf16 to vector<24x128xbf16>
    %18 = tpu.concatenate %17, %16, %17 in 0 : vector<24x128xbf16>, vector<328x128xbf16>, vector<24x128xbf16> -> vector<376x128xbf16>
    %cst_13 = arith.constant 0.000000e+00 : f32
    %19 = vector.broadcast %cst_13 : f32 to vector<328x128xf32>
    %20 = vector.extract_strided_slice %18 {offsets = [5, 0], sizes = [328, 128], strides = [1, 1]} : vector<376x128xbf16> to vector<328x128xbf16>
    %21 = vector.extract_strided_slice %18 {offsets = [6, 0], sizes = [328, 128], strides = [1, 1]} : vector<376x128xbf16> to vector<328x128xbf16>
    %22 = vector.extract_strided_slice %18 {offsets = [7, 0], sizes = [328, 128], strides = [1, 1]} : vector<376x128xbf16> to vector<328x128xbf16>
    %23 = tpu.concatenate %20, %21, %22 in 1 : vector<328x128xbf16>, vector<328x128xbf16>, vector<328x128xbf16> -> vector<328x384xbf16>
    %c0_14 = arith.constant 0 : index
    %c0_15 = arith.constant 0 : index
    %c0_16 = arith.constant 0 : index
    %24 = vector.load %arg6[%c0_14, %c0_15, %c0_16] : memref<3x384x128xbf16, #tpu.memory_space<vmem>>, vector<1x384x128xbf16>
    %25 = vector.shape_cast %24 : vector<1x384x128xbf16> to vector<384x128xbf16>
    %cst_17 = arith.constant dense<0.000000e+00> : vector<328x128xf32>
    %26 = tpu.matmul %23, %25, %cst_17 {dimension_numbers = #tpu.dot_dimension_numbers<[1], [0], [0], [1], [0, 0, 1, 1], [], []>} : vector<328x384xbf16>, vector<384x128xbf16>, vector<328x128xf32> -> vector<328x128xf32>
    %27 = arith.addf %19, %26 : vector<328x128xf32>
    %28 = vector.extract_strided_slice %18 {offsets = [23, 0], sizes = [328, 128], strides = [1, 1]} : vector<376x128xbf16> to vector<328x128xbf16>
    %29 = vector.extract_strided_slice %18 {offsets = [24, 0], sizes = [328, 128], strides = [1, 1]} : vector<376x128xbf16> to vector<328x128xbf16>
    %30 = vector.extract_strided_slice %18 {offsets = [25, 0], sizes = [328, 128], strides = [1, 1]} : vector<376x128xbf16> to vector<328x128xbf16>
    %31 = tpu.concatenate %28, %29, %30 in 1 : vector<328x128xbf16>, vector<328x128xbf16>, vector<328x128xbf16> -> vector<328x384xbf16>
    %c1 = arith.constant 1 : index
    %c0_18 = arith.constant 0 : index
    %c0_19 = arith.constant 0 : index
    %32 = vector.load %arg6[%c1, %c0_18, %c0_19] : memref<3x384x128xbf16, #tpu.memory_space<vmem>>, vector<1x384x128xbf16>
    %33 = vector.shape_cast %32 : vector<1x384x128xbf16> to vector<384x128xbf16>
    %cst_20 = arith.constant dense<0.000000e+00> : vector<328x128xf32>
    %34 = tpu.matmul %31, %33, %cst_20 {dimension_numbers = #tpu.dot_dimension_numbers<[1], [0], [0], [1], [0, 0, 1, 1], [], []>} : vector<328x384xbf16>, vector<384x128xbf16>, vector<328x128xf32> -> vector<328x128xf32>
    %35 = arith.addf %27, %34 : vector<328x128xf32>
    %36 = vector.extract_strided_slice %18 {offsets = [41, 0], sizes = [328, 128], strides = [1, 1]} : vector<376x128xbf16> to vector<328x128xbf16>
    %37 = vector.extract_strided_slice %18 {offsets = [42, 0], sizes = [328, 128], strides = [1, 1]} : vector<376x128xbf16> to vector<328x128xbf16>
    %38 = vector.extract_strided_slice %18 {offsets = [43, 0], sizes = [328, 128], strides = [1, 1]} : vector<376x128xbf16> to vector<328x128xbf16>
    %39 = tpu.concatenate %36, %37, %38 in 1 : vector<328x128xbf16>, vector<328x128xbf16>, vector<328x128xbf16> -> vector<328x384xbf16>
    %c2 = arith.constant 2 : index
    %c0_21 = arith.constant 0 : index
    %c0_22 = arith.constant 0 : index
    %40 = vector.load %arg6[%c2, %c0_21, %c0_22] : memref<3x384x128xbf16, #tpu.memory_space<vmem>>, vector<1x384x128xbf16>
    %41 = vector.shape_cast %40 : vector<1x384x128xbf16> to vector<384x128xbf16>
    %cst_23 = arith.constant dense<0.000000e+00> : vector<328x128xf32>
    %42 = tpu.matmul %39, %41, %cst_23 {dimension_numbers = #tpu.dot_dimension_numbers<[1], [0], [0], [1], [0, 0, 1, 1], [], []>} : vector<328x384xbf16>, vector<384x128xbf16>, vector<328x128xf32> -> vector<328x128xf32>
    %43 = arith.addf %35, %42 : vector<328x128xf32>
    %c0_24 = arith.constant 0 : index
    %c0_25 = arith.constant 0 : index
    %44 = vector.load %arg7[%c0_24, %c0_25] : memref<1x128xf32, #tpu.memory_space<vmem>>, vector<1x128xf32>
    %45 = vector.broadcast %44 : vector<1x128xf32> to vector<328x128xf32>
    %46 = arith.addf %43, %45 : vector<328x128xf32>
    %cst_26 = arith.constant 0.000000e+00 : f32
    %47 = vector.broadcast %cst_26 : f32 to vector<328x128xf32>
    %48 = arith.maximumf %46, %47 : vector<328x128xf32>
    %c64_i32 = arith.constant 64 : i32
    %49 = tpu.dynamic_rotate %48 by %c64_i32 dim 1 : vector<328x128xf32>, i32 -> vector<328x128xf32>
    %50 = arith.subf %48, %49 : vector<328x128xf32>
    %51 = arith.mulf %50, %50 : vector<328x128xf32>
    %52 = vector.shape_cast %51 : vector<328x128xf32> to vector<1x328x128xf32>
    %c0_27 = arith.constant 0 : index
    %c0_28 = arith.constant 0 : index
    %53 = vector.load %arg4[%c0_27, %c0_28] : memref<328x128xf32, #tpu.memory_space<vmem>>, vector<328x128xf32>
    %54 = vector.shape_cast %53 : vector<328x128xf32> to vector<1x328x128xf32>
    %55 = arith.mulf %52, %54 : vector<1x328x128xf32>
    %56 = vector.shape_cast %55 : vector<1x328x128xf32> to vector<1x1x328x128xf32>
    %cst_29 = arith.constant dense<0.000000e+00> : vector<1xf32>
    %57 = vector.multi_reduction <add>, %56, %cst_29 [1, 2, 3] : vector<1x1x328x128xf32> to vector<1xf32>
    %58 = vector.shape_cast %57 : vector<1xf32> to vector<1x1x1x1xf32>
    %59 = vector.extract %58[0, 0, 0, 0] : f32 from vector<1x1x1x1xf32>
    %cst_30 = arith.constant 5.000000e-01 : f32
    %60 = arith.mulf %cst_30, %59 : f32
    %61 = vector.broadcast %9 : f32 to vector<1x1xf32>
    %62 = vector.broadcast %60 : f32 to vector<1x1xf32>
    %cst_31 = arith.constant 0.000000e+00 : f32
    %63 = vector.broadcast %cst_31 : f32 to vector<1x126xf32>
    %64 = tpu.concatenate %61, %62, %63 in 1 : vector<1x1xf32>, vector<1x1xf32>, vector<1x126xf32> -> vector<1x128xf32>
    %c0_32 = arith.constant 0 : index
    %c0_33 = arith.constant 0 : index
    %c0_34 = arith.constant 0 : index
    %65 = vector.load %arg8[%c0_32, %c0_33, %c0_34] : memref<1x1x128xf32, #tpu.memory_space<vmem>>, vector<1x1x128xf32>
    %66 = vector.shape_cast %65 : vector<1x1x128xf32> to vector<1x128xf32>
    %67 = vector.shape_cast %64 : vector<1x128xf32> to vector<1x1x128xf32>
    tpu.vector_store %arg8[%c0_32, %c0_33, %c0_34], %67 {strides = array<i32>} : memref<1x1x128xf32, #tpu.memory_space<vmem>>, vector<1x1x128xf32>,
    return
  }
  func.func @transform_0(%arg0: i32) -> (i32, i32, i32) {
    %c0_i32 = arith.constant 0 : i32
    %c0_i32_0 = arith.constant 0 : i32
    %c0_i32_1 = arith.constant 0 : i32
    return %arg0, %c0_i32, %c0_i32_0 : i32, i32, i32
  }
  func.func @transform_1(%arg0: i32) -> (i32, i32, i32) {
    %c0_i32 = arith.constant 0 : i32
    %c0_i32_0 = arith.constant 0 : i32
    %c0_i32_1 = arith.constant 0 : i32
    return %arg0, %c0_i32, %c0_i32_0 : i32, i32, i32
  }
  func.func @transform_2(%arg0: i32) -> (i32, i32, i32) {
    %c0_i32 = arith.constant 0 : i32
    %c0_i32_0 = arith.constant 0 : i32
    %c0_i32_1 = arith.constant 0 : i32
    return %arg0, %c0_i32, %c0_i32_0 : i32, i32, i32
  }
  func.func @transform_3(%arg0: i32) -> (i32, i32) {
    %c0_i32 = arith.constant 0 : i32
    %c0_i32_0 = arith.constant 0 : i32
    %c0_i32_1 = arith.constant 0 : i32
    return %c0_i32, %c0_i32_0 : i32, i32
  }
  func.func @transform_4(%arg0: i32) -> (i32, i32) {
    %c0_i32 = arith.constant 0 : i32
    %c0_i32_0 = arith.constant 0 : i32
    %c0_i32_1 = arith.constant 0 : i32
    return %c0_i32, %c0_i32_0 : i32, i32
  }
  func.func @transform_5(%arg0: i32) -> (i32, i32, i32) {
    %c0_i32 = arith.constant 0 : i32
    %c0_i32_0 = arith.constant 0 : i32
    %c0_i32_1 = arith.constant 0 : i32
    %c0_i32_2 = arith.constant 0 : i32
    return %c0_i32, %c0_i32_0, %c0_i32_1 : i32, i32, i32
  }
  func.func @transform_6(%arg0: i32) -> (i32, i32) {
    %c0_i32 = arith.constant 0 : i32
    %c0_i32_0 = arith.constant 0 : i32
    %c0_i32_1 = arith.constant 0 : i32
    return %c0_i32, %c0_i32_0 : i32, i32
  }
  func.func @transform_7(%arg0: i32) -> (i32, i32, i32) {
    %c0_i32 = arith.constant 0 : i32
    %c0_i32_0 = arith.constant 0 : i32
    %c0_i32_1 = arith.constant 0 : i32
    return %arg0, %c0_i32, %c0_i32_0 : i32, i32, i32
  }
}

</mosaic_0001>

<bundles_post_ra>
// kernel: tpu_custom_call.1
= control target key start
LH: loop header
LB: loop body
LE: loop exit
PB: predicated region body
PF: predicated region fallthrough
CT: control target
= control target key end

     0   :  { %12 = vsyncpa [#allocation3], 0  ;;  %s8111_s0 = inlined_call_operand.vmem [shape: f32[2,1,768], index: 0, kind: input, shape index: {}]   ;;  %s8112_s1 = inlined_call_operand.vmem [shape: f32[2,1,768], index: 1, kind: input, shape index: {}]   ;;  %s8113_s2 = inlined_call_operand.vmem [shape: bf16[2,328,56], index: 2, kind: input, shape index: {}]   ;;  %s8114_s3 = inlined_call_operand.vmem [shape: f32[328,128], index: 3, kind: input, shape index: {}]   ;;  %s8115_s4 = inlined_call_operand.vmem [shape: bf16[56,128], index: 4, kind: input, shape index: {}]   ;;  %s8116_s5 = inlined_call_operand.hbm [shape: bf16[3,384,128], index: 5, kind: input, shape index: {}]   ;;  %s8117_s6 = inlined_call_operand.vmem [shape: f32[1,128], index: 6, kind: input, shape index: {}]   ;;  %s8118_s7 = inlined_call_operand.hbm [shape: f32[2,1,128], index: 7, kind: output, shape index: {}]  }
   0x1   :  { %13 = vsyncpa [#allocation4], 0 }
   0x2   :  { %15 = vsyncpa [#allocation4 + $0x1], 0  ;;  %s5628_s24 = smov 0   ;;  %s5630_s25 = smov 0  }
   0x3   :  { %s5632_s26 = smov 0   ;;  %s5634_s27 = smov 0  }
   0x4 LB: > { %s5649_s28 = sadd.s32 4294967295, %s5578_s27   ;;  %s4684_s29 = sadd.s32 4294967294, %s5578_s27   ;;  %s5578_s27 = sphi %s5634_s27, %s8773_s27   ;;  %s5574_s26 = sphi %s5632_s26, %s8772_s26   ;;  %s5570_s25 = sphi %s5630_s25, %s8771_s25   ;;  %s5566_s24 = sphi %s5628_s24, %s8770_s24  }
   0x5   : > { %s5653_s30 = sadd.s32 1, %s5578_s27   ;;  %s190_s8 = sadd.s32 1, %s5574_s26 }
   0x6   : > { %s187_s9 = ssub.s32 %s5578_s27, %s5653_s30  ;;  %p200_p0 = scmp.ne.s32.totalorder %s5574_s26, %s5570_s25 }
   0x7   : > { %p188_p1 = scmp.eq.s32.totalorder %s187_s9, 0  ;;  %p201_p2 = scmp.eq.s32.totalorder %s5649_s28, 1 }
   0x8   : > { %p206_p3 = scmp.ne.s32.totalorder %s5570_s25, %s5566_s24  ;;  %p207_p4 = scmp.eq.s32.totalorder %s4684_s29, 1 }
   0x9   : > { %s5664_s10 = scalar_select %p188_p1, %s5574_s26, %s190_s8  }
   0xa   : > { %p5666_p5 = por %p201_p2, %p200_p0  ;;  %p5670_p6 = por %p207_p4, %p206_p3 }
   0xb   : > { %p4685_p7 = scmp.ge.s32.totalorder %s5578_s27, 1  ;;  %p214_p8 = scmp.lt.s32.totalorder %s5578_s27, 3 }
   0xc   : > { %s8368_s11 = scalar_select %p5666_p5, 1, 0 }
   0xd   : > { %s8369_s12 = scalar_select %p5670_p6, 1, 0 }
   0xe   : > { %p8119_p9 = scmp.eq.s32.totalorder %s5649_s28, 0  ;;  %p5677_p10 = pnand %p4685_p7, %p214_p8 }
   0xf   : > { %s5580_s14 = smov [#allocation2]   ;;  %s5484_s19 = scalar_lea.hbm %s8116_s5, 9216 }
  0x10   : > { %s8370_s13 = scalar_select %p5677_p10, 1, 0 }
  0x11   : > { %s232_s15 = sshll.u32 %s5580_s14, 4  ;;  %p5337_p11 = pneg %p5677_p10  ;;  %s233_s15 = int_to_ptr.vmem [resolvable:$true] %s232_s15 }
  0x12   : > { %p5485_p13 = scmp.ne.s32.totalorder %s8116_s5, %s5484_s19  ;;  %p5491_p3 = scmp.lt.u32.totalorder %s5484_s19, %s8116_s5 }
  0x13   : > { %p5685_p12 = pnand %p8119_p9, %p5337_p11 }
  0x15   : > { %p5486_p0 = pneg %p5685_p12 }
  0x17   : > { %p5487_p1 = pnand %p5486_p0, %p5485_p13 }
  0x19   : > { %p5488_p2 = pneg %p5487_p1 }
  0x1b   : > { %p5493_p4 = pnand %p5491_p3, %p5488_p2 }
  0x1d   : > { %5496 = shalt.err (!%p5493_p4)
}
  0x1e   : > { %s5497_s29 = scalar_lea.vmem %s233_s15, 9216  ;;  %p5505_p9 = scmp.lt.s32.totalorder %s233_s15, %s233_s15 }
  0x1f   : > { %p5498_p7 = scmp.ne.s32.totalorder %s233_s15, %s5497_s29  ;;  %p5506_p6 = scmp.lt.s32.totalorder %s5497_s29, %s5497_s29 }
  0x21   : > { %p5500_p8 = pnand %p5498_p7, %p5486_p0  ;;  %p5507_p5 = por %p5506_p6, %p5505_p9 }
  0x23   : > { %p5501_p11 = pneg %p5500_p8 }
  0x25   : > { %p5508_p10 = pnand %p5507_p5, %p5501_p11 }
  0x27   : > { %5511 = shalt.err (!%p5508_p10)
}
  0x28   : > { %s5581_s8 = smov 64   ;;  %s5582_s9 = smov 4  }
  0x29   : > { %5340 = dma.hbm_to_vmem [thread:$0]  (!%p5685_p12), %s8116_s5, 9216, %s233_s15, [#allocation3], %s5581_s8, %s5581_s8, %s5582_s9  }
  0x2a   : > { %p8372_p13 = scmp.ne.s32.totalorder %s8370_s13, 0 }
  0x2c   : > { %273 = sbr.rel (%p8372_p13) target bundleno = 1391 (0x56f), region = 48 }
  0x33   : > { %p8373_p1 = scmp.eq.s32.totalorder %s5649_s28, 0 }
  0x35   : > { %5557 = dma.done.wait (%p8373_p1), [#allocation3], 9216   ;;  %p8374_p0 = pmov %p8373_p1 }
  0x36   : > { %p312_p5 = scmp.lt.s32.totalorder %s5649_s28, 1  ;;  %v8138_v0 = vmov 0.0   ;;  %vm5584_vm0 = vmmov 0   ;;  %v5387_v1 = vld [vmem:[%s8115_s4] sm:$0xff]   ;;  %v5388_v2 = vld [vmem:[%s8115_s4 + $0x8] sm:$0xff]   ;;  %v5389_v3 = vld [vmem:[%s8115_s4 + $0x10] sm:$0xff]  }
  0x37   : > { %5559 = vsyncadd (%p8374_p0), [#allocation3], 4294958080  ;;  %4925 = vmatprep.subr.bf16.mxu0 %v8138_v0  ;;  %4933 = vmatprep.mubr.msk.bf16.mxu0 %vm5584_vm0, %v8138_v0  ;;  %v5390_v4 = vld [vmem:[%s8115_s4 + $0x18] ss:$0 sps:$4 sm:$0xff]   ;;  %vm618_vm1 = vcmask 1043456   ;;  %vm554_vm2 = vcmask 457728  }
  0x38   : > { %s5716_s15 = scalar_select %p312_p5, %s5649_s28, 1  ;;  %5317 = vmatprep.subr.bf16.mxu1 %v8138_v0  ;;  %4977 = vmatprep.mubr.msk.bf16.mxu1 %vm5584_vm0, %v8138_v0  ;;  %v620_v5 = vsel %vm618_vm1, %v5390_v4, 0  ;;  %v8132_v8 = vmov 0   ;;  %v5412_v11 = vld [vmem:[#allocation2 + $0x140] sm:$0xff]   ;;  %v5414_v14 = vld [vmem:[#allocation2 + $0x148] sm:$0xff]   ;;  %v5417_v17 = vld [vmem:[#allocation2 + $0x150] sm:$0xff]  }
  0x39   : > { %4926 = vmatpush3.bf16.msra.mxu0 %v5387_v1  ;;  %5321 = vmatpush3.bf16.msra.mxu1 %v5387_v1  ;;  %v5413_v12 = vld [vmem:[#allocation2 + $0xc0] sm:$0xff]   ;;  %v5415_v15 = vld [vmem:[#allocation2 + $0xc8] sm:$0xff]   ;;  %v5416_v18 = vld [vmem:[#allocation2 + $0xd0] sm:$0xff]   ;;  %vm1118_vm3 = vcmask 1046528   ;;  %vm950_vm4 = vsmask.f32 7424 }
  0x3a   : > { %s5326_s13 = smul.u32 164, %s5716_s15  ;;  %4927 = vmatprep.subr.bf16.mxu0 %v8138_v0  ;;  %5318 = vmatprep.subr.bf16.mxu1 %v8138_v0  ;;  %v5421_v20 = vld [vmem:[#allocation2 + $0x158] sm:$0xff]   ;;  %v5419_v23 = vld [vmem:[#allocation2 + $0xe0] sm:$0xff]   ;;  %v5420_v25 = vld [vmem:[#allocation2 + $0xe8] sm:$0xff]   ;;  %vm1268_vm5 = vsmask.f32 4352 }
  0x3b   : > { %v5418_v21 = vld [vmem:[#allocation2 + $0xd8] sm:$0xff]   ;;  %v5424_v24 = vld [vmem:[#allocation2 + $0x160] sm:$0xff]   ;;  %v5422_v28 = vld [vmem:[#allocation2 + $0xf0] sm:$0xff]   ;;  %vm2335_vm6 = vsmask.f32 5376  ;;  %s5586_s16 = smov 64  }
  0x3c   : > { %s5731_s23 = scalar_lea.vmem %s8113_s2, %s5326_s13  ;;  %v5423_v29 = vld [vmem:[#allocation2 + $0xf8] sm:$0xff]   ;;  %v5425_v32 = vld [vmem:[#allocation2 + $0x100] sm:$0xff]   ;;  %v5426_v42 = vld [vmem:[#allocation2 + $0x108] sm:$0xff]   ;;  %vm3264_vm7 = vsmask.f32 3328  ;;  %s5325_s18 = smul.u32 6, %s5716_s15 }
  0x3d   : > { %4928 = vmatpush3.bf16.msra.mxu0 %v5388_v2  ;;  %5322 = vmatpush3.bf16.msra.mxu1 %v5388_v2  ;;  %v5391_v6 = vld [vmem:[%s5731_s23] sm:$0xff]   ;;  %v5399_v7 = vld [vmem:[%s5731_s23 + $0x58] sm:$0xff]   ;;  %v5392_v9 = vld [vmem:[%s5731_s23 + $0x8] sm:$0xff]   ;;  %vm361_vm8 = vcmask 1040384   ;;  %s4810_s8 = sshll.u32 %s5649_s28, 4  ;;  %vm4575_vm9 = vcmask 7168  }
  0x3e   : > { %4929 = vmatprep.subr.bf16.mxu0 %v8138_v0  ;;  %5319 = vmatprep.subr.bf16.mxu1 %v8138_v0  ;;  %v5401_v10 = vld [vmem:[%s5731_s23 + $0x60] sm:$0xff]   ;;  %v5393_v13 = vld [vmem:[%s5731_s23 + $0x10] sm:$0xff]   ;;  %v5403_v16 = vld [vmem:[%s5731_s23 + $0x68] sm:$0xff]   ;;  %s315_s21 = scalar_lea.vmem %s8111_s0, %s5325_s18  ;;  %s319_s29 = scalar_lea.vmem %s8112_s1, %s5325_s18  ;;  %vm4577_vm10 = vcmask 15360  }
  0x3f   : > { %v5394_v19 = vld [vmem:[%s5731_s23 + $0x18] sm:$0xff]   ;;  %v5405_v22 = vld [vmem:[%s5731_s23 + $0x70] sm:$0xff]   ;;  %v5395_v26 = vld [vmem:[%s5731_s23 + $0x20] sm:$0xff]   ;;  %s8069_s19 = scalar_lea.hbm %s8118_s7, %s4810_s8  ;;  %p8768_p9 = scmp.ne.s32.totalorder %s8368_s11, 0 }
  0x40   : > { %v5406_v27 = vld [vmem:[%s5731_s23 + $0x78] sm:$0xff]   ;;  %v5396_v30 = vld [vmem:[%s5731_s23 + $0x28] sm:$0xff]   ;;  %v5407_v31 = vld [vmem:[%s5731_s23 + $0x80] sm:$0xff]   ;;  %s5587_s20 = smov [#allocation5]  }
  0x41   : > { %4930 = vmatpush3.bf16.msra.mxu0 %v5389_v3  ;;  %5323 = vmatpush3.bf16.msra.mxu1 %v5389_v3  ;;  %v5397_v33 = vld [vmem:[%s5731_s23 + $0x30] sm:$0xff]   ;;  %v5408_v34 = vld [vmem:[%s5731_s23 + $0x88] sm:$0xff]   ;;  %v5398_v35 = vld [vmem:[%s5731_s23 + $0x38] sm:$0xff]  }
  0x42   : > { %4931 = vmatprep.subr.bf16.mxu0 %v8138_v0  ;;  %5320 = vmatprep.subr.bf16.mxu1 %v8138_v0  ;;  %v5409_v36 = vld [vmem:[%s5731_s23 + $0x90] sm:$0xff]   ;;  %v5400_v37 = vld [vmem:[%s5731_s23 + $0x40] sm:$0xff]   ;;  %v5410_v38 = vld [vmem:[%s5731_s23 + $0x98] sm:$0xff]  }
  0x43   : > { %v5402_v39 = vld [vmem:[%s5731_s23 + $0x48] sm:$0xff]   ;;  %v5411_v40 = vld [vmem:[%s5731_s23 + $0xa0] ss:$0 sps:$4 sm:$0xff]   ;;  %v5404_v41 = vld [vmem:[%s5731_s23 + $0x50] sm:$0xff]   ;;  %s310_s23 = sand.u32 1, %s5570_s25  }
  0x44   : > { %v5427_v43 = vld [vmem:[#allocation2 + $0x168] sm:$0xff]   ;;  %v5428_v44 = vld [vmem:[#allocation2 + $0x110] sm:$0xff]   ;;  %v5429_v45 = vld [vmem:[#allocation2 + $0x118] sm:$0xff]   ;;  %s311_s14 = scalar_lea.vmem [#allocation5], %s310_s23  ;;  %s4581_s28 = scalar_lea.sflag [#allocation4], %s310_s23 }
  0x45   : > { %4932 = vmatpush3.bf16.msra.mxu0 %v620_v5  ;;  %5324 = vmatpush3.bf16.msra.mxu1 %v620_v5  ;;  %v5430_v46 = vld [vmem:[#allocation2 + $0x170] sm:$0xff]   ;;  %v5431_v47 = vld [vmem:[#allocation2 + $0x120] sm:$0xff]   ;;  %v5432_v48 = vld [vmem:[#allocation2 + $0x128] sm:$0xff]   ;;  %s4593_s17 = sshll.u32 %s311_s14, 4  ;;  %s8071_s17 = int_to_ptr.vmem [resolvable:$true] %s4593_s17 }
  0x46   : > { %5017 = vmatprep.subr.bf16.mxu0 %v8138_v0  ;;  %1935 = vmatprep.subr.bf16.mxu1 %v8132_v8  ;;  %v5434_v49 = vld [vmem:[#allocation2 + $0x130] sm:$0xff]   ;;  %v5433_v50 = vld [vmem:[#allocation2 + $0x178] sm:$0xff]  }
  0x47   : > { %v5435_v51 = vld [vmem:[#allocation2 + $0x138] sm:$0xff]  }
  0x48   : > { %4934 = vmatmul.mubr.msk.bf16.vlgmr.msra.gmra.mrb[0].mxu0 %vm554_vm2, %v5391_v6  ;;  %4978 = vmatmul.mubr.msk.bf16.vlgmr.msra.gmra.mrb[0].mxu1 %vm554_vm2, %v5399_v7 }
  0x49   : > { %4937 = vmatprep.mubr.msk.bf16.mxu0 %vm5584_vm0, %v8138_v0  ;;  %4981 = vmatprep.mubr.msk.bf16.mxu1 %vm5584_vm0, %v8138_v0 }
  0x4a   : > { %5018 = vmatpush3.bf16.msra.mxu0 %v5412_v11  ;;  %1936 = vmatpush1.bf16.msra.mxu1 %v5413_v12 }
  0x4b   : > { %5019 = vmatprep.subr.bf16.mxu0 %v8138_v0  ;;  %1937 = vmatprep.subr.bf16.mxu1 %v8132_v8 }
  0x4e   : > { %5020 = vmatpush3.bf16.msra.mxu0 %v5414_v14  ;;  %1938 = vmatpush1.bf16.msra.mxu1 %v5415_v15 }
  0x4f   : > { %5021 = vmatprep.subr.bf16.mxu0 %v8138_v0  ;;  %1939 = vmatprep.subr.bf16.mxu1 %v8132_v8 }
  0x50   : > { %4938 = vmatmul.mubr.msk.bf16.gmra.mrb[4].mxu0 %vm554_vm2, %v5392_v9  ;;  %4982 = vmatmul.mubr.msk.bf16.gmra.mrb[4].mxu1 %vm554_vm2, %v5401_v10 }
  0x51   : > { %4941 = vmatprep.mubr.msk.bf16.mxu0 %vm5584_vm0, %v8138_v0  ;;  %4985 = vmatprep.mubr.msk.bf16.mxu1 %vm5584_vm0, %v8138_v0 }
  0x52   : > { %5022 = vmatpush3.bf16.msra.mxu0 %v5417_v17  ;;  %1940 = vmatpush1.bf16.msra.mxu1 %v5416_v18 }
  0x53   : > { %5023 = vmatprep.subr.bf16.mxu0 %v8138_v0  ;;  %1941 = vmatprep.subr.bf16.mxu1 %v8132_v8 }
  0x56   : > { %5024 = vmatpush3.bf16.msra.mxu0 %v5421_v20  ;;  %1942 = vmatpush1.bf16.msra.mxu1 %v5418_v21 }
  0x57   : > { %5025 = vmatprep.subr.bf16.mxu0 %v8138_v0  ;;  %1943 = vmatprep.subr.bf16.mxu1 %v8132_v8 }
  0x58   : > { %4942 = vmatmul.mubr.msk.bf16.gmra.mrb[8].mxu0 %vm554_vm2, %v5393_v13  ;;  %4986 = vmatmul.mubr.msk.bf16.gmra.mrb[8].mxu1 %vm554_vm2, %v5403_v16 }
  0x59   : > { %4945 = vmatprep.mubr.msk.bf16.mxu0 %vm5584_vm0, %v8138_v0  ;;  %4989 = vmatprep.mubr.msk.bf16.mxu1 %vm5584_vm0, %v8138_v0 }
  0x5a   : > { %5026 = vmatpush3.bf16.msra.mxu0 %v5424_v24  ;;  %1944 = vmatpush1.bf16.msra.mxu1 %v5419_v23 }
  0x5b   : > { %5027 = vmatprep.subr.bf16.mxu0 %v8138_v0  ;;  %1945 = vmatprep.subr.bf16.mxu1 %v8132_v8 }
  0x5e   : > { %1946 = vmatpush1.bf16.msra.mxu1 %v5420_v25  ;;  %5028 = vmatpush3.bf16.msra.mxu0 %v5427_v43 }
  0x5f   : > { %1947 = vmatprep.subr.bf16.mxu1 %v8132_v8  ;;  %5029 = vmatprep.subr.bf16.mxu0 %v8138_v0 }
  0x60   : > { %4946 = vmatmul.mubr.msk.bf16.gmra.mrb[12].mxu0 %vm554_vm2, %v5394_v19  ;;  %4990 = vmatmul.mubr.msk.bf16.gmra.mrb[12].mxu1 %vm554_vm2, %v5405_v22 }
  0x61   : > { %4949 = vmatprep.mubr.msk.bf16.mxu0 %vm5584_vm0, %v8138_v0  ;;  %4993 = vmatprep.mubr.msk.bf16.mxu1 %vm5584_vm0, %v8138_v0 }
  0x62   : > { %1948 = vmatpush1.bf16.msra.mxu1 %v5422_v28  ;;  %5030 = vmatpush3.bf16.msra.mxu0 %v5430_v46 }
  0x63   : > { %1949 = vmatprep.subr.bf16.mxu1 %v8132_v8  ;;  %5031 = vmatprep.subr.bf16.mxu0 %v8138_v0 }
  0x66   : > { %1950 = vmatpush1.bf16.msra.mxu1 %v5423_v29  ;;  %5032 = vmatpush3.bf16.msra.mxu0 %v5433_v50 }
  0x67   : > { %1951 = vmatprep.subr.bf16.mxu1 %v8132_v8  ;;  %5117 = vmatprep.subr.bf16.mxu0 %v8138_v0 }
  0x68   : > { %4950 = vmatmul.mubr.msk.bf16.gmra.mrb[16].mxu0 %vm554_vm2, %v5395_v26  ;;  %4994 = vmatmul.mubr.msk.bf16.gmra.mrb[16].mxu1 %vm554_vm2, %v5406_v27 }
  0x69   : > { %4953 = vmatprep.mubr.msk.bf16.mxu0 %vm5584_vm0, %v8138_v0  ;;  %4997 = vmatprep.mubr.msk.bf16.mxu1 %vm5584_vm0, %v8138_v0 }
  0x6a   : > { %1952 = vmatpush1.bf16.msra.mxu1 %v5425_v32 }
  0x6b   : > { %1953 = vmatprep.subr.bf16.mxu1 %v8132_v8 }
  0x6e   : > { %1954 = vmatpush1.bf16.msra.mxu1 %v5426_v42 }
  0x6f   : > { %1955 = vmatprep.subr.bf16.mxu1 %v8132_v8 }
  0x70   : > { %4954 = vmatmul.mubr.msk.bf16.gmra.mrb[20].mxu0 %vm554_vm2, %v5396_v30  ;;  %4998 = vmatmul.mubr.msk.bf16.gmra.mrb[20].mxu1 %vm554_vm2, %v5407_v31 }
  0x71   : > { %4957 = vmatprep.mubr.msk.bf16.mxu0 %vm5584_vm0, %v8138_v0  ;;  %5001 = vmatprep.mubr.msk.bf16.mxu1 %vm5584_vm0, %v8138_v0 }
  0x72   : > { %1956 = vmatpush1.bf16.msra.mxu1 %v5428_v44 }
  0x73   : > { %1957 = vmatprep.subr.bf16.mxu1 %v8132_v8 }
  0x76   : > { %1958 = vmatpush1.bf16.msra.mxu1 %v5429_v45 }
  0x77   : > { %1959 = vmatprep.subr.bf16.mxu1 %v8132_v8 }
  0x78   : > { %4958 = vmatmul.mubr.msk.bf16.gmra.mrb[24].mxu0 %vm554_vm2, %v5397_v33  ;;  %5002 = vmatmul.mubr.msk.bf16.gmra.mrb[24].mxu1 %vm554_vm2, %v5408_v34 }
  0x79   : > { %4961 = vmatprep.mubr.msk.bf16.mxu0 %vm5584_vm0, %v8138_v0  ;;  %5005 = vmatprep.mubr.msk.bf16.mxu1 %vm5584_vm0, %v8138_v0 }
  0x7a   : > { %1960 = vmatpush1.bf16.msra.mxu1 %v5431_v47 }
  0x7b   : > { %1961 = vmatprep.subr.bf16.mxu1 %v8132_v8 }
  0x7e   : > { %1962 = vmatpush1.bf16.msra.mxu1 %v5432_v48 }
  0x7f   : > { %1963 = vmatprep.subr.bf16.mxu1 %v8132_v8 }
  0x80   : > { %4962 = vmatmul.mubr.msk.bf16.gmra.mrb[28].mxu0 %vm554_vm2, %v5398_v35  ;;  %5006 = vmatmul.mubr.msk.bf16.gmra.mrb[28].mxu1 %vm554_vm2, %v5409_v36 }
  0x81   : > { %4965 = vmatprep.mubr.msk.bf16.mxu0 %vm5584_vm0, %v8138_v0  ;;  %5009 = vmatprep.mubr.msk.bf16.mxu1 %vm5584_vm0, %v8138_v0 }
  0x82   : > { %1964 = vmatpush1.bf16.msra.mxu1 %v5434_v49 }
  0x83   : > { %1965 = vmatprep.subr.bf16.mxu1 %v8132_v8 }
  0x86   : > { %1966 = vmatpush1.bf16.msra.mxu1 %v5435_v51 }
  0x87   : > { %2812 = vmatprep.subr.bf16.mxu1 %v8132_v8 }
  0x88   : > { %4966 = vmatmul.mubr.msk.bf16.gmra.mrb[32].mxu0 %vm554_vm2, %v5400_v37  ;;  %5010 = vmatmul.mubr.msk.bf16.gmra.mrb[32].mxu1 %vm554_vm2, %v5410_v38 }
  0x89   : > { %4969 = vmatprep.mubr.msk.bf16.mxu0 %vm5584_vm0, %v8138_v0  ;;  %5013 = vmatprep.mubr.msk.bf16.mxu1 %vm5584_vm0, %v8138_v0 }
  0x90   : > { %4970 = vmatmul.mubr.msk.bf16.gmra.mrb[36].mxu0 %vm554_vm2, %v5402_v39  ;;  %5014 = vmatmul.mubr.msk.bf16.gmra.mrb[36].mxu1 %vm554_vm2, %v5411_v40 }
  0x91   : > { %4973 = vmatprep.mubr.msk.bf16.mxu0 %vm5584_vm0, %v8138_v0 }
  0x98   : > { %4974 = vmatmul.mubr.msk.bf16.gmra.mrb[40].mxu0 %vm554_vm2, %v5404_v41 }
  0x99   : > { %5033 = vmatprep.mubr.msk.bf16.mxu0 %vm5584_vm0, %v8138_v0 }
 0x11b   : > { %v656_v52 = vpop.f32.mrb[0].mxu0  ;;  %v744_v53 = vpop.f32.mrb[0].mxu1 }
 0x11c   : > { %v4935_v54 = vpop.f32.mrb[1].mxu0  ;;  %v844_v55 = vmax.f32 %v744_v53, 0.0  ;;  %v4979_v56 = vpop.f32.mrb[1].mxu1  ;;  %v822_v59 = vmax.f32 %v656_v52, 0.0 }
 0x11d   : > { %v659_v57 = vpop.f32.mrb[2].mxu0  ;;  %v747_v58 = vpop.f32.mrb[2].mxu1 }
 0x11e   : > { %v823_v60 = vmax.f32 %v659_v57, 0.0  ;;  %v4936_v61 = vpop.f32.mrb[3].mxu0  ;;  %v845_v62 = vmax.f32 %v747_v58, 0.0  ;;  %v4980_v63 = vpop.f32.mrb[3].mxu1 }
 0x120   : > { %v863_v1 = vpack.c.bf16 %v823_v60, %v822_v59  ;;  %v5854_v2 = vpack.c.bf16 %v845_v62, %v844_v55 }
 0x122   : > { %v906_v3 = vrot.slane %v863_v1, 4  ;;  %v8128_v20 = vrot.slane %v5854_v2, 4 }
 0x123   : > { %v664_v4 = vpop.f32.mrb[4].mxu0  ;;  %v752_v5 = vpop.f32.mrb[4].mxu1 }
 0x124   : > { %v5857_v6 = vsel %vm618_vm1, 0, %v906_v3  ;;  %v4939_v7 = vpop.f32.mrb[5].mxu0  ;;  %v846_v9 = vmax.f32 %v752_v5, 0.0  ;;  %v4983_v10 = vpop.f32.mrb[5].mxu1  ;;  %v824_v13 = vmax.f32 %v664_v4, 0.0 }
 0x125   : > { %v667_v11 = vpop.f32.mrb[6].mxu0  ;;  %v755_v12 = vpop.f32.mrb[6].mxu1  ;;  %v5860_v18 = vshll.u32 %v5857_v6, 16  ;;  %v5865_v27 = vshrl.u32 %v5857_v6, 16  ;;  %v8126_v33 = vrot.slane %v5857_v6, 1 }
 0x126   : > { %v825_v14 = vmax.f32 %v667_v11, 0.0  ;;  %v4940_v15 = vpop.f32.mrb[7].mxu0  ;;  %v847_v16 = vmax.f32 %v755_v12, 0.0  ;;  %v4984_v17 = vpop.f32.mrb[7].mxu1 }
 0x127   : > { %v8127_v24 = vrot.slane %v5860_v18, 1  ;;  %v1269_v57 = vrot.slane %v5865_v27, 3  ;;  %v1270_v58 = vrot.slane %v5860_v18, 4 }
 0x128   : > { %v864_v19 = vpack.c.bf16 %v825_v14, %v824_v13  ;;  %v875_v21 = vpack.c.bf16 %v847_v16, %v846_v9 }
 0x129   : > { %v963_v44 = vor.u32 %v5865_v27, %v8127_v24 }
 0x12a   : > { %v907_v22 = vrot.slane %v864_v19, 4  ;;  %v929_v23 = vrot.slane %v875_v21, 4 }
 0x12b   : > { %v672_v25 = vpop.f32.mrb[8].mxu0  ;;  %v760_v26 = vpop.f32.mrb[8].mxu1 }
 0x12c   : > { %v908_v28 = vsel %vm618_vm1, %v906_v3, %v907_v22  ;;  %v4943_v29 = vpop.f32.mrb[9].mxu0  ;;  %v5871_v30 = vsel %vm618_vm1, %v8128_v20, %v929_v23  ;;  %v848_v31 = vmax.f32 %v760_v26, 0.0  ;;  %v4987_v32 = vpop.f32.mrb[9].mxu1  ;;  %v826_v39 = vmax.f32 %v672_v25, 0.0 }
 0x12d   : > { %v5874_v34 = vshll.u32 %v908_v28, 16  ;;  %v5876_v35 = vshrl.u32 %v908_v28, 16  ;;  %v1122_v36 = vrot.slane %v908_v28, 1  ;;  %v675_v37 = vpop.f32.mrb[10].mxu0  ;;  %v763_v38 = vpop.f32.mrb[10].mxu1 }
 0x12e   : > { %v827_v40 = vmax.f32 %v675_v37, 0.0  ;;  %v4944_v41 = vpop.f32.mrb[11].mxu0  ;;  %v849_v42 = vmax.f32 %v763_v38, 0.0  ;;  %v4988_v43 = vpop.f32.mrb[11].mxu1  ;;  %v1271_v38 = vor.u32 %v1270_v58, %v1269_v57 }
 0x12f   : > { %v5884_v45 = vsel %vm1118_vm3, %v8126_v33, %v1122_v36  ;;  %v967_v46 = vrot.slane %v5874_v34, 1  ;;  %v1272_v48 = vrot.slane %v5876_v35, 3  ;;  %v1273_v49 = vrot.slane %v5874_v34, 4 }
 0x130   : > { %v865_v47 = vpack.c.bf16 %v827_v40, %v826_v39  ;;  %v5889_v50 = vpack.c.bf16 %v849_v42, %v848_v31  ;;  %v8123_v51 = vshrl.u32 %v5884_v45, 16  ;;  %v8122_v52 = vshll.u32 %v5884_v45, 16 }
 0x131   : > { %v5894_v53 = vsel %vm950_vm4, %v963_v44, %v967_v46  ;;  %v971_v63 = vor.u32 %v5876_v35, %v967_v46  ;;  %v5903_v3 = vor.u32 %v1273_v49, %v1272_v48 }
 0x132   : > { %v909_v54 = vrot.slane %v865_v47, 4  ;;  %v8125_v55 = vshrl.u32 %v5894_v53, 16  ;;  %v931_v59 = vrot.slane %v5889_v50, 4  ;;  %v8124_v1 = vshll.u32 %v5894_v53, 16 }
 0x133   : > { %v680_v56 = vpop.f32.mrb[12].mxu0  ;;  %v768_v60 = vpop.f32.mrb[12].mxu1  ;;  %v1296_v10 = vrot.slane %v8123_v51, 3  ;;  %v1299_v11 = vrot.slane %v8122_v52, 4  ;;  %v1275_v46 = vsel %vm1268_vm5, %v1271_v38, %v5903_v3 }
 0x134   : > { %v910_v61 = vsel %vm618_vm1, %v907_v22, %v909_v54  ;;  %v4947_v62 = vpop.f32.mrb[13].mxu0  ;;  %v4991_v4 = vpop.f32.mrb[13].mxu1  ;;  %v828_v13 = vmax.f32 %v680_v56, 0.0  ;;  %v1279_v16 = vrot.slane %v8125_v55, 3  ;;  %v5916_v17 = vsel %vm618_vm1, %v929_v23, %v931_v59 }
 0x135   : > { %v5905_v5 = vshll.u32 %v910_v61, 16  ;;  %v1124_v7 = vrot.slane %v910_v61, 1  ;;  %v683_v9 = vpop.f32.mrb[14].mxu0  ;;  %v771_v12 = vpop.f32.mrb[14].mxu1  ;;  %v850_v25 = vmax.f32 %v768_v60, 0.0  ;;  %v1282_v32 = vrot.slane %v8124_v1, 4 }
 0x136   : > { %v829_v14 = vmax.f32 %v683_v9, 0.0  ;;  %v4948_v15 = vpop.f32.mrb[15].mxu0  ;;  %v4992_v19 = vpop.f32.mrb[15].mxu1  ;;  %v851_v26 = vmax.f32 %v771_v12, 0.0  ;;  %v5928_v37 = vshrl.u32 %v910_v61, 16  ;;  %v1300_v43 = vor.u32 %v1299_v11, %v1296_v10  ;;  %v5437_v61 = vld [vmem:[#allocation2 + $0x80] sm:$0xff]  }
 0x137   : > { %8375 = vst [vmem:[#allocation8_spill] sm:$0xff] %v5905_v5  ;;  %v1125_v21 = vsel %vm1118_vm3, %v1122_v36, %v1124_v7  ;;  %v975_v22 = vrot.slane %v5905_v5, 1  ;;  %v1283_v58 = vor.u32 %v1282_v32, %v1279_v16 }
 0x138   : > { %v5920_v28 = vpack.c.bf16 %v829_v14, %v828_v13  ;;  %v5922_v29 = vshrl.u32 %v1125_v21, 16  ;;  %v5924_v31 = vshll.u32 %v1125_v21, 16  ;;  %v5940_v47 = vpack.c.bf16 %v851_v26, %v850_v25 }
 0x139   : > { %v976_v23 = vsel %vm950_vm4, %v971_v63, %v975_v22  ;;  %v1310_v11 = vrot.slane %v5928_v37, 3  ;;  %v979_v26 = vor.u32 %v5928_v37, %v975_v22 }
 0x13a   : > { %v911_v36 = vrot.slane %v5920_v28, 4  ;;  %v1304_v39 = vrot.slane %v5922_v29, 3  ;;  %v1307_v40 = vrot.slane %v5924_v31, 4  ;;  %v5934_v41 = vshrl.u32 %v976_v23, 16 }
 0x13b   : > { %v688_v42 = vpop.f32.mrb[16].mxu0  ;;  %v5936_v44 = vshll.u32 %v976_v23, 16  ;;  %v5942_v48 = vpop.f32.mrb[16].mxu1  ;;  %v8130_v16 = vrot.slane %v5940_v47, 4  ;;  %v5436_v23 = vld [vmem:[#allocation2] sm:$0xff]  }
 0x13c   : > { %v5945_v49 = vsel %vm618_vm1, %v909_v54, %v911_v36  ;;  %v4951_v56 = vpop.f32.mrb[17].mxu0  ;;  %v5947_v57 = vor.u32 %v1307_v40, %v1304_v39  ;;  %v1287_v60 = vrot.slane %v5934_v41, 3  ;;  %v4995_v62 = vpop.f32.mrb[17].mxu1  ;;  %v830_v12 = vmax.f32 %v688_v42, 0.0  ;;  %v5440_v42 = vld [vmem:[#allocation2 + $0x88] sm:$0xff]  }
 0x13d   : > { %v5951_v63 = vshll.u32 %v5945_v49, 16  ;;  %v1126_v4 = vrot.slane %v5945_v49, 1  ;;  %v691_v9 = vpop.f32.mrb[18].mxu0  ;;  %v1290_v10 = vrot.slane %v5936_v44, 4  ;;  %v5956_v54 = vpop.f32.mrb[18].mxu1  ;;  %v1311_v40 = vrot.slane %v5905_v5, 4 }
 0x13e   : > { %v831_v13 = vmax.f32 %v691_v9, 0.0  ;;  %v4952_v14 = vpop.f32.mrb[19].mxu0  ;;  %v1309_v15 = vsel %vm1268_vm5, %v1300_v43, %v5947_v57  ;;  %v4996_v19 = vpop.f32.mrb[19].mxu1  ;;  %v5989_v56 = vsel %vm618_vm1, %v931_v59, %v8130_v16 }
 0x13f   : > { %8376 = vst [vmem:[#allocation9_spill] sm:$0xff] %v5951_v63  ;;  %5034 = vmatmul.mubr.bf16.vlgmr.msra.gmra.mrb[44].mxu0 %v1309_v15  ;;  %v5961_v21 = vor.u32 %v1290_v10, %v1287_v60  ;;  %v1127_v25 = vsel %vm1118_vm3, %v1124_v7, %v1126_v4  ;;  %v983_v28 = vrot.slane %v5951_v63, 1  ;;  %v5978_v7 = vshrl.u32 %v5945_v49, 16  ;;  %v5438_v19 = vld [vmem:[#allocation2 + $0x8] sm:$0xff]   ;;  %v5439_v49 = vld [vmem:[#allocation2 + $0x10] sm:$0xff]  }
 0x140   : > { %v5968_v32 = vpack.c.bf16 %v831_v13, %v830_v12  ;;  %5118 = vmatpush3.bf16.msra.mxu0 %v5437_v61  ;;  %5037 = vmatprep.mubr.msk.bf16.mxu0 %vm5584_vm0, %v8138_v0  ;;  %v5972_v38 = vshrl.u32 %v1127_v25, 16  ;;  %v5974_v39 = vshll.u32 %v1127_v25, 16  ;;  %v6008_v15 = vor.u32 %v1311_v40, %v1310_v11 }
 0x141   : > { %8377 = vst [vmem:[#allocation10_spill] sm:$0xff] %v5978_v7  ;;  %v1292_v22 = vsel %vm1268_vm5, %v1283_v58, %v5961_v21  ;;  %v984_v43 = vsel %vm950_vm4, %v979_v26, %v983_v28  ;;  %5119 = vmatprep.subr.bf16.mxu0 %v8138_v0 }
 0x142   : > { %v913_v60 = vrot.slane %v5968_v32, 4  ;;  %1967 = vmatprep.mubr.bf16.mxu1 %v1292_v22  ;;  %v1326_v61 = vrot.slane %v5972_v38, 3  ;;  %v1329_v62 = vrot.slane %v5974_v39, 4  ;;  %v5994_v9 = vshrl.u32 %v984_v43, 16 }
 0x143   : > { %1968 = vmatmul.mubr.bf16.vlgmr.msra.gmra.mrb[40].mxu1 %v1275_v46  ;;  %v696_v58 = vpop.f32.mrb[20].mxu0  ;;  %v5996_v10 = vshll.u32 %v984_v43, 16  ;;  %v5998_v12 = vpop.f32.mrb[20].mxu1  ;;  %v5443_v46 = vld [vmem:[#allocation2 + $0x90] sm:$0xff]  }
 0x144   : > { %v6003_v50 = vsel %vm618_vm1, %v911_v36, %v913_v60  ;;  %2813 = vmatpush1.bf16.msra.mxu1 %v5436_v23  ;;  %v4955_v59 = vpop.f32.mrb[21].mxu0  ;;  %v6005_v13 = vor.u32 %v1329_v62, %v1326_v61  ;;  %v1317_v14 = vrot.slane %v5994_v9, 3  ;;  %5120 = vmatpush3.bf16.msra.mxu0 %v5440_v42  ;;  %v4999_v25 = vpop.f32.mrb[21].mxu1  ;;  %v1332_v23 = vrot.slane %v5978_v7, 3 }
 0x145   : > { %v6011_v26 = vshll.u32 %v6003_v50, 16  ;;  %v8131_v22 = vrot.slane %v6003_v50, 1  ;;  %v699_v43 = vpop.f32.mrb[22].mxu0  ;;  %v1320_v36 = vrot.slane %v5996_v10, 4  ;;  %2814 = vmatprep.subr.bf16.mxu1 %v8132_v8  ;;  %5121 = vmatprep.subr.bf16.mxu0 %v8138_v0  ;;  %v6018_v11 = vpop.f32.mrb[22].mxu1  ;;  %v832_v40 = vmax.f32 %v696_v58, 0.0 }
 0x146   : > { %v833_v42 = vmax.f32 %v699_v43, 0.0  ;;  %v4956_v61 = vpop.f32.mrb[23].mxu0  ;;  %v1331_v62 = vsel %vm1268_vm5, %v5947_v57, %v6005_v13  ;;  %v1333_v59 = vrot.slane %v5951_v63, 4  ;;  %v5000_v25 = vpop.f32.mrb[23].mxu1  ;;  %v987_v58 = vor.u32 %v5978_v7, %v983_v28 }
 0x147   : > { %8378 = vst [vmem:[#allocation11_spill] sm:$0xff] %v6011_v26  ;;  %5038 = vmatmul.mubr.bf16.gmra.mrb[48].mxu0 %v1331_v62  ;;  %v6024_v52 = vor.u32 %v1320_v36, %v1317_v14  ;;  %v1129_v51 = vsel %vm1118_vm3, %v1126_v4, %v8131_v22  ;;  %v991_v43 = vrot.slane %v6011_v26, 1  ;;  %v6034_v61 = vshrl.u32 %v6003_v50, 16 }
 0x148   : > { %v6036_v57 = vpack.c.bf16 %v833_v42, %v832_v40  ;;  %2815 = vmatpush1.bf16.msra.mxu1 %v5438_v19  ;;  %5041 = vmatprep.mubr.msk.bf16.mxu0 %vm5584_vm0, %v8138_v0  ;;  %v6040_v14 = vshrl.u32 %v1129_v51, 16  ;;  %v6042_v36 = vshll.u32 %v1129_v51, 16  ;;  %v1313_v28 = vsel %vm1268_vm5, %v5903_v3, %v6008_v15  ;;  %v5446_v42 = vld [vmem:[#allocation2 + $0x98] sm:$0xff]  }
 0x149   : > { %8379 = vst [vmem:[#allocation12_spill] sm:$0xff] %v6034_v61  ;;  %v1322_v4 = vsel %vm1268_vm5, %v5961_v21, %v6024_v52  ;;  %v992_v40 = vsel %vm950_vm4, %v987_v58, %v991_v43  ;;  %2816 = vmatprep.subr.bf16.mxu1 %v8132_v8  ;;  %5122 = vmatpush3.bf16.msra.mxu0 %v5443_v46  ;;  %v852_v19 = vmax.f32 %v5942_v48, 0.0  ;;  %v853_v48 = vmax.f32 %v5956_v54, 0.0  ;;  %v5449_v54 = vld [vmem:[#allocation2 + $0xa0] sm:$0xff]  }
 0x14a   : > { %8380 = vst [vmem:[#allocation13_spill] sm:$0xff] %v6040_v14  ;;  %8381 = vst [vmem:[#allocation14_spill] sm:$0xff] %v6042_v36  ;;  %v8129_v51 = vrot.slane %v6036_v57, 4  ;;  %1975 = vmatprep.mubr.bf16.mxu1 %v1322_v4  ;;  %v1348_v62 = vrot.slane %v6040_v14, 3  ;;  %v1351_v25 = vrot.slane %v6042_v36, 4  ;;  %v6056_v21 = vshrl.u32 %v992_v40, 16  ;;  %5123 = vmatprep.subr.bf16.mxu0 %v8138_v0 }
 0x14b   : > { %1976 = vmatmul.mubr.bf16.gmra.mrb[44].mxu1 %v1313_v28  ;;  %v704_v3 = vpop.f32.mrb[24].mxu0  ;;  %v6059_v58 = vshll.u32 %v992_v40, 16  ;;  %v6061_v1 = vor.u32 %v1333_v59, %v1332_v23  ;;  %v6064_v46 = vpop.f32.mrb[24].mxu1  ;;  %v1354_v23 = vrot.slane %v6034_v61, 3  ;;  %v5441_v59 = vld [vmem:[#allocation2 + $0x18] sm:$0xff]   ;;  %v6089_v16 = vpack.c.bf16 %v853_v48, %v852_v19  ;;  %v5450_v36 = vld [vmem:[#allocation2 + $0x48] sm:$0xff]  }
 0x14c   : > { %8382 = vst [vmem:[#allocation15_spill] sm:$0xff] %v6056_v21  ;;  %v6071_v4 = vsel %vm618_vm1, %v913_v60, %v8129_v51  ;;  %v4959_v55 = vpop.f32.mrb[25].mxu0  ;;  %v6073_v33 = vor.u32 %v1351_v25, %v1348_v62  ;;  %v1339_v28 = vrot.slane %v6056_v21, 3  ;;  %2817 = vmatpush1.bf16.msra.mxu1 %v5439_v49  ;;  %v5003_v40 = vpop.f32.mrb[25].mxu1  ;;  %v834_v49 = vmax.f32 %v704_v3, 0.0 }
 0x14d   : > { %8383 = vst [vmem:[#allocation16_spill] sm:$0xff] %v6059_v58  ;;  %v6078_v24 = vshll.u32 %v6071_v4, 16  ;;  %v707_v32 = vpop.f32.mrb[26].mxu0  ;;  %v1342_v60 = vrot.slane %v6059_v58, 4  ;;  %v1355_v55 = vrot.slane %v6011_v26, 4  ;;  %2818 = vmatprep.subr.bf16.mxu1 %v8132_v8  ;;  %5124 = vmatpush3.bf16.msra.mxu0 %v5446_v42  ;;  %v6084_v62 = vpop.f32.mrb[26].mxu1 }
 0x14e   : > { %v835_v25 = vmax.f32 %v707_v32, 0.0  ;;  %v4960_v51 = vpop.f32.mrb[27].mxu0  ;;  %v1353_v40 = vsel %vm1268_vm5, %v6005_v13, %v6073_v33  ;;  %v5004_v22 = vpop.f32.mrb[27].mxu1  ;;  %5125 = vmatprep.subr.bf16.mxu0 %v8138_v0  ;;  %v8385_v8 = vrot.slane %v6071_v4, 1  ;;  %v8386_v42 = vrot.slane %v6003_v50, 1  ;;  %v5442_v50 = vld [vmem:[#allocation2 + $0x20] sm:$0xff]  }
 0x14f   : > { %8384 = vst [vmem:[#allocation17_spill] sm:$0xff] %v6078_v24  ;;  %5042 = vmatmul.mubr.bf16.gmra.mrb[52].mxu0 %v1353_v40  ;;  %v6092_v20 = vor.u32 %v1342_v60, %v1339_v28  ;;  %v995_v51 = vor.u32 %v6034_v61, %v991_v43  ;;  %v999_v32 = vrot.slane %v6078_v24, 1  ;;  %v6102_v13 = vshrl.u32 %v6071_v4, 16 }
 0x150   : > { %v1131_v3 = vsel %vm1118_vm3, %v8386_v42, %v8385_v8  ;;  %v6104_v19 = vpack.c.bf16 %v835_v25, %v834_v49  ;;  %5045 = vmatprep.mubr.msk.bf16.mxu0 %vm5584_vm0, %v8138_v0  ;;  %2819 = vmatpush1.bf16.msra.mxu1 %v5441_v59  ;;  %v1335_v43 = vsel %vm1268_vm5, %v6008_v15, %v6061_v1  ;;  %v8390_v60 = vmov 0   ;;  %v5452_v25 = vld [vmem:[#allocation2 + $0xa8] sm:$0xff]  }
 0x151   : > { %8387 = vst [vmem:[#allocation18_spill] sm:$0xff] %v6102_v13  ;;  %v6108_v22 = vshrl.u32 %v1131_v3, 16  ;;  %v6110_v48 = vshll.u32 %v1131_v3, 16  ;;  %v1344_v8 = vsel %vm1268_vm5, %v6024_v52, %v6092_v20  ;;  %v1000_v28 = vsel %vm950_vm4, %v995_v51, %v999_v32  ;;  %2820 = vmatprep.subr.bf16.mxu1 %v8390_v60  ;;  %5126 = vmatpush3.bf16.msra.mxu0 %v5449_v54 }
 0x152   : > { %v8140_v49 = vrot.slane %v6089_v16, 4  ;;  %1983 = vmatprep.mubr.bf16.mxu1 %v1344_v8  ;;  %v6124_v52 = vshrl.u32 %v1000_v28, 16  ;;  %5127 = vmatprep.subr.bf16.mxu0 %v8138_v0  ;;  %v6127_v3 = vshll.u32 %v1000_v28, 16  ;;  %v6129_v51 = vor.u32 %v1355_v55, %v1354_v23 }
 0x153   : > { %8388 = vst [vmem:[#allocation19_spill] sm:$0xff] %v6108_v22  ;;  %8389 = vst [vmem:[#allocation20_spill] sm:$0xff] %v6110_v48  ;;  %v1370_v59 = vrot.slane %v6108_v22, 3  ;;  %v1373_v42 = vrot.slane %v6110_v48, 4  ;;  %1984 = vmatmul.mubr.bf16.gmra.mrb[48].mxu1 %v1335_v43  ;;  %v712_v15 = vpop.f32.mrb[28].mxu0  ;;  %v8393_v54 = vrot.slane %v5940_v47, 4 }
 0x154   : > { %8391 = vst [vmem:[#allocation21_spill] sm:$0xff] %v6124_v52  ;;  %8392 = vst [vmem:[#allocation22_spill] sm:$0xff] %v6127_v3  ;;  %v854_v40 = vmax.f32 %v5998_v12, 0.0  ;;  %v6139_v26 = vpop.f32.mrb[28].mxu1  ;;  %v8394_v61 = vrot.slane %v6104_v19, 4  ;;  %v8395_v43 = vrot.slane %v6036_v57, 4  ;;  %2821 = vmatpush1.bf16.msra.mxu1 %v5442_v50 }
 0x155   : > { %v6136_v8 = vsel %vm618_vm1, %v8393_v54, %v8140_v49  ;;  %v4963_v23 = vpop.f32.mrb[29].mxu0  ;;  %v6148_v55 = vor.u32 %v1373_v42, %v1370_v59  ;;  %v1361_v0 = vrot.slane %v6124_v52, 3  ;;  %v1376_v47 = vrot.slane %v6102_v13, 3  ;;  %v5444_v54 = vld [vmem:[#allocation2 + $0x28] sm:$0xff]   ;;  %v5007_v49 = vpop.f32.mrb[29].mxu1  ;;  %v5455_v12 = vld [vmem:[#allocation2 + $0xb0] sm:$0xff]   ;;  %2822 = vmatprep.subr.bf16.mxu1 %v8390_v60  ;;  %5128 = vmatpush3.bf16.msra.mxu0 %v5452_v25 }
 0x156   : > { %v6146_v28 = vsel %vm618_vm1, %v8395_v43, %v8394_v61  ;;  %v715_v57 = vpop.f32.mrb[30].mxu0  ;;  %v1364_v61 = vrot.slane %v6127_v3, 4  ;;  %v1377_v43 = vrot.slane %v6078_v24, 4  ;;  %v6159_v59 = vpop.f32.mrb[30].mxu1  ;;  %v836_v42 = vmax.f32 %v712_v15, 0.0 }
 0x157   : > { %v6153_v48 = vshll.u32 %v6146_v28, 16  ;;  %v837_v50 = vmax.f32 %v715_v57, 0.0  ;;  %v4964_v23 = vpop.f32.mrb[31].mxu0  ;;  %v1375_v49 = vsel %vm1268_vm5, %v6073_v33, %v6148_v55  ;;  %v1003_v52 = vor.u32 %v6102_v13, %v999_v32  ;;  %v5008_v22 = vpop.f32.mrb[31].mxu1 }
 0x158   : > { %v8397_v63 = vmov 0.0   ;;  %5046 = vmatmul.mubr.bf16.gmra.mrb[56].mxu0 %v1375_v49  ;;  %v6166_v3 = vor.u32 %v1364_v61, %v1361_v0  ;;  %v8398_v24 = vrot.slane %v6146_v28, 1  ;;  %v8399_v7 = vrot.slane %v6071_v4, 1  ;;  %2823 = vmatpush1.bf16.msra.mxu1 %v5444_v54  ;;  %v5445_v4 = vld [vmem:[#allocation2 + $0x30] sm:$0xff]   ;;  %v5458_v61 = vld [vmem:[#allocation2 + $0xb8] sm:$0xff]  }
 0x159   : > { %8396 = vst [vmem:[#allocation23_spill] sm:$0xff] %v6153_v48  ;;  %5129 = vmatprep.subr.bf16.mxu0 %v8397_v63  ;;  %v1007_v15 = vrot.slane %v6153_v48, 1  ;;  %v855_v57 = vmax.f32 %v6018_v11, 0.0  ;;  %v6176_v33 = vshrl.u32 %v6146_v28, 16  ;;  %v6178_v32 = vpack.c.bf16 %v837_v50, %v836_v42  ;;  %5049 = vmatprep.mubr.msk.bf16.mxu0 %vm5584_vm0, %v8397_v63 }
 0x15a   : > { %v1133_v25 = vsel %vm1118_vm3, %v8399_v7, %v8398_v24  ;;  %v1366_v24 = vsel %vm1268_vm5, %v6092_v20, %v6166_v3  ;;  %v1357_v7 = vsel %vm1268_vm5, %v6061_v1, %v6129_v51  ;;  %2824 = vmatprep.subr.bf16.mxu1 %v8390_v60  ;;  %5130 = vmatpush3.bf16.msra.mxu0 %v5455_v12 }
 0x15b   : > { %8400 = vst [vmem:[#allocation24_spill] sm:$0xff] %v6176_v33  ;;  %v6182_v0 = vshrl.u32 %v1133_v25, 16  ;;  %v6184_v22 = vshll.u32 %v1133_v25, 16  ;;  %v1008_v11 = vsel %vm950_vm4, %v1003_v52, %v1007_v15  ;;  %v8161_v42 = vrot.slane %v6178_v32, 4  ;;  %1991 = vmatprep.mubr.bf16.mxu1 %v1366_v24  ;;  %5131 = vmatprep.subr.bf16.mxu0 %v8397_v63  ;;  %v720_v20 = vpop.f32.mrb[32].mxu0  ;;  %v6206_v12 = vpop.f32.mrb[32].mxu1 }
 0x15c   : > { %v6197_v23 = vshrl.u32 %v1008_v11, 16  ;;  %1992 = vmatmul.mubr.bf16.gmra.mrb[52].mxu1 %v1357_v7  ;;  %v6200_v1 = vshll.u32 %v1008_v11, 16  ;;  %v6202_v52 = vor.u32 %v1377_v43, %v1376_v47  ;;  %v6204_v49 = vpack.c.bf16 %v855_v57, %v854_v40  ;;  %v4967_v13 = vpop.f32.mrb[33].mxu0  ;;  %v5447_v47 = vld [vmem:[#allocation2 + $0x38] sm:$0xff]   ;;  %v5011_v40 = vpop.f32.mrb[33].mxu1 }
 0x15d   : > { %8401 = vst [vmem:[#allocation25_spill] sm:$0xff] %v6182_v0  ;;  %8402 = vst [vmem:[#allocation26_spill] sm:$0xff] %v6184_v22  ;;  %v1392_v54 = vrot.slane %v6182_v0, 3  ;;  %v1395_v50 = vrot.slane %v6184_v22, 4  ;;  %v8405_v25 = vrot.slane %v6104_v19, 4  ;;  %v1398_v11 = vrot.slane %v6176_v33, 3  ;;  %2825 = vmatpush1.bf16.msra.mxu1 %v5445_v4 }
 0x15e   : > { %8403 = vst [vmem:[#allocation27_spill] sm:$0xff] %v6197_v23  ;;  %8404 = vst [vmem:[#allocation28_spill] sm:$0xff] %v6200_v1  ;;  %v1383_v7 = vrot.slane %v6197_v23, 3  ;;  %v723_v0 = vpop.f32.mrb[34].mxu0  ;;  %v1386_v19 = vrot.slane %v6200_v1, 4  ;;  %2826 = vmatprep.subr.bf16.mxu1 %v8390_v60  ;;  %v6226_v13 = vpop.f32.mrb[34].mxu1  ;;  %5132 = vmatpush3.bf16.msra.mxu0 %v5458_v61 }
 0x15f   : > { %v6213_v24 = vsel %vm618_vm1, %v8405_v25, %v8161_v42  ;;  %v6215_v22 = vor.u32 %v1395_v50, %v1392_v54  ;;  %v1399_v25 = vrot.slane %v6153_v48, 4  ;;  %v838_v54 = vmax.f32 %v720_v20, 0.0  ;;  %v4968_v4 = vpop.f32.mrb[35].mxu0  ;;  %v5012_v57 = vpop.f32.mrb[35].mxu1  ;;  %5217 = vmatprep.subr.bf16.mxu0 %v8397_v63 }
 0x160   : > { %v6220_v43 = vshll.u32 %v6213_v24, 16  ;;  %v839_v50 = vmax.f32 %v723_v0, 0.0  ;;  %v8168_v42 = vrot.slane %v6204_v49, 4  ;;  %v1387_v1 = vor.u32 %v1386_v19, %v1383_v7 }
 0x161   : > { %v1397_v40 = vsel %vm1268_vm5, %v6148_v55, %v6215_v22  ;;  %v8407_v48 = vrot.slane %v6213_v24, 1  ;;  %v8408_v23 = vrot.slane %v6146_v28, 1  ;;  %v1011_v0 = vor.u32 %v6176_v33, %v1007_v15  ;;  %2827 = vmatpush1.bf16.msra.mxu1 %v5447_v47  ;;  %v5448_v28 = vld [vmem:[#allocation2 + $0x40] sm:$0xff]  }
 0x162   : > { %8406 = vst [vmem:[#allocation29_spill] sm:$0xff] %v6220_v43  ;;  %5050 = vmatmul.mubr.bf16.gmra.mrb[60].mxu0 %v1397_v40  ;;  %v1015_v20 = vrot.slane %v6220_v43, 1  ;;  %v6241_v4 = vshrl.u32 %v6213_v24, 16  ;;  %v6243_v55 = vpack.c.bf16 %v839_v50, %v838_v54  ;;  %v1379_v15 = vsel %vm1268_vm5, %v6129_v51, %v6202_v52  ;;  %2828 = vmatprep.subr.bf16.mxu1 %v8390_v60 }
 0x163   : > { %v1135_v61 = vsel %vm1118_vm3, %v8408_v23, %v8407_v48  ;;  %5053 = vmatprep.mubr.msk.bf16.mxu0 %vm5584_vm0, %v8397_v63  ;;  %v1388_v48 = vsel %vm1268_vm5, %v6166_v3, %v1387_v1  ;;  %v8412_v19 = vrot.slane %v6089_v16, 4  ;;  %v728_v51 = vpop.f32.mrb[36].mxu0  ;;  %v6274_v16 = vshrl.u32 %v5871_v30, 16 }
 0x164   : > { %8409 = vst [vmem:[#allocation30_spill] sm:$0xff] %v6241_v4  ;;  %v6247_v57 = vshrl.u32 %v1135_v61, 16  ;;  %v6249_v7 = vshll.u32 %v1135_v61, 16  ;;  %v1016_v23 = vsel %vm950_vm4, %v1011_v0, %v1015_v20  ;;  %v921_v47 = vrot.slane %v6243_v55, 4  ;;  %1999 = vmatprep.mubr.bf16.mxu1 %v1388_v48  ;;  %v6280_v55 = vpop.f32.mrb[36].mxu1  ;;  %v4971_v33 = vpop.f32.mrb[37].mxu0 }
 0x165   : > { %v6262_v54 = vsel %vm618_vm1, %v8412_v19, %v8168_v42  ;;  %v6268_v40 = vshrl.u32 %v1016_v23, 16  ;;  %2000 = vmatmul.mubr.bf16.gmra.mrb[56].mxu1 %v1379_v15  ;;  %v6271_v61 = vshll.u32 %v5871_v30, 16  ;;  %8415 = vst [vmem:[#allocation35_spill] sm:$0xff] %v6274_v16  ;;  %v6276_v0 = vshll.u32 %v1016_v23, 16  ;;  %v5015_v23 = vpop.f32.mrb[37].mxu1  ;;  %v731_v14 = vpop.f32.mrb[38].mxu0 }
 0x166   : > { %8410 = vst [vmem:[#allocation31_spill] sm:$0xff] %v6247_v57  ;;  %8411 = vst [vmem:[#allocation32_spill] sm:$0xff] %v6249_v7  ;;  %v1414_v3 = vrot.slane %v6247_v57, 3  ;;  %v1417_v50 = vrot.slane %v6249_v7, 4  ;;  %v6278_v19 = vor.u32 %v1399_v25, %v1398_v11  ;;  %v8417_v48 = vrot.slane %v6178_v32, 4  ;;  %2829 = vmatpush1.bf16.msra.mxu1 %v5448_v28  ;;  %v819_v33 = vpop.f32.mrb[38].mxu1 }
 0x167   : > { %8413 = vst [vmem:[#allocation33_spill] sm:$0xff] %v6268_v40  ;;  %8414 = vst [vmem:[#allocation34_spill] sm:$0xff] %v6271_v61  ;;  %v1405_v7 = vrot.slane %v6268_v40, 3  ;;  %v1420_v57 = vrot.slane %v6241_v4, 3  ;;  %v1408_v32 = vrot.slane %v6276_v0, 4  ;;  %2830 = vmatprep.subr.bf16.mxu1 %v8390_v60  ;;  %v4972_v40 = vpop.f32.mrb[39].mxu0  ;;  %v1019_v23 = vor.u32 %v6241_v4, %v1015_v20 }
 0x168   : > { %8416 = vst [vmem:[#allocation36_spill] sm:$0xff] %v6276_v0  ;;  %v6285_v42 = vsel %vm618_vm1, %v8417_v48, %v921_v47  ;;  %v6287_v15 = vor.u32 %v1417_v50, %v1414_v3  ;;  %v1421_v48 = vrot.slane %v6220_v43, 4  ;;  %v840_v3 = vmax.f32 %v728_v51, 0.0  ;;  %v5016_v58 = vpop.f32.mrb[39].mxu1  ;;  %v5451_v20 = vld [vmem:[#allocation2 + $0x50] sm:$0xff]  }
 0x169   : > { %v6292_v11 = vshll.u32 %v6285_v42, 16  ;;  %v1136_v25 = vrot.slane %v6285_v42, 1  ;;  %v841_v50 = vmax.f32 %v731_v14, 0.0  ;;  %v6303_v21 = vshrl.u32 %v6285_v42, 16 }
 0x16a   : > { %v1419_v28 = vsel %vm1268_vm5, %v6215_v22, %v6287_v15  ;;  %v1409_v0 = vor.u32 %v1408_v32, %v1405_v7  ;;  %v8420_v43 = vrot.slane %v6213_v24, 1  ;;  %v1401_v22 = vsel %vm1268_vm5, %v6202_v52, %v6278_v19  ;;  %2831 = vmatpush1.bf16.msra.mxu1 %v5450_v36 }
 0x16b   : > { %8418 = vst [vmem:[#allocation37_spill] sm:$0xff] %v6292_v11  ;;  %8419 = vst [vmem:[#allocation38_spill] sm:$0xff] %v6303_v21  ;;  %5054 = vmatmul.mubr.bf16.gmra.mrb[64].mxu0 %v1419_v28  ;;  %v1023_v51 = vrot.slane %v6292_v11, 1  ;;  %v6309_v14 = vpack.c.bf16 %v841_v50, %v840_v3  ;;  %v6322_v7 = vor.u32 %v1421_v48, %v1420_v57  ;;  %v856_v40 = vmax.f32 %v6064_v46, 0.0 }
 0x16c   : > { %v1137_v5 = vsel %vm1118_vm3, %v8420_v43, %v1136_v25  ;;  %5057 = vmatprep.mubr.msk.bf16.mxu0 %vm5584_vm0, %v8397_v63  ;;  %v1410_v24 = vsel %vm1268_vm5, %v1387_v1, %v1409_v0  ;;  %2832 = vmatprep.subr.bf16.mxu1 %v8390_v60  ;;  %v736_v1 = vpop.f32.mrb[40].mxu0  ;;  %v1442_v57 = vrot.slane %v6303_v21, 3  ;;  %v857_v46 = vmax.f32 %v6084_v62, 0.0 }
 0x16d   : > { %v6316_v58 = vshrl.u32 %v1137_v5, 16  ;;  %v6318_v42 = vshll.u32 %v1137_v5, 16  ;;  %v1024_v43 = vsel %vm950_vm4, %v1019_v23, %v1023_v51  ;;  %v923_v52 = vrot.slane %v6309_v14, 4  ;;  %2007 = vmatprep.mubr.bf16.mxu1 %v1410_v24  ;;  %v4975_v50 = vpop.f32.mrb[41].mxu0  ;;  %v5453_v24 = vld [vmem:[#allocation2 + $0x58] sm:$0xff]  }
 0x16e   : > { %v6329_v33 = vshrl.u32 %v1024_v43, 16  ;;  %2008 = vmatmul.mubr.bf16.gmra.mrb[60].mxu1 %v1401_v22  ;;  %v6332_v3 = vshll.u32 %v1024_v43, 16  ;;  %v1443_v14 = vrot.slane %v6292_v11, 4  ;;  %v739_v36 = vpop.f32.mrb[42].mxu0  ;;  %v1423_v62 = vsel %vm1268_vm5, %v6278_v19, %v6322_v7 }
 0x16f   : > { %8421 = vst [vmem:[#allocation39_spill] sm:$0xff] %v6316_v58  ;;  %8422 = vst [vmem:[#allocation40_spill] sm:$0xff] %v6318_v42  ;;  %v1436_v32 = vrot.slane %v6316_v58, 3  ;;  %v1439_v5 = vrot.slane %v6318_v42, 4  ;;  %v6337_v48 = vsel %vm618_vm1, %v921_v47, %v923_v52  ;;  %2833 = vmatpush1.bf16.msra.mxu1 %v5451_v20  ;;  %v842_v47 = vmax.f32 %v736_v1, 0.0 }
 0x170   : > { %8423 = vst [vmem:[#allocation41_spill] sm:$0xff] %v6329_v33  ;;  %8424 = vst [vmem:[#allocation42_spill] sm:$0xff] %v6332_v3  ;;  %v1427_v23 = vrot.slane %v6329_v33, 3  ;;  %v6342_v22 = vshll.u32 %v6337_v48, 16  ;;  %v1138_v43 = vrot.slane %v6337_v48, 1  ;;  %v1430_v4 = vrot.slane %v6332_v3, 4  ;;  %2834 = vmatprep.subr.bf16.mxu1 %v8390_v60 }
 0x171   : > { %v1440_v28 = vor.u32 %v1439_v5, %v1436_v32  ;;  %v843_v32 = vmax.f32 %v739_v36, 0.0  ;;  %v4976_v5 = vpop.f32.mrb[43].mxu0  ;;  %v6352_v50 = vpack.c.bf16 %v857_v46, %v856_v40  ;;  %v1027_v58 = vor.u32 %v6303_v21, %v1023_v51 }
 0x172   : > { %8425 = vst [vmem:[#allocation43_spill] sm:$0xff] %v6342_v22  ;;  %v1431_v11 = vor.u32 %v1430_v4, %v1427_v23  ;;  %v1139_v42 = vsel %vm1118_vm3, %v1136_v25, %v1138_v43  ;;  %v1031_v3 = vrot.slane %v6342_v22, 1  ;;  %v6363_v1 = vor.u32 %v1443_v14, %v1442_v57 }
 0x173   : > { %v1441_v20 = vsel %vm1268_vm5, %v6287_v15, %v1440_v28  ;;  %v873_v33 = vpack.c.bf16 %v843_v32, %v842_v47  ;;  %v6359_v19 = vshrl.u32 %v1139_v42, 16  ;;  %v6361_v36 = vshll.u32 %v1139_v42, 16  ;;  %2835 = vmatpush1.bf16.msra.mxu1 %v5453_v24  ;;  %v5454_v15 = vld [vmem:[#allocation2 + $0x60] sm:$0xff]  }
 0x174   : > { %5058 = vmatmul.mubr.bf16.gmra.mrb[68].mxu0 %v1441_v20  ;;  %v6366_v4 = vshrl.u32 %v6337_v48, 16  ;;  %v1432_v25 = vsel %vm1268_vm5, %v1409_v0, %v1431_v11  ;;  %v1032_v51 = vsel %vm950_vm4, %v1027_v58, %v1031_v3  ;;  %v8203_v40 = vrot.slane %v6352_v50, 4  ;;  %2836 = vmatprep.subr.bf16.mxu1 %v8390_v60  ;;  %v5456_v20 = vld [vmem:[#allocation2 + $0x68] sm:$0xff]  }
 0x175   : > { %5061 = vmatprep.mubr.msk.bf16.mxu0 %vm5584_vm0, %v8397_v63  ;;  %8426 = vst [vmem:[#allocation44_spill] sm:$0xff] %v6359_v19  ;;  %8427 = vst [vmem:[#allocation45_spill] sm:$0xff] %v6361_v36  ;;  %v925_v46 = vrot.slane %v873_v33, 4  ;;  %2015 = vmatprep.mubr.bf16.mxu1 %v1432_v25  ;;  %v1458_v42 = vrot.slane %v6359_v19, 3  ;;  %v1461_v57 = vrot.slane %v6361_v36, 4  ;;  %v6374_v23 = vshrl.u32 %v1032_v51, 16 }
 0x176   : > { %8428 = vst [vmem:[#allocation46_spill] sm:$0xff] %v6366_v4  ;;  %2016 = vmatmul.mubr.bf16.gmra.mrb[64].mxu1 %v1423_v62  ;;  %v6376_v14 = vshll.u32 %v1032_v51, 16  ;;  %v8431_v0 = vrot.slane %v6204_v49, 4  ;;  %v8432_v47 = vrot.slane %v5854_v2, 4  ;;  %v1445_v51 = vsel %vm1268_vm5, %v6322_v7, %v6363_v1 }
 0x177   : > { %8429 = vst [vmem:[#allocation47_spill] sm:$0xff] %v6374_v23  ;;  %v926_v24 = vsel %vm618_vm1, %v923_v52, %v925_v46  ;;  %v1462_v62 = vor.u32 %v1461_v57, %v1458_v42  ;;  %v1449_v5 = vrot.slane %v6374_v23, 3  ;;  %2837 = vmatpush1.bf16.msra.mxu1 %v5454_v15  ;;  %v1464_v52 = vrot.slane %v6366_v4, 3 }
 0x178   : > { %8430 = vst [vmem:[#allocation48_spill] sm:$0xff] %v6376_v14  ;;  %v6383_v58 = vsel %vm618_vm1, %v8431_v0, %v8203_v40  ;;  %v6391_v32 = vsel %vm618_vm1, %v925_v46, %v8432_v47  ;;  %v6394_v49 = vshll.u32 %v926_v24, 16  ;;  %2838 = vmatprep.subr.bf16.mxu1 %v8390_v60  ;;  %v1140_v2 = vrot.slane %v926_v24, 1 }
 0x179   : > { %v6397_v25 = vshll.u32 %v6391_v32, 16  ;;  %v1142_v46 = vrot.slane %v6391_v32, 1  ;;  %v1463_v42 = vsel %vm1268_vm5, %v1440_v28, %v1462_v62  ;;  %v1452_v15 = vrot.slane %v6376_v14, 4 }
 0x17a   : > { %8433 = vst [vmem:[#allocation49_spill] sm:$0xff] %v6394_v49  ;;  %v1039_v57 = vrot.slane %v6394_v49, 1  ;;  %v6408_v0 = vshrl.u32 %v926_v24, 16  ;;  %v1035_v47 = vor.u32 %v6366_v4, %v1031_v3  ;;  %v1465_v7 = vrot.slane %v6342_v22, 4 }
 0x17b   : > { %8434 = vst [vmem:[#allocation50_spill] sm:$0xff] %v6397_v25  ;;  %v1047_v40 = vrot.slane %v6397_v25, 1  ;;  %v1453_v33 = vor.u32 %v1452_v15, %v1449_v5  ;;  %v1141_v48 = vsel %vm1118_vm3, %v1138_v43, %v1140_v2  ;;  %v1143_v28 = vsel %vm1118_vm3, %v1140_v2, %v1142_v46  ;;  %2839 = vmatpush1.bf16.msra.mxu1 %v5456_v20  ;;  %v5457_v5 = vld [vmem:[#allocation2 + $0x70] sm:$0xff]  }
 0x17c   : > { %8435 = vst [vmem:[#allocation51_spill] sm:$0xff] %v6408_v0  ;;  %5062 = vmatmul.mubr.bf16.gmra.mrb[72].mxu0 %v1463_v42  ;;  %v1043_v21 = vor.u32 %v6408_v0, %v1039_v57  ;;  %v6419_v24 = vshrl.u32 %v6391_v32, 16  ;;  %v6421_v42 = vshrl.u32 %v1141_v48, 16  ;;  %v6423_v3 = vshll.u32 %v1141_v48, 16  ;;  %2840 = vmatprep.subr.bf16.mxu1 %v8390_v60 }
 0x17d   : > { %5065 = vmatprep.mubr.msk.bf16.mxu0 %vm5584_vm0, %v8397_v63  ;;  %v1454_v15 = vsel %vm1268_vm5, %v1431_v11, %v1453_v33  ;;  %v1040_v22 = vsel %vm950_vm4, %v1035_v47, %v1039_v57  ;;  %v6428_v43 = vshrl.u32 %v1143_v28, 16  ;;  %v6430_v2 = vshll.u32 %v1143_v28, 16 }
 0x17e   : > { %8436 = vst [vmem:[#allocation52_spill] sm:$0xff] %v6419_v24  ;;  %8437 = vst [vmem:[#allocation53_spill] sm:$0xff] %v6421_v42  ;;  %2023 = vmatprep.mubr.bf16.mxu1 %v1454_v15  ;;  %v1480_v20 = vrot.slane %v6421_v42, 3  ;;  %v1483_v32 = vrot.slane %v6423_v3, 4  ;;  %v6434_v4 = vshrl.u32 %v1040_v22, 16  ;;  %v6436_v48 = vshll.u32 %v1040_v22, 16 }
 0x17f   : > { %8438 = vst [vmem:[#allocation54_spill] sm:$0xff] %v6423_v3  ;;  %8439 = vst [vmem:[#allocation55_spill] sm:$0xff] %v6428_v43  ;;  %v1051_v36 = vor.u32 %v6419_v24, %v1047_v40  ;;  %2024 = vmatmul.mubr.bf16.gmra.mrb[68].mxu1 %v1445_v51  ;;  %v1466_v19 = vor.u32 %v1465_v7, %v1464_v52  ;;  %v1048_v11 = vsel %vm950_vm4, %v1043_v21, %v1047_v40  ;;  %v5459_v3 = vld [vmem:[#allocation2 + $0x78] sm:$0xff]  }
 0x180   : > { %8440 = vst [vmem:[#allocation56_spill] sm:$0xff] %v6430_v2  ;;  %8441 = vst [vmem:[#allocation57_spill] sm:$0xff] %v6434_v4  ;;  %v859_v57 = vmax.f32 %v6159_v59, 0.0  ;;  %v1484_v47 = vor.u32 %v1483_v32, %v1480_v20  ;;  %v1471_v28 = vrot.slane %v6434_v4, 3  ;;  %v1474_v15 = vrot.slane %v6436_v48, 4  ;;  %2841 = vmatpush1.bf16.msra.mxu1 %v5457_v5 }
 0x181   : > { %8442 = vst [vmem:[#allocation58_spill] sm:$0xff] %v6436_v48  ;;  %v6443_v42 = vshrl.u32 %v1048_v11, 16  ;;  %v6445_v14 = vshll.u32 %v1048_v11, 16  ;;  %v1502_v22 = vrot.slane %v6428_v43, 3  ;;  %v1486_v51 = vrot.slane %v6408_v0, 3  ;;  %2842 = vmatprep.subr.bf16.mxu1 %v8390_v60 }
 0x182   : > { %v1487_v52 = vrot.slane %v6394_v49, 4  ;;  %v1485_v21 = vsel %vm1268_vm5, %v1462_v62, %v1484_v47  ;;  %v1475_v59 = vor.u32 %v1474_v15, %v1471_v28  ;;  %v1505_v7 = vrot.slane %v6430_v2, 4 }
 0x183   : > { %8443 = vst [vmem:[#allocation59_spill] sm:$0xff] %v6443_v42  ;;  %8444 = vst [vmem:[#allocation60_spill] sm:$0xff] %v6445_v14  ;;  %v1493_v40 = vrot.slane %v6443_v42, 3  ;;  %v6455_v5 = vshll.u32 %v5916_v17, 16  ;;  %v1146_v20 = vrot.slane %v5916_v17, 1  ;;  %v1496_v32 = vrot.slane %v6445_v14, 4 }
 0x184   : > { %5066 = vmatmul.mubr.bf16.gmra.mrb[76].mxu0 %v1485_v21  ;;  %v8446_v11 = vrot.slane %v6271_v61, 1  ;;  %v1476_v0 = vsel %vm1268_vm5, %v1453_v33, %v1475_v59  ;;  %v8449_v15 = vrot.slane %v5871_v30, 1  ;;  %2843 = vmatpush1.bf16.msra.mxu1 %v5459_v3  ;;  %v1488_v42 = vor.u32 %v1487_v52, %v1486_v51 }
 0x185   : > { %8445 = vst [vmem:[#allocation61_spill] sm:$0xff] %v6455_v5  ;;  %5069 = vmatprep.mubr.msk.bf16.mxu0 %vm5584_vm0, %v8397_v63  ;;  %2031 = vmatprep.mubr.bf16.mxu1 %v1476_v0  ;;  %v1497_v21 = vor.u32 %v1496_v32, %v1493_v40  ;;  %v1063_v32 = vrot.slane %v6455_v5, 1  ;;  %v6498_v52 = vshll.u32 %v5989_v56, 16 }
 0x186   : > { %v1056_v49 = vsel %vm950_vm4, %v1051_v36, %v8446_v11  ;;  %v1145_v2 = vsel %vm1118_vm3, %v1142_v46, %v8449_v15  ;;  %v8452_v36 = vmov %v8446_v11  ;;  %3747 = vmatprep.subr.bf16.mxu1 %v8390_v60  ;;  %v1506_v11 = vor.u32 %v1505_v7, %v1502_v22 }
 0x187   : > { %v6465_v62 = vshrl.u32 %v1056_v49, 16  ;;  %v6467_v28 = vshll.u32 %v1056_v49, 16  ;;  %v6472_v43 = vshrl.u32 %v1145_v2, 16  ;;  %v6474_v14 = vshll.u32 %v1145_v2, 16  ;;  %8456 = vst [vmem:[#allocation67_spill] sm:$0xff] %v6498_v52 }
 0x188   : > { %v1059_v33 = vor.u32 %v6274_v16, %v8452_v36  ;;  %v1467_v49 = vsel %vm1268_vm5, %v6363_v1, %v1466_v19  ;;  %v8453_v46 = vmax.f32 %v6139_v26, 0.0  ;;  %v1498_v0 = vsel %vm1268_vm5, %v1475_v59, %v1497_v21 }
 0x189   : > { %8447 = vst [vmem:[#allocation62_spill] sm:$0xff] %v6465_v62  ;;  %8448 = vst [vmem:[#allocation63_spill] sm:$0xff] %v6467_v28  ;;  %2032 = vmatmul.mubr.bf16.gmra.mrb[72].mxu1 %v1467_v49  ;;  %v1515_v2 = vrot.slane %v6465_v62, 3  ;;  %v1518_v40 = vrot.slane %v6467_v28, 4  ;;  %v1524_v15 = vrot.slane %v6472_v43, 3  ;;  %v1527_v36 = vrot.slane %v6474_v14, 4 }
 0x18a   : > { %8450 = vst [vmem:[#allocation64_spill] sm:$0xff] %v6472_v43  ;;  %8451 = vst [vmem:[#allocation65_spill] sm:$0xff] %v6474_v14  ;;  %v881_v3 = vpack.c.bf16 %v859_v57, %v8453_v46  ;;  %2039 = vmatprep.mubr.bf16.mxu1 %v1498_v0  ;;  %v8454_v22 = vrot.slane %v5871_v30, 1  ;;  %v6494_v57 = vshrl.u32 %v5916_v17, 16  ;;  %v1064_v51 = vsel %vm950_vm4, %v1059_v33, %v1063_v32 }
 0x18b   : > { %v1507_v59 = vsel %vm1268_vm5, %v1484_v47, %v1506_v11  ;;  %v8457_v7 = vrot.slane %v6352_v50, 4  ;;  %v6506_v46 = vshrl.u32 %v1064_v51, 16  ;;  %v1148_v30 = vrot.slane %v5989_v56, 1 }
 0x18c   : > { %v941_v1 = vrot.slane %v881_v3, 4  ;;  %v1147_v26 = vsel %vm1118_vm3, %v8454_v22, %v1146_v20  ;;  %8455 = vst [vmem:[#allocation66_spill] sm:$0xff] %v6494_v57  ;;  %5070 = vmatmul.mubr.bf16.gmra.mrb[80].mxu0 %v1507_v59  ;;  %v1489_v17 = vsel %vm1268_vm5, %v1466_v19, %v1488_v42  ;;  %v1519_v3 = vor.u32 %v1518_v40, %v1515_v2 }
 0x18d   : > { %8458 = vst [vmem:[#allocation68_spill] sm:$0xff] %v6506_v46  ;;  %5073 = vmatprep.mubr.msk.bf16.mxu0 %vm5584_vm0, %v8397_v63  ;;  %v1528_v33 = vor.u32 %v1527_v36, %v1524_v15  ;;  %v1508_v0 = vrot.slane %v6419_v24, 3  ;;  %v1509_v47 = vrot.slane %v6397_v25, 4  ;;  %v6514_v50 = vshll.u32 %v1064_v51, 16 }
 0x18e   : > { %v6504_v49 = vsel %vm618_vm1, %v8457_v7, %v941_v1  ;;  %v6516_v22 = vshrl.u32 %v1147_v26, 16  ;;  %v6518_v7 = vshll.u32 %v1147_v26, 16  ;;  %v860_v14 = vmax.f32 %v6206_v12, 0.0 }
 0x18f   : > { %8459 = vst [vmem:[#allocation69_spill] sm:$0xff] %v6514_v50  ;;  %v861_v59 = vmax.f32 %v6226_v13, 0.0  ;;  %v1537_v19 = vrot.slane %v6506_v46, 3  ;;  %v1540_v2 = vrot.slane %v6514_v50, 4  ;;  %v1067_v40 = vor.u32 %v6494_v57, %v1063_v32 }
 0x190   : > { %8460 = vst [vmem:[#allocation70_spill] sm:$0xff] %v6516_v22  ;;  %8461 = vst [vmem:[#allocation71_spill] sm:$0xff] %v6518_v7  ;;  %v1071_v15 = vrot.slane %v6498_v52, 1  ;;  %v1520_v36 = vsel %vm1268_vm5, %v1497_v21, %v1519_v3  ;;  %v1149_v25 = vsel %vm1118_vm3, %v1146_v20, %v1148_v30  ;;  %v1510_v26 = vor.u32 %v1509_v47, %v1508_v0 }
 0x191   : > { %2040 = vmatmul.mubr.bf16.gmra.mrb[76].mxu1 %v1489_v17  ;;  %v882_v51 = vpack.c.bf16 %v861_v59, %v860_v14  ;;  %v6530_v13 = vshrl.u32 %v5989_v56, 16  ;;  %v1546_v46 = vrot.slane %v6516_v22, 3  ;;  %v1549_v50 = vrot.slane %v6518_v7, 4 }
 0x192   : > { %2047 = vmatprep.mubr.bf16.mxu1 %v1520_v36  ;;  %v1072_v12 = vsel %vm950_vm4, %v1067_v40, %v1071_v15  ;;  %v6535_v24 = vshll.u32 %v6136_v8, 16  ;;  %v1150_v21 = vrot.slane %v6136_v8, 1  ;;  %v1529_v14 = vsel %vm1268_vm5, %v1506_v11, %v1528_v33 }
 0x193   : > { %8462 = vst [vmem:[#allocation72_spill] sm:$0xff] %v6530_v13  ;;  %v943_v32 = vrot.slane %v882_v51, 4  ;;  %v1541_v20 = vor.u32 %v1540_v2, %v1537_v19  ;;  %v6542_v0 = vshrl.u32 %v1072_v12, 16  ;;  %v6544_v56 = vshll.u32 %v1072_v12, 16 }
 0x194   : > { %8463 = vst [vmem:[#allocation73_spill] sm:$0xff] %v6535_v24  ;;  %5074 = vmatmul.mubr.bf16.gmra.mrb[84].mxu0 %v1529_v14  ;;  %v862_v47 = vmax.f32 %v6280_v55, 0.0  ;;  %v1511_v59 = vsel %vm1268_vm5, %v1488_v42, %v1510_v26  ;;  %v1530_v40 = vrot.slane %v6274_v16, 3  ;;  %v1550_v36 = vor.u32 %v1549_v50, %v1546_v46 }
 0x195   : > { %v6540_v17 = vsel %vm618_vm1, %v941_v1, %v943_v32  ;;  %8464 = vst [vmem:[#allocation74_spill] sm:$0xff] %v6542_v0  ;;  %8465 = vst [vmem:[#allocation75_spill] sm:$0xff] %v6544_v56  ;;  %5077 = vmatprep.mubr.msk.bf16.mxu0 %vm5584_vm0, %v8397_v63  ;;  %v1531_v11 = vrot.slane %v6271_v61, 4  ;;  %v1075_v1 = vor.u32 %v6530_v13, %v1071_v15  ;;  %v6553_v2 = vshrl.u32 %v1149_v25, 16 }
 0x196   : > { %v883_v19 = vpack.c.bf16 %v862_v47, %v862_v47  ;;  %v6555_v51 = vshll.u32 %v1149_v25, 16  ;;  %v1079_v12 = vrot.slane %v6535_v24, 1  ;;  %v1151_v55 = vsel %vm1118_vm3, %v1148_v30, %v1150_v21 }
 0x197   : > { %8466 = vst [vmem:[#allocation76_spill] sm:$0xff] %v6553_v2  ;;  %v1542_v42 = vsel %vm1268_vm5, %v1519_v3, %v1541_v20  ;;  %v1559_v14 = vrot.slane %v6542_v0, 3  ;;  %v1562_v46 = vrot.slane %v6544_v56, 4  ;;  %v6563_v47 = vshrl.u32 %v6136_v8, 16 }
 0x198   : > { %8467 = vst [vmem:[#allocation77_spill] sm:$0xff] %v6555_v51  ;;  %v945_v50 = vrot.slane %v883_v19, 4  ;;  %v6566_v15 = vshll.u32 %v6262_v54, 16  ;;  %v1080_v25 = vsel %vm950_vm4, %v1075_v1, %v1079_v12  ;;  %v1152_v61 = vrot.slane %v6262_v54, 1 }
 0x199   : > { %2048 = vmatmul.mubr.bf16.gmra.mrb[80].mxu1 %v1511_v59  ;;  %8468 = vst [vmem:[#allocation78_spill] sm:$0xff] %v6563_v47  ;;  %v1551_v30 = vsel %vm1268_vm5, %v1528_v33, %v1550_v36  ;;  %v1532_v59 = vor.u32 %v1531_v11, %v1530_v40  ;;  %v1568_v56 = vrot.slane %v6553_v2, 3  ;;  %v1571_v19 = vrot.slane %v6555_v51, 4 }
 0x19a   : > { %8469 = vst [vmem:[#allocation79_spill] sm:$0xff] %v6566_v15  ;;  %2055 = vmatprep.mubr.bf16.mxu1 %v1542_v42  ;;  %v6572_v3 = vsel %vm618_vm1, %v943_v32, %v945_v50  ;;  %v1154_v1 = vrot.slane %v6383_v58, 1  ;;  %v1563_v42 = vor.u32 %v1562_v46, %v1559_v14  ;;  %v6583_v16 = vshrl.u32 %v1080_v25, 16 }
 0x19b   : > { %v6577_v8 = vshll.u32 %v6572_v3, 16  ;;  %v6580_v0 = vshrl.u32 %v6572_v3, 16  ;;  %v6585_v33 = vshll.u32 %v1080_v25, 16  ;;  %v1552_v32 = vrot.slane %v6494_v57, 3 }
 0x19c   : > { %5078 = vmatmul.mubr.bf16.gmra.mrb[88].mxu0 %v1551_v30  ;;  %8470 = vst [vmem:[#allocation80_spill] sm:$0xff] %v6583_v16  ;;  %v1553_v40 = vrot.slane %v6455_v5, 4  ;;  %v6593_v51 = vshrl.u32 %v1151_v55, 16  ;;  %v6595_v2 = vshll.u32 %v1151_v55, 16  ;;  %v1083_v14 = vor.u32 %v6563_v47, %v1079_v12 }
 0x19d   : > { %8471 = vst [vmem:[#allocation81_spill] sm:$0xff] %v6585_v33  ;;  %5081 = vmatprep.mubr.msk.bf16.mxu0 %vm5584_vm0, %v8397_v63  ;;  %v3490_v11 = vrot.slane %v6580_v0, 4  ;;  %v3491_v50 = vrot.slane %v6577_v8, 5  ;;  %v1087_v46 = vrot.slane %v6566_v15, 1  ;;  %v1533_v25 = vsel %vm1268_vm5, %v1510_v26, %v1532_v59 }
 0x19e   : > { %8472 = vst [vmem:[#allocation82_spill] sm:$0xff] %v6593_v51  ;;  %8473 = vst [vmem:[#allocation83_spill] sm:$0xff] %v6595_v2  ;;  %v1572_v30 = vor.u32 %v1571_v19, %v1568_v56  ;;  %v1153_v57 = vsel %vm1118_vm3, %v1150_v21, %v1152_v61  ;;  %v1564_v5 = vsel %vm1268_vm5, %v1541_v20, %v1563_v42  ;;  %v1581_v22 = vrot.slane %v6583_v16, 3 }
 0x19f   : > { %v6600_v7 = vor.u32 %v3491_v50, %v3490_v11  ;;  %v1584_v43 = vrot.slane %v6585_v33, 4  ;;  %v1088_v55 = vsel %vm950_vm4, %v1083_v14, %v1087_v46  ;;  %v6608_v12 = vshrl.u32 %v6262_v54, 16 }
 0x1a0   : > { %v6611_v28 = vshll.u32 %v6383_v58, 16  ;;  %v1554_v26 = vor.u32 %v1553_v40, %v1552_v32  ;;  %v1590_v56 = vrot.slane %v6593_v51, 3  ;;  %v1593_v21 = vrot.slane %v6595_v2, 4 }
 0x1a1   : > { %8474 = vst [vmem:[#allocation84_spill] sm:$0xff] %v6600_v7  ;;  %2056 = vmatmul.mubr.bf16.gmra.mrb[84].mxu1 %v1533_v25  ;;  %8475 = vst [vmem:[#allocation85_spill] sm:$0xff] %v6608_v12  ;;  %v1573_v20 = vsel %vm1268_vm5, %v1550_v36, %v1572_v30  ;;  %v6616_v19 = vshrl.u32 %v1088_v55, 16  ;;  %v6618_v11 = vshll.u32 %v1088_v55, 16  ;;  %v1585_v50 = vor.u32 %v1584_v43, %v1581_v22 }
 0x1a2   : > { %8476 = vst [vmem:[#allocation86_spill] sm:$0xff] %v6611_v28  ;;  %2063 = vmatprep.mubr.bf16.mxu1 %v1564_v5  ;;  %v1155_v54 = vsel %vm1118_vm3, %v1152_v61, %v1154_v1  ;;  %v1091_v5 = vor.u32 %v6608_v12, %v1087_v46  ;;  %v1095_v32 = vrot.slane %v6611_v28, 1  ;;  %v1555_v40 = vsel %vm1268_vm5, %v1532_v59, %v1554_v26 }
 0x1a3   : > { %8477 = vst [vmem:[#allocation87_spill] sm:$0xff] %v6616_v19  ;;  %8478 = vst [vmem:[#allocation88_spill] sm:$0xff] %v6618_v11  ;;  %v1594_v36 = vor.u32 %v1593_v21, %v1590_v56  ;;  %v1574_v25 = vrot.slane %v6530_v13, 3  ;;  %v1575_v55 = vrot.slane %v6498_v52, 4  ;;  %v1603_v43 = vrot.slane %v6616_v19, 3 }
 0x1a4   : > { %5082 = vmatmul.mubr.bf16.gmra.mrb[92].mxu0 %v1573_v20  ;;  %v1606_v61 = vrot.slane %v6618_v11, 4  ;;  %v6631_v22 = vshrl.u32 %v1153_v57, 16  ;;  %v6633_v20 = vshll.u32 %v1153_v57, 16  ;;  %v6636_v14 = vshrl.u32 %v6383_v58, 16 }
 0x1a5   : > { %5085 = vmatprep.mubr.msk.bf16.mxu0 %vm5584_vm0, %v8397_v63  ;;  %v6639_v46 = vshll.u32 %v6504_v49, 16  ;;  %v1586_v59 = vsel %vm1268_vm5, %v1563_v42, %v1585_v50  ;;  %v1096_v56 = vsel %vm950_vm4, %v1091_v5, %v1095_v32  ;;  %v1576_v21 = vor.u32 %v1575_v55, %v1574_v25 }
 0x1a6   : > { %8479 = vst [vmem:[#allocation89_spill] sm:$0xff] %v6631_v22  ;;  %8480 = vst [vmem:[#allocation90_spill] sm:$0xff] %v6633_v20  ;;  %v8482_v7 = vrot.slane %v6504_v49, 1  ;;  %v1595_v57 = vsel %vm1268_vm5, %v1572_v30, %v1594_v36  ;;  %v1607_v19 = vor.u32 %v1606_v61, %v1603_v43  ;;  %v1612_v58 = vrot.slane %v6631_v22, 3 }
 0x1a7   : > { %8481 = vst [vmem:[#allocation91_spill] sm:$0xff] %v6639_v46  ;;  %v1615_v52 = vrot.slane %v6633_v20, 4  ;;  %v6649_v13 = vshrl.u32 %v1096_v56, 16  ;;  %v1099_v42 = vor.u32 %v6636_v14, %v1095_v32  ;;  %v1103_v5 = vrot.slane %v6639_v46, 1 }
 0x1a8   : > { %v1157_v11 = vsel %vm1118_vm3, %v1154_v1, %v8482_v7  ;;  %v6657_v7 = vshrl.u32 %v1155_v54, 16  ;;  %v6659_v1 = vshll.u32 %v1155_v54, 16  ;;  %v1577_v30 = vsel %vm1268_vm5, %v1554_v26, %v1576_v21 }
 0x1a9   : > { %2064 = vmatmul.mubr.bf16.gmra.mrb[88].mxu1 %v1555_v40  ;;  %8483 = vst [vmem:[#allocation92_spill] sm:$0xff] %v6649_v13  ;;  %v6651_v40 = vshll.u32 %v1096_v56, 16  ;;  %v1616_v25 = vor.u32 %v1615_v52, %v1612_v58  ;;  %v1596_v55 = vrot.slane %v6563_v47, 3  ;;  %v1597_v43 = vrot.slane %v6535_v24, 4 }
 0x1aa   : > { %2071 = vmatprep.mubr.bf16.mxu1 %v1586_v59  ;;  %8485 = vst [vmem:[#allocation94_spill] sm:$0xff] %v6657_v7  ;;  %8486 = vst [vmem:[#allocation95_spill] sm:$0xff] %v6659_v1  ;;  %v1608_v61 = vsel %vm1268_vm5, %v1585_v50, %v1607_v19  ;;  %v1625_v32 = vrot.slane %v6649_v13, 3  ;;  %v1104_v56 = vsel %vm950_vm4, %v1099_v42, %v1103_v5  ;;  %v6672_v54 = vshll.u32 %v6540_v17, 16 }
 0x1ab   : > { %8484 = vst [vmem:[#allocation93_spill] sm:$0xff] %v6651_v40  ;;  %v1628_v59 = vrot.slane %v6651_v40, 4  ;;  %v1216_v52 = vrot.slane %v6572_v3, 1  ;;  %v6676_v26 = vrot.slane %v6540_v17, 1  ;;  %v1634_v50 = vrot.slane %v6657_v7, 3 }
 0x1ac   : > { %5086 = vmatmul.mubr.bf16.gmra.mrb[96].mxu0 %v1595_v57  ;;  %v6669_v57 = vshrl.u32 %v6504_v49, 16  ;;  %v1637_v58 = vrot.slane %v6659_v1, 4  ;;  %v1598_v40 = vor.u32 %v1597_v43, %v1596_v55  ;;  %v6681_v42 = vshrl.u32 %v1104_v56, 16 }
 0x1ad   : > { %5089 = vmatprep.mubr.msk.bf16.mxu0 %vm5584_vm0, %v8397_v63  ;;  %8488 = vst [vmem:[#allocation97_spill] sm:$0xff] %v6676_v26  ;;  %v6683_v13 = vshll.u32 %v1104_v56, 16  ;;  %v1629_v24 = vor.u32 %v1628_v59, %v1625_v32  ;;  %v1618_v47 = vrot.slane %v6608_v12, 3  ;;  %v1619_v3 = vrot.slane %v6566_v15, 4 }
 0x1ae   : > { %8487 = vst [vmem:[#allocation96_spill] sm:$0xff] %v6669_v57  ;;  %8489 = vst [vmem:[#allocation98_spill] sm:$0xff] %v6681_v42  ;;  %v1111_v1 = vrot.slane %v6672_v54, 1  ;;  %v1638_v55 = vor.u32 %v1637_v58, %v1634_v50  ;;  %v6695_v43 = vshrl.u32 %v1157_v11, 16  ;;  %v1599_v56 = vsel %vm1268_vm5, %v1576_v21, %v1598_v40 }
 0x1af   : > { %8490 = vst [vmem:[#allocation99_spill] sm:$0xff] %v6683_v13  ;;  %v1650_v15 = vrot.slane %v6683_v13, 4  ;;  %v1630_v12 = vsel %vm1268_vm5, %v1607_v19, %v1629_v24  ;;  %v6708_v58 = vrot.slane %v8390_v60, 1  ;;  %v6711_v7 = vshrl.u32 %v6540_v17, 16 }
 0x1b0   : > { %8491 = vst [vmem:[#allocation100_spill] sm:$0xff] %v6695_v43  ;;  %v1656_v19 = vrot.slane %v6695_v43, 3  ;;  %v8494_v17 = vrot.slane %v6504_v49, 1 }
 0x1b1   : > { %2072 = vmatmul.mubr.bf16.gmra.mrb[92].mxu1 %v1577_v30  ;;  %v1617_v30 = vsel %vm1268_vm5, %v1594_v36, %v1616_v25  ;;  %v6693_v36 = vsel %vm1118_vm3, %v6676_v26, %v1216_v52  ;;  %8493 = vst [vmem:[#allocation102_spill] sm:$0xff] %v6708_v58  ;;  %v6739_v49 = vor.u32 %v6711_v7, %v1111_v1 }
 0x1b2   : > { %2079 = vmatprep.mubr.bf16.mxu1 %v1608_v61  ;;  %v1107_v61 = vor.u32 %v6669_v57, %v1103_v5  ;;  %v8293_v32 = vshrl.u32 %v6693_v36, 16  ;;  %v8298_v59 = vshll.u32 %v6693_v36, 16  ;;  %v6702_v5 = vshll.u32 %v1157_v11, 16 }
 0x1b3   : > { %v1639_v11 = vsel %vm1268_vm5, %v1616_v25, %v1638_v55 }
 0x1b4   : > { %5090 = vmatmul.mubr.bf16.gmra.mrb[100].mxu0 %v1617_v30  ;;  %v1647_v30 = vrot.slane %v6681_v42, 3  ;;  %8492 = vst [vmem:[#allocation101_spill] sm:$0xff] %v6702_v5  ;;  %v3486_v50 = vrot.slane %v8293_v32, 4  ;;  %v1112_v21 = vsel %vm950_vm4, %v1107_v61, %v1111_v1  ;;  %v3487_v13 = vrot.slane %v8298_v59, 5 }
 0x1b5   : > { %5093 = vmatprep.mubr.msk.bf16.mxu0 %vm5584_vm0, %v8397_v63  ;;  %v6720_v32 = vsel %vm1118_vm3, %v1216_v52, %v6708_v58  ;;  %v1659_v20 = vrot.slane %v6702_v5, 4  ;;  %v6729_v59 = vshrl.u32 %v1112_v21, 16 }
 0x1b6   : > { %v1651_v42 = vor.u32 %v1650_v15, %v1647_v30  ;;  %v6727_v61 = vor.u32 %v3487_v13, %v3486_v50  ;;  %v1720_v25 = vshrl.u32 %v6720_v32, 16  ;;  %v1723_v52 = vshll.u32 %v6720_v32, 16 }
 0x1b7   : > { %8496 = vst [vmem:[#allocation104_spill] sm:$0xff] %v6729_v59  ;;  %v1211_v15 = vrot.slane %v6577_v8, 1  ;;  %v1641_v30 = vrot.slane %v6611_v28, 4  ;;  %v1669_v5 = vrot.slane %v6729_v59, 3 }
 0x1b8   : > { %8495 = vst [vmem:[#allocation103_spill] sm:$0xff] %v6727_v61  ;;  %v3503_v50 = vrot.slane %v1720_v25, 4  ;;  %v3504_v32 = vrot.slane %v1723_v52, 5 }
 0x1b9   : > { %2080 = vmatmul.mubr.bf16.gmra.mrb[96].mxu1 %v1599_v56  ;;  %v1620_v56 = vor.u32 %v1619_v3, %v1618_v47  ;;  %v6731_v47 = vshll.u32 %v1112_v21, 16  ;;  %v1640_v3 = vrot.slane %v6636_v14, 3  ;;  %v1660_v21 = vor.u32 %v1659_v20, %v1656_v19 }
 0x1ba   : > { %2087 = vmatprep.mubr.bf16.mxu1 %v1630_v12  ;;  %v1159_v12 = vsel %vm1118_vm3, %v8494_v17, %v6676_v26  ;;  %v1652_v26 = vsel %vm1268_vm5, %v1629_v24, %v1651_v42  ;;  %v6755_v28 = vor.u32 %v3504_v32, %v3503_v50  ;;  %v1662_v32 = vrot.slane %v6669_v57, 3 }
 0x1bb   : > { %8497 = vst [vmem:[#allocation105_spill] sm:$0xff] %v6731_v47  ;;  %v1621_v13 = vsel %vm1268_vm5, %v1598_v40, %v1620_v56  ;;  %v6746_v17 = vshll.u32 %v1159_v12, 16  ;;  %v1672_v1 = vrot.slane %v6731_v47, 4  ;;  %v6753_v40 = vsel %vm950_vm4, %v6739_v49, %v1211_v15 }
 0x1bc   : > { %5094 = vmatmul.mubr.bf16.gmra.mrb[104].mxu0 %v1639_v11  ;;  %v6744_v11 = vshrl.u32 %v1159_v12, 16  ;;  %8500 = vst [vmem:[#allocation108_spill] sm:$0xff] %v6753_v40  ;;  %8501 = vst [vmem:[#allocation109_spill] sm:$0xff] %v6755_v28  ;;  %v1661_v20 = vsel %vm1268_vm5, %v1638_v55, %v1660_v21  ;;  %v1642_v19 = vor.u32 %v1641_v30, %v1640_v3  ;;  %v8314_v59 = vshrl.u32 %v6753_v40, 16 }
 0x1bd   : > { %5097 = vmatprep.mubr.msk.bf16.mxu0 %vm5584_vm0, %v8397_v63  ;;  %8499 = vst [vmem:[#allocation107_spill] sm:$0xff] %v6746_v17  ;;  %v1673_v24 = vor.u32 %v1672_v1, %v1669_v5  ;;  %v8313_v47 = vshll.u32 %v6753_v40, 16  ;;  %v1663_v55 = vrot.slane %v6639_v46, 4  ;;  %v6768_v3 = vor.u32 %v6580_v0, %v1211_v15 }
 0x1be   : > { %8498 = vst [vmem:[#allocation106_spill] sm:$0xff] %v6744_v11  ;;  %v1678_v12 = vrot.slane %v6744_v11, 3  ;;  %v1691_v30 = vrot.slane %v8314_v59, 3  ;;  %v8504_v46 = vshll.u32 %v6693_v36, 16 }
 0x1bf   : > { %8502 = vst [vmem:[#allocation110_spill] sm:$0xff] %v6768_v3  ;;  %v1674_v5 = vsel %vm1268_vm5, %v1651_v42, %v1673_v24  ;;  %v1694_v1 = vrot.slane %v8313_v47, 4  ;;  %v1711_v42 = vshrl.u32 %v6768_v3, 16  ;;  %v1714_v57 = vshll.u32 %v6768_v3, 16 }
 0x1c0   : > { %v1703_v15 = vrot.slane %v8504_v46, 4 }
 0x1c1   : > { %2088 = vmatmul.mubr.bf16.gmra.mrb[100].mxu1 %v1621_v13  ;;  %v1681_v13 = vrot.slane %v6746_v17, 4  ;;  %v1713_v46 = vrot.slane %v1711_v42, 3 }
 0x1c2   : > { %2095 = vmatprep.mubr.bf16.mxu1 %v1652_v26  ;;  %v1643_v26 = vsel %vm1268_vm5, %v1620_v56, %v1642_v19 }
 0x1c3   : > { %v1682_v50 = vor.u32 %v1681_v13, %v1678_v12  ;;  %v8503_v12 = vshrl.u32 %v6693_v36, 16 }
 0x1c4   : > { %5098 = vmatmul.mubr.bf16.gmra.mrb[108].mxu0 %v1661_v20  ;;  %v1664_v20 = vor.u32 %v1663_v55, %v1662_v32  ;;  %v1685_v32 = vrot.slane %v6672_v54, 4  ;;  %v1716_v55 = vrot.slane %v1714_v57, 4 }
 0x1c5   : > { %5101 = vmatprep.mubr.msk.bf16.mxu0 %vm5584_vm0, %v8397_v63  ;;  %v1683_v56 = vsel %vm1268_vm5, %v1660_v21, %v1682_v50  ;;  %v1700_v13 = vrot.slane %v8503_v12, 3  ;;  %v1684_v21 = vrot.slane %v6711_v7, 3  ;;  %v1725_v12 = vrot.slane %v1723_v52, 4 }
 0x1c6   : > { %v1717_v59 = vor.u32 %v1716_v55, %v1713_v46  ;;  %v8505_v52 = vrot.slane %v5860_v18, 1 }
 0x1c7   : > { %v1704_v47 = vor.u32 %v1703_v15, %v1700_v13  ;;  %v1706_v15 = vrot.slane %v6580_v0, 3 }
 0x1c8   : > { %v960_v42 = vsel %vm950_vm4, %v6708_v58, %v8505_v52 }
 0x1c9   : > { %2096 = vmatmul.mubr.bf16.gmra.mrb[104].mxu1 %v1643_v26  ;;  %v1695_v26 = vor.u32 %v1694_v1, %v1691_v30  ;;  %v1705_v30 = vsel %vm1268_vm5, %v1682_v50, %v1704_v47  ;;  %v1686_v1 = vor.u32 %v1685_v32, %v1684_v21  ;;  %v2347_v0 = vshll.u32 %v960_v42, 16 }
 0x1ca   : > { %2103 = vmatprep.mubr.bf16.mxu1 %v1674_v5  ;;  %v1665_v5 = vsel %vm1268_vm5, %v1642_v19, %v1664_v20  ;;  %v8508_v32 = vshll.u32 %v5894_v53, 16 }
 0x1cb   : > { %v1696_v36 = vsel %vm1268_vm5, %v1673_v24, %v1695_v26  ;;  %v1687_v19 = vsel %vm1268_vm5, %v1664_v20, %v1686_v1  ;;  %v1707_v24 = vrot.slane %v6577_v8, 4  ;;  %v1718_v57 = vsel %vm1268_vm5, %v1695_v26, %v1717_v59 }
 0x1cc   : > { %5102 = vmatmul.mubr.bf16.gmra.mrb[112].mxu0 %v1683_v56  ;;  %v1722_v56 = vrot.slane %v1720_v25, 3  ;;  %v2344_v20 = vshrl.u32 %v960_v42, 16  ;;  %v8506_v8 = vrot.slane %v5857_v6, 1  ;;  %v2339_v42 = vrot.slane %v5865_v27, 2 }
 0x1cd   : > { %5105 = vmatprep.mubr.msk.bf16.mxu0 %vm5584_vm0, %v8397_v63  ;;  %v1708_v25 = vor.u32 %v1707_v24, %v1706_v15  ;;  %v2376_v27 = vrot.slane %v5924_v31, 3 }
 0x1ce   : > { %v1726_v13 = vor.u32 %v1725_v12, %v1722_v56  ;;  %v1121_v26 = vsel %vm1118_vm3, %v6708_v58, %v8506_v8  ;;  %v2349_v56 = vrot.slane %v2347_v0, 3  ;;  %v8509_v12 = vshrl.u32 %v5884_v45, 16 }
 0x1cf   : > { %v2356_v46 = vshrl.u32 %v1121_v26, 16  ;;  %v2359_v55 = vshll.u32 %v1121_v26, 16  ;;  %v2372_v0 = vrot.slane %v5936_v44, 3  ;;  %v5461_v26 = vld [vmem:[#allocation2 + $0x200] sm:$0xff]  }
 0x1d0   : > { %v1727_v50 = vsel %vm1268_vm5, %v1704_v47, %v1726_v13  ;;  %v8507_v47 = vshrl.u32 %v5894_v53, 16  ;;  %v2363_v6 = vrot.slane %v8509_v12, 2 }
 0x1d1   : > { %2104 = vmatmul.mubr.bf16.gmra.mrb[108].mxu1 %v1665_v5  ;;  %v1709_v5 = vsel %vm1268_vm5, %v1686_v1, %v1708_v25  ;;  %v2358_v24 = vrot.slane %v2356_v46, 2 }
 0x1d2   : > { %2111 = vmatprep.mubr.bf16.mxu1 %v1696_v36  ;;  %v2351_v21 = vrot.slane %v8507_v47, 2  ;;  %v2352_v36 = vrot.slane %v8508_v32, 3  ;;  %v2375_v32 = vrot.slane %v5922_v29, 2 }
 0x1d4   : > { %5106 = vmatmul.mubr.bf16.gmra.mrb[116].mxu0 %v1705_v30  ;;  %v2346_v30 = vrot.slane %v2344_v20, 2  ;;  %v2353_v1 = vor.u32 %v2352_v36, %v2351_v21  ;;  %v2340_v20 = vrot.slane %v5860_v18, 3  ;;  %v5464_v36 = vld [vmem:[#allocation2 + $0x208] sm:$0xff]  }
 0x1d5   : > { %5109 = vmatprep.mubr.msk.bf16.mxu0 %vm5584_vm0, %v8397_v63 }
 0x1d6   : > { %v2350_v53 = vor.u32 %v2349_v56, %v2346_v30  ;;  %v2341_v21 = vor.u32 %v2340_v20, %v2339_v42  ;;  %v2367_v30 = vrot.slane %v5876_v35, 2  ;;  %v2368_v56 = vrot.slane %v5874_v34, 3  ;;  %v5463_v42 = vld [vmem:[#allocation2 + $0x190] sm:$0xff]   ;;  %v5470_v20 = vld [vmem:[#allocation2 + $0x218] sm:$0xff]  }
 0x1d9   : > { %2112 = vmatmul.mubr.bf16.gmra.mrb[112].mxu1 %v1687_v19  ;;  %v8510_v19 = vshll.u32 %v5884_v45, 16  ;;  %v2354_v45 = vsel %vm2335_vm6, %v2350_v53, %v2353_v1  ;;  %v2369_v53 = vor.u32 %v2368_v56, %v2367_v30  ;;  %v8514_v30 = vld [vmem:[#allocation13_spill] sm:$0xff] }
 0x1da   : > { %2119 = vmatprep.mubr.bf16.mxu1 %v1718_v57  ;;  %v2361_v57 = vrot.slane %v2359_v55, 3  ;;  %v2377_v55 = vor.u32 %v2376_v27, %v2375_v32  ;;  %v8513_v32 = vld [vmem:[#allocation16_spill] sm:$0xff]  ;;  %v2399_v56 = vrot.slane %v8514_v30, 2 }
 0x1db   : > { %v2364_v15 = vrot.slane %v8510_v19, 3  ;;  %v2384_v19 = vrot.slane %v5996_v10, 3  ;;  %v2396_v27 = vrot.slane %v8513_v32, 3 }
 0x1dc   : > { %5110 = vmatmul.mubr.bf16.gmra.mrb[120].mxu0 %v1727_v50  ;;  %v2337_v50 = vrot.slane %v8390_v60, 3  ;;  %v2362_v8 = vor.u32 %v2361_v57, %v2358_v24  ;;  %v5467_v24 = vld [vmem:[#allocation2 + $0x210] sm:$0xff]  }
 0x1dd   : > { %5113 = vmatprep.mubr.msk.bf16.mxu0 %vm5584_vm0, %v8397_v63  ;;  %v2365_v52 = vor.u32 %v2364_v15, %v2363_v6  ;;  %v2383_v6 = vrot.slane %v5994_v9, 2  ;;  %v5462_v15 = vld [vmem:[#allocation2 + $0x188] sm:$0xff]  }
 0x1df   : > { %v2366_v47 = vsel %vm2335_vm6, %v2362_v8, %v2365_v52  ;;  %v2378_v57 = vsel %vm2335_vm6, %v2365_v52, %v2377_v55  ;;  %v2370_v52 = vsel %vm2335_vm6, %v2341_v21, %v2369_v53 }
 0x1e1   : > { %2120 = vmatmul.mubr.bf16.gmra.mrb[116].mxu1 %v1709_v5 }
 0x1e2   : > { %2127 = vmatprep.mubr.bf16.mxu1 %v1717_v59  ;;  %v2336_v59 = vrot.slane %v8390_v60, 2 }
 0x1e4   : > { %5114 = vmatmul.mubr.bf16.gmra.mrb[124].mxu0 %v1726_v13  ;;  %v2371_v13 = vrot.slane %v5934_v41, 2  ;;  %v2338_v5 = vor.u32 %v2337_v50, %v2336_v59  ;;  %v2387_v59 = vrot.slane %v5972_v38, 2  ;;  %v2388_v50 = vrot.slane %v5974_v39, 3 }
 0x1e5   : > { %5133 = vmatprep.mubr.msk.bf16.mxu0 %vm5584_vm0, %v8397_v63 }
 0x1e6   : > { %v2373_v18 = vor.u32 %v2372_v0, %v2371_v13  ;;  %v2342_v46 = vsel %vm2335_vm6, %v2338_v5, %v2341_v21  ;;  %v2379_v13 = vrot.slane %v5928_v37, 2  ;;  %v8511_v0 = vld [vmem:[#allocation8_spill] sm:$0xff]  ;;  %v8512_v5 = vld [vmem:[#allocation15_spill] sm:$0xff] }
 0x1e7   : > { %v2380_v8 = vrot.slane %v8511_v0, 3  ;;  %v5473_v21 = vld [vmem:[#allocation2 + $0x220] sm:$0xff]  }
 0x1e8   : > { %v2374_v12 = vsel %vm2335_vm6, %v2353_v1, %v2373_v18  ;;  %v2385_v1 = vor.u32 %v2384_v19, %v2383_v6  ;;  %v5466_v19 = vld [vmem:[#allocation2 + $0x1a0] sm:$0xff]  }
 0x1e9   : > { %2128 = vmatmul.mubr.bf16.gmra.mrb[120].mxu1 %v1708_v25  ;;  %v5460_v25 = vld [vmem:[#allocation2 + $0x180] sm:$0xff]  }
 0x1ea   : > { %2844 = vmatprep.mubr.bf16.mxu1 %v2354_v45  ;;  %v2389_v45 = vor.u32 %v2388_v50, %v2387_v59  ;;  %v8517_v50 = vld [vmem:[#allocation9_spill] sm:$0xff] }
 0x1ec   : > { %5134 = vmatmul.mubr.bf16.vlgmr.msra.gmra.mrb[128].mxu0 %v2366_v47  ;;  %v2395_v47 = vrot.slane %v8512_v5, 2 }
 0x1ed   : > { %5218 = vmatpush3.bf16.msra.mxu0 %v5461_v26  ;;  %5137 = vmatprep.mubr.msk.bf16.mxu0 %vm5584_vm0, %v8397_v63  ;;  %v2386_v26 = vsel %vm2335_vm6, %v2373_v18, %v2385_v1 }
 0x1ee   : > { %5219 = vmatprep.subr.bf16.mxu0 %v8397_v63  ;;  %v2397_v18 = vor.u32 %v2396_v27, %v2395_v47  ;;  %v5468_v47 = vld [vmem:[#allocation2 + $0x1a8] sm:$0xff]  }
 0x1f1   : > { %2845 = vmatmul.mubr.bf16.vlgmr.msra.gmra.mrb[124].mxu1 %v2342_v46  ;;  %5220 = vmatpush3.bf16.msra.mxu0 %v5464_v36  ;;  %v2390_v36 = vsel %vm2335_vm6, %v2377_v55, %v2389_v45  ;;  %v2381_v46 = vor.u32 %v2380_v8, %v2379_v13  ;;  %v8519_v8 = vld [vmem:[#allocation22_spill] sm:$0xff] }
 0x1f2   : > { %3748 = vmatpush1.bf16.msra.mxu1 %v5460_v25  ;;  %2852 = vmatprep.mubr.bf16.mxu1 %v2374_v12  ;;  %v5465_v25 = vld [vmem:[#allocation2 + $0x198] sm:$0xff]  }
 0x1f3   : > { %3749 = vmatprep.subr.bf16.mxu1 %v8390_v60  ;;  %5221 = vmatprep.subr.bf16.mxu0 %v8397_v63  ;;  %v8515_v12 = vld [vmem:[#allocation14_spill] sm:$0xff]  ;;  %v2382_v55 = vsel %vm2335_vm6, %v2369_v53, %v2381_v46 }
 0x1f4   : > { %5138 = vmatmul.mubr.bf16.gmra.mrb[132].mxu0 %v2378_v57  ;;  %v2400_v6 = vrot.slane %v8515_v12, 3  ;;  %v8516_v57 = vld [vmem:[#allocation10_spill] sm:$0xff] }
 0x1f5   : > { %5141 = vmatprep.mubr.msk.bf16.mxu0 %vm5584_vm0, %v8397_v63  ;;  %5222 = vmatpush3.bf16.msra.mxu0 %v5467_v24  ;;  %v2391_v59 = vrot.slane %v8516_v57, 2  ;;  %v5479_v53 = vld [vmem:[#allocation2 + $0x230] sm:$0xff]  }
 0x1f6   : > { %3750 = vmatpush1.bf16.msra.mxu1 %v5462_v15  ;;  %5223 = vmatprep.subr.bf16.mxu0 %v8397_v63  ;;  %v5476_v15 = vld [vmem:[#allocation2 + $0x228] sm:$0xff]   ;;  %v2401_v24 = vor.u32 %v2400_v6, %v2399_v56 }
 0x1f7   : > { %3751 = vmatprep.subr.bf16.mxu1 %v8390_v60  ;;  %v8521_v56 = vld [vmem:[#allocation20_spill] sm:$0xff] }
 0x1f8   : > { %v2402_v27 = vsel %vm2335_vm6, %v2389_v45, %v2401_v24  ;;  %v2412_v6 = vrot.slane %v8521_v56, 3 }
 0x1f9   : > { %2853 = vmatmul.mubr.bf16.gmra.mrb[128].mxu1 %v2370_v52  ;;  %5224 = vmatpush3.bf16.msra.mxu0 %v5470_v20  ;;  %v2398_v20 = vsel %vm2335_vm6, %v2385_v1, %v2397_v18  ;;  %v8518_v52 = vld [vmem:[#allocation21_spill] sm:$0xff] }
 0x1fa   : > { %2860 = vmatprep.mubr.bf16.mxu1 %v2386_v26  ;;  %3752 = vmatpush1.bf16.msra.mxu1 %v5463_v42  ;;  %v2392_v42 = vrot.slane %v8517_v50, 3  ;;  %v2407_v13 = vrot.slane %v8518_v52, 2  ;;  %v2408_v26 = vrot.slane %v8519_v8, 3 }
 0x1fb   : > { %3753 = vmatprep.subr.bf16.mxu1 %v8390_v60  ;;  %5225 = vmatprep.subr.bf16.mxu0 %v8397_v63 }
 0x1fc   : > { %5142 = vmatmul.mubr.bf16.gmra.mrb[136].mxu0 %v2390_v36  ;;  %v2409_v1 = vor.u32 %v2408_v26, %v2407_v13  ;;  %v8524_v26 = vld [vmem:[#allocation27_spill] sm:$0xff] }
 0x1fd   : > { %5145 = vmatprep.mubr.msk.bf16.mxu0 %vm5584_vm0, %v8397_v63  ;;  %5226 = vmatpush3.bf16.msra.mxu0 %v5473_v21  ;;  %v8520_v21 = vld [vmem:[#allocation19_spill] sm:$0xff] }
 0x1fe   : > { %3754 = vmatpush1.bf16.msra.mxu1 %v5465_v25  ;;  %5227 = vmatprep.subr.bf16.mxu0 %v8397_v63  ;;  %v2393_v25 = vor.u32 %v2392_v42, %v2391_v59  ;;  %v2411_v36 = vrot.slane %v8520_v21, 2  ;;  %v8522_v59 = vld [vmem:[#allocation12_spill] sm:$0xff]  ;;  %v2410_v13 = vsel %vm2335_vm6, %v2397_v18, %v2409_v1 }
 0x1ff   : > { %3755 = vmatprep.subr.bf16.mxu1 %v8390_v60  ;;  %v2403_v42 = vrot.slane %v8522_v59, 2  ;;  %v5472_v18 = vld [vmem:[#allocation2 + $0x1c0] sm:$0xff]  }
 0x200   : > { %v2394_v45 = vsel %vm2335_vm6, %v2381_v46, %v2393_v25 }
 0x201   : > { %2861 = vmatmul.mubr.bf16.gmra.mrb[132].mxu1 %v2382_v55  ;;  %5228 = vmatpush3.bf16.msra.mxu0 %v5476_v15  ;;  %v5482_v15 = vld [vmem:[#allocation2 + $0x238] sm:$0xff]   ;;  %v2413_v55 = vor.u32 %v2412_v6, %v2411_v36  ;;  %v8526_v6 = vld [vmem:[#allocation25_spill] sm:$0xff] }
 0x202   : > { %2868 = vmatprep.mubr.bf16.mxu1 %v2398_v20  ;;  %3756 = vmatpush1.bf16.msra.mxu1 %v5466_v19  ;;  %v5469_v19 = vld [vmem:[#allocation2 + $0x1b0] sm:$0xff]   ;;  %v8523_v20 = vld [vmem:[#allocation11_spill] sm:$0xff]  ;;  %v2423_v40 = vrot.slane %v8526_v6, 2 }
 0x203   : > { %3757 = vmatprep.subr.bf16.mxu1 %v8390_v60  ;;  %5229 = vmatprep.subr.bf16.mxu0 %v8397_v63  ;;  %v2404_v3 = vrot.slane %v8523_v20, 3  ;;  %v2414_v46 = vsel %vm2335_vm6, %v2401_v24, %v2413_v55  ;;  %v8527_v20 = vld [vmem:[#allocation26_spill] sm:$0xff]  ;;  %v8529_v24 = vld [vmem:[#allocation17_spill] sm:$0xff] }
 0x204   : > { %5146 = vmatmul.mubr.bf16.gmra.mrb[140].mxu0 %v2402_v27  ;;  %v2419_v27 = vrot.slane %v8524_v26, 2  ;;  %v2424_v59 = vrot.slane %v8527_v20, 3  ;;  %v8530_v20 = vld [vmem:[#allocation33_spill] sm:$0xff] }
 0x205   : > { %5149 = vmatprep.mubr.msk.bf16.mxu0 %vm5584_vm0, %v8397_v63  ;;  %5230 = vmatpush3.bf16.msra.mxu0 %v5479_v53  ;;  %v5471_v53 = vld [vmem:[#allocation2 + $0x1b8] sm:$0xff]   ;;  %v2405_v36 = vor.u32 %v2404_v3, %v2403_v42  ;;  %v2416_v3 = vrot.slane %v8529_v24, 3 }
 0x206   : > { %3758 = vmatpush1.bf16.msra.mxu1 %v5468_v47  ;;  %5231 = vmatprep.subr.bf16.mxu0 %v8397_v63  ;;  %v8525_v47 = vld [vmem:[#allocation28_spill] sm:$0xff] }
 0x207   : > { %3759 = vmatprep.subr.bf16.mxu1 %v8390_v60  ;;  %v2420_v58 = vrot.slane %v8525_v47, 3 }
 0x209   : > { %2869 = vmatmul.mubr.bf16.gmra.mrb[136].mxu1 %v2394_v45  ;;  %5232 = vmatpush3.bf16.msra.mxu0 %v5482_v15  ;;  %v2421_v45 = vor.u32 %v2420_v58, %v2419_v27  ;;  %v8528_v15 = vld [vmem:[#allocation18_spill] sm:$0xff]  ;;  %v8531_v58 = vld [vmem:[#allocation36_spill] sm:$0xff] }
 0x20a   : > { %2876 = vmatprep.mubr.bf16.mxu1 %v2410_v13  ;;  %3760 = vmatpush1.bf16.msra.mxu1 %v5469_v19  ;;  %v2406_v19 = vsel %vm2335_vm6, %v2393_v25, %v2405_v36  ;;  %v2425_v13 = vor.u32 %v2424_v59, %v2423_v40  ;;  %v2415_v47 = vrot.slane %v8528_v15, 2  ;;  %v2432_v27 = vrot.slane %v8531_v58, 3  ;;  %v8532_v40 = vld [vmem:[#allocation31_spill] sm:$0xff]  ;;  %v8533_v15 = vld [vmem:[#allocation32_spill] sm:$0xff] }
 0x20b   : > { %3761 = vmatprep.subr.bf16.mxu1 %v8390_v60  ;;  %v2422_v42 = vsel %vm2335_vm6, %v2409_v1, %v2421_v45  ;;  %v2435_v59 = vrot.slane %v8532_v40, 2  ;;  %v2436_v26 = vrot.slane %v8533_v15, 3  ;;  %v5475_v1 = vld [vmem:[#allocation2 + $0x1d0] sm:$0xff]  }
 0x20c   : > { %5150 = vmatmul.mubr.bf16.gmra.mrb[144].mxu0 %v2414_v46  ;;  %v2431_v46 = vrot.slane %v8530_v20, 2  ;;  %v2426_v6 = vsel %vm2335_vm6, %v2413_v55, %v2425_v13  ;;  %v2417_v25 = vor.u32 %v2416_v3, %v2415_v47  ;;  %v8535_v20 = vld [vmem:[#allocation23_spill] sm:$0xff]  ;;  %v8537_v40 = vld [vmem:[#allocation42_spill] sm:$0xff] }
 0x20d   : > { %5153 = vmatprep.mubr.msk.bf16.mxu0 %vm5584_vm0, %v8397_v63  ;;  %v2428_v24 = vrot.slane %v8535_v20, 3  ;;  %v2437_v3 = vor.u32 %v2436_v26, %v2435_v59  ;;  %v8539_v59 = vld [vmem:[#allocation39_spill] sm:$0xff] }
 0x20e   : > { %3762 = vmatpush1.bf16.msra.mxu1 %v5471_v53  ;;  %v5474_v53 = vld [vmem:[#allocation2 + $0x1c8] sm:$0xff]   ;;  %v2418_v55 = vsel %vm2335_vm6, %v2405_v36, %v2417_v25 }
 0x20f   : > { %3763 = vmatprep.subr.bf16.mxu1 %v8390_v60  ;;  %v2438_v26 = vsel %vm2335_vm6, %v2425_v13, %v2437_v3 }
 0x211   : > { %2877 = vmatmul.mubr.bf16.gmra.mrb[140].mxu1 %v2406_v19  ;;  %v2433_v19 = vor.u32 %v2432_v27, %v2431_v46  ;;  %v8536_v27 = vld [vmem:[#allocation41_spill] sm:$0xff] }
 0x212   : > { %2884 = vmatprep.mubr.bf16.mxu1 %v2422_v42  ;;  %3764 = vmatpush1.bf16.msra.mxu1 %v5472_v18  ;;  %v2169_v58 = vpop.f32.mrb[44].mxu0  ;;  %v8534_v42 = vld [vmem:[#allocation24_spill] sm:$0xff]  ;;  %v2443_v15 = vrot.slane %v8536_v27, 2 }
 0x213   : > { %3765 = vmatprep.subr.bf16.mxu1 %v8390_v60  ;;  %v2427_v18 = vrot.slane %v8534_v42, 2  ;;  %v5035_v47 = vpop.f32.mrb[45].mxu0  ;;  %v5477_v42 = vld [vmem:[#allocation2 + $0x1d8] sm:$0xff]  }
 0x214   : > { %5154 = vmatmul.mubr.bf16.gmra.mrb[148].mxu0 %v2426_v6  ;;  %v2434_v6 = vsel %vm2335_vm6, %v2421_v45, %v2433_v19  ;;  %v2172_v46 = vpop.f32.mrb[46].mxu0  ;;  %v2447_v45 = vrot.slane %v8539_v59, 2 }
 0x215   : > { %5157 = vmatprep.mubr.msk.bf16.mxu0 %vm5584_vm0, %v8397_v63  ;;  %v5036_v56 = vpop.f32.mrb[47].mxu0  ;;  %v2429_v20 = vor.u32 %v2428_v24, %v2427_v18  ;;  %v5478_v24 = vld [vmem:[#allocation2 + $0x1e0] sm:$0xff]   ;;  %v8543_v18 = vld [vmem:[#allocation29_spill] sm:$0xff] }
 0x216   : > { %3766 = vmatpush1.bf16.msra.mxu1 %v5474_v53  ;;  %v2444_v53 = vrot.slane %v8537_v40, 3  ;;  %v1969_v21 = vpop.f32.mrb[40].mxu1  ;;  %v2440_v13 = vrot.slane %v8543_v18, 3 }
 0x217   : > { %3767 = vmatprep.subr.bf16.mxu1 %v8390_v60  ;;  %v6908_v8 = vadd.f32 %v2169_v58, %v1969_v21  ;;  %v1971_v36 = vpop.f32.mrb[41].mxu1  ;;  %v8542_v58 = vld [vmem:[#allocation30_spill] sm:$0xff] }
 0x218   : > { %v1972_v27 = vpop.f32.mrb[42].mxu1  ;;  %v2445_v40 = vor.u32 %v2444_v53, %v2443_v15  ;;  %v2430_v36 = vsel %vm2335_vm6, %v2417_v25, %v2429_v20  ;;  %v8544_v53 = vld [vmem:[#allocation48_spill] sm:$0xff] }
 0x219   : > { %2885 = vmatmul.mubr.bf16.gmra.mrb[144].mxu1 %v2418_v55  ;;  %8538 = vst [vmem:[#allocation8_spill] sm:$0xff] %v6908_v8  ;;  %v8540_v55 = vld [vmem:[#allocation40_spill] sm:$0xff]  ;;  %v1974_v56 = vpop.f32.mrb[43].mxu1 }
 0x21a   : > { %2892 = vmatprep.mubr.bf16.mxu1 %v2434_v6  ;;  %3768 = vmatpush1.bf16.msra.mxu1 %v5475_v1  ;;  %v2448_v47 = vrot.slane %v8540_v55, 3  ;;  %v6913_v6 = vadd.f32 %v2172_v46, %v1972_v27  ;;  %v2177_v21 = vpop.f32.mrb[48].mxu0  ;;  %v2439_v1 = vrot.slane %v8542_v58, 2  ;;  %v2446_v15 = vsel %vm2335_vm6, %v2433_v19, %v2445_v40 }
 0x21b   : > { %3769 = vmatprep.subr.bf16.mxu1 %v8390_v60  ;;  %v5039_v8 = vpop.f32.mrb[49].mxu0  ;;  %v2455_v27 = vrot.slane %v6374_v23, 2 }
 0x21c   : > { %5158 = vmatmul.mubr.bf16.gmra.mrb[152].mxu0 %v2438_v26  ;;  %8541 = vst [vmem:[#allocation15_spill] sm:$0xff] %v6913_v6  ;;  %v2449_v26 = vor.u32 %v2448_v47, %v2447_v45  ;;  %v2180_v46 = vpop.f32.mrb[50].mxu0  ;;  %v5480_v6 = vld [vmem:[#allocation2 + $0x1e8] sm:$0xff]   ;;  %v2441_v18 = vor.u32 %v2440_v13, %v2439_v1  ;;  %v5481_v1 = vld [vmem:[#allocation2 + $0x1f0] sm:$0xff]  }
 0x21d   : > { %5161 = vmatprep.mubr.msk.bf16.mxu0 %vm5584_vm0, %v8397_v63  ;;  %v5040_v56 = vpop.f32.mrb[51].mxu0  ;;  %v8546_v45 = vld [vmem:[#allocation44_spill] sm:$0xff]  ;;  %v8547_v47 = vld [vmem:[#allocation45_spill] sm:$0xff] }
 0x21e   : > { %3770 = vmatpush1.bf16.msra.mxu1 %v5477_v42  ;;  %v2456_v42 = vrot.slane %v8544_v53, 3  ;;  %v1977_v58 = vpop.f32.mrb[44].mxu1  ;;  %v2450_v25 = vsel %vm2335_vm6, %v2437_v3, %v2449_v26  ;;  %v2459_v19 = vrot.slane %v8546_v45, 2  ;;  %v8550_v56 = vld [vmem:[#allocation37_spill] sm:$0xff] }
 0x21f   : > { %3771 = vmatprep.subr.bf16.mxu1 %v8390_v60  ;;  %v6925_v55 = vadd.f32 %v2177_v21, %v1977_v58  ;;  %v1979_v8 = vpop.f32.mrb[45].mxu1  ;;  %v8549_v58 = vld [vmem:[#allocation38_spill] sm:$0xff]  ;;  %v2452_v3 = vrot.slane %v8550_v56, 3 }
 0x220   : > { %v1980_v23 = vpop.f32.mrb[46].mxu1  ;;  %v2457_v53 = vor.u32 %v2456_v42, %v2455_v27  ;;  %v2451_v13 = vrot.slane %v8549_v58, 2  ;;  %v2442_v8 = vsel %vm2335_vm6, %v2429_v20, %v2441_v18  ;;  %v2467_v27 = vrot.slane %v6434_v4, 2 }
 0x221   : > { %2893 = vmatmul.mubr.bf16.gmra.mrb[148].mxu1 %v2430_v36  ;;  %8545 = vst [vmem:[#allocation16_spill] sm:$0xff] %v6925_v55  ;;  %v2460_v36 = vrot.slane %v8547_v47, 3 }
 0x222   : > { %2900 = vmatprep.mubr.bf16.mxu1 %v2446_v15  ;;  %3772 = vmatpush1.bf16.msra.mxu1 %v5478_v24  ;;  %v6930_v15 = vadd.f32 %v2180_v46, %v1980_v23  ;;  %v1982_v24 = vpop.f32.mrb[47].mxu1  ;;  %v2185_v21 = vpop.f32.mrb[52].mxu0  ;;  %v2458_v23 = vsel %vm2335_vm6, %v2445_v40, %v2457_v53  ;;  %v2453_v56 = vor.u32 %v2452_v3, %v2451_v13  ;;  %v8556_v3 = vld [vmem:[#allocation43_spill] sm:$0xff] }
 0x223   : > { %3773 = vmatprep.subr.bf16.mxu1 %v8390_v60  ;;  %v5043_v55 = vpop.f32.mrb[53].mxu0  ;;  %v5483_v24 = vld [vmem:[#allocation2 + $0x1f8] sm:$0xff]  }
 0x224   : > { %5162 = vmatmul.mubr.bf16.gmra.mrb[156].mxu0 %v2450_v25  ;;  %8548 = vst [vmem:[#allocation13_spill] sm:$0xff] %v6930_v15  ;;  %v2461_v25 = vor.u32 %v2460_v36, %v2459_v19  ;;  %v2188_v46 = vpop.f32.mrb[54].mxu0  ;;  %v8552_v19 = vld [vmem:[#allocation53_spill] sm:$0xff]  ;;  %v8553_v36 = vld [vmem:[#allocation54_spill] sm:$0xff] }
 0x225   : > { %5165 = vmatprep.mubr.msk.bf16.mxu0 %vm5584_vm0, %v8397_v63  ;;  %v5044_v42 = vpop.f32.mrb[55].mxu0  ;;  %v2471_v40 = vrot.slane %v8552_v19, 2 }
 0x226   : > { %3774 = vmatpush1.bf16.msra.mxu1 %v5480_v6  ;;  %v2468_v6 = vrot.slane %v6436_v48, 3  ;;  %v1985_v15 = vpop.f32.mrb[48].mxu1  ;;  %v2462_v55 = vsel %vm2335_vm6, %v2449_v26, %v2461_v25  ;;  %v2464_v42 = vrot.slane %v8556_v3, 3  ;;  %v2454_v26 = vsel %vm2335_vm6, %v2441_v18, %v2453_v56  ;;  %v8560_v18 = vld [vmem:[#allocation55_spill] sm:$0xff] }
 0x227   : > { %3775 = vmatprep.subr.bf16.mxu1 %v8390_v60  ;;  %v6942_v58 = vadd.f32 %v2185_v21, %v1985_v15  ;;  %v1987_v20 = vpop.f32.mrb[49].mxu1  ;;  %v8555_v15 = vld [vmem:[#allocation46_spill] sm:$0xff] }
 0x228   : > { %v1988_v4 = vpop.f32.mrb[50].mxu1  ;;  %v2469_v48 = vor.u32 %v2468_v6, %v2467_v27  ;;  %v2463_v21 = vrot.slane %v8555_v15, 2  ;;  %v8558_v6 = vld [vmem:[#allocation60_spill] sm:$0xff] }
 0x229   : > { %2901 = vmatmul.mubr.bf16.gmra.mrb[152].mxu1 %v2442_v8  ;;  %8551 = vst [vmem:[#allocation14_spill] sm:$0xff] %v6942_v58  ;;  %v2472_v8 = vrot.slane %v8553_v36, 3 }
 0x22a   : > { %2908 = vmatprep.mubr.bf16.mxu1 %v2458_v23  ;;  %3776 = vmatpush1.bf16.msra.mxu1 %v5481_v1  ;;  %v6947_v23 = vadd.f32 %v2188_v46, %v1988_v4  ;;  %v1990_v1 = vpop.f32.mrb[51].mxu1  ;;  %v8557_v4 = vld [vmem:[#allocation59_spill] sm:$0xff]  ;;  %v2465_v58 = vor.u32 %v2464_v42, %v2463_v21  ;;  %v8564_v42 = vld [vmem:[#allocation49_spill] sm:$0xff] }
 0x22b   : > { %3777 = vmatprep.subr.bf16.mxu1 %v8390_v60  ;;  %v2193_v13 = vpop.f32.mrb[56].mxu0  ;;  %v2473_v60 = vor.u32 %v2472_v8, %v2471_v40  ;;  %v2479_v46 = vrot.slane %v8557_v4, 2  ;;  %v2480_v1 = vrot.slane %v8558_v6, 3  ;;  %v8561_v40 = vld [vmem:[#allocation56_spill] sm:$0xff]  ;;  %v8563_v21 = vld [vmem:[#allocation51_spill] sm:$0xff] }
 0x22c   : > { %5166 = vmatmul.mubr.bf16.gmra.mrb[160].mxu0 %v2462_v55  ;;  %8554 = vst [vmem:[#allocation10_spill] sm:$0xff] %v6947_v23  ;;  %v5047_v20 = vpop.f32.mrb[57].mxu0  ;;  %v2470_v55 = vsel %vm2335_vm6, %v2457_v53, %v2469_v48  ;;  %v2484_v8 = vrot.slane %v8561_v40, 3 }
 0x22d   : > { %5169 = vmatprep.mubr.msk.bf16.mxu0 %vm5584_vm0, %v8397_v63  ;;  %v2196_v27 = vpop.f32.mrb[58].mxu0  ;;  %v2474_v3 = vsel %vm2335_vm6, %v2461_v25, %v2473_v60  ;;  %v2483_v20 = vrot.slane %v8560_v18, 2  ;;  %v2481_v53 = vor.u32 %v2480_v1, %v2479_v46  ;;  %v2466_v25 = vsel %vm2335_vm6, %v2453_v56, %v2465_v58  ;;  %v8566_v1 = vld [vmem:[#allocation63_spill] sm:$0xff] }
 0x22e   : > { %3778 = vmatpush1.bf16.msra.mxu1 %v5483_v24  ;;  %v5048_v23 = vpop.f32.mrb[59].mxu0  ;;  %v2491_v46 = vrot.slane %v6465_v62, 2 }
 0x22f   : > { %v1993_v24 = vpop.f32.mrb[52].mxu1 }
 0x230   : > { %v6957_v36 = vadd.f32 %v2193_v13, %v1993_v24  ;;  %v1995_v15 = vpop.f32.mrb[53].mxu1  ;;  %v2475_v13 = vrot.slane %v8563_v21, 2  ;;  %v2485_v24 = vor.u32 %v2484_v8, %v2483_v20 }
 0x231   : > { %2909 = vmatmul.mubr.bf16.gmra.mrb[156].mxu1 %v2454_v26  ;;  %v1996_v26 = vpop.f32.mrb[54].mxu1  ;;  %v2476_v15 = vrot.slane %v8564_v42, 3 }
 0x232   : > { %2916 = vmatprep.mubr.bf16.mxu1 %v2470_v55  ;;  %8559 = vst [vmem:[#allocation9_spill] sm:$0xff] %v6957_v36  ;;  %v6962_v19 = vadd.f32 %v2196_v27, %v1996_v26  ;;  %v1998_v4 = vpop.f32.mrb[55].mxu1  ;;  %v2482_v27 = vsel %vm2335_vm6, %v2469_v48, %v2481_v53  ;;  %v2492_v26 = vrot.slane %v8566_v1, 3  ;;  %v2486_v8 = vsel %vm2335_vm6, %v2473_v60, %v2485_v24 }
 0x233   : > { %v2477_v42 = vor.u32 %v2476_v15, %v2475_v13  ;;  %v8571_v13 = vld [vmem:[#allocation52_spill] sm:$0xff] }
 0x234   : > { %5170 = vmatmul.mubr.bf16.gmra.mrb[164].mxu0 %v2474_v3  ;;  %8562 = vst [vmem:[#allocation21_spill] sm:$0xff] %v6962_v19  ;;  %v6972_v3 = vsel %vm3264_vm7, %v6727_v61, %v6755_v28  ;;  %v2493_v48 = vor.u32 %v2492_v26, %v2491_v46  ;;  %v8573_v46 = vld [vmem:[#allocation68_spill] sm:$0xff] }
 0x235   : > { %5173 = vmatprep.mubr.msk.bf16.mxu0 %vm5584_vm0, %v8397_v63  ;;  %v2201_v23 = vpop.f32.mrb[60].mxu0  ;;  %8565 = vst [vmem:[#allocation39_spill] sm:$0xff] %v6972_v3  ;;  %v8569_v3 = vld [vmem:[#allocation65_spill] sm:$0xff]  ;;  %v2478_v60 = vsel %vm2335_vm6, %v2465_v58, %v2477_v42  ;;  %v8576_v58 = vld [vmem:[#allocation70_spill] sm:$0xff] }
 0x236   : > { %v5051_v55 = vpop.f32.mrb[61].mxu0 }
 0x237   : > { %v2204_v4 = vpop.f32.mrb[62].mxu0  ;;  %v8568_v55 = vld [vmem:[#allocation64_spill] sm:$0xff] }
 0x238   : > { %v5052_v19 = vpop.f32.mrb[63].mxu0  ;;  %v2001_v36 = vpop.f32.mrb[56].mxu1  ;;  %v2495_v28 = vrot.slane %v8568_v55, 2 }
 0x239   : > { %2917 = vmatmul.mubr.bf16.gmra.mrb[160].mxu1 %v2466_v25  ;;  %v6977_v56 = vadd.f32 %v2201_v23, %v2001_v36  ;;  %v2003_v20 = vpop.f32.mrb[57].mxu1  ;;  %v2496_v25 = vrot.slane %v8569_v3, 3  ;;  %v2487_v36 = vrot.slane %v8571_v13, 2  ;;  %v8572_v23 = vld [vmem:[#allocation50_spill] sm:$0xff] }
 0x23a   : > { %2924 = vmatprep.mubr.bf16.mxu1 %v2482_v27  ;;  %v2004_v61 = vpop.f32.mrb[58].mxu1  ;;  %v2488_v15 = vrot.slane %v8572_v23, 3 }
 0x23b   : > { %8567 = vst [vmem:[#allocation44_spill] sm:$0xff] %v6977_v56  ;;  %v6982_v21 = vadd.f32 %v2204_v4, %v2004_v61  ;;  %v2006_v62 = vpop.f32.mrb[59].mxu1  ;;  %v2497_v20 = vor.u32 %v2496_v25, %v2495_v28  ;;  %v2494_v56 = vsel %vm2335_vm6, %v2481_v53, %v2493_v48  ;;  %v2503_v61 = vrot.slane %v8573_v46, 2  ;;  %v8574_v4 = vld [vmem:[#allocation69_spill] sm:$0xff]  ;;  %v8577_v28 = vld [vmem:[#allocation71_spill] sm:$0xff] }
 0x23c   : > { %5174 = vmatmul.mubr.bf16.gmra.mrb[168].mxu0 %v2486_v8  ;;  %v2504_v62 = vrot.slane %v8574_v4, 3  ;;  %v2489_v3 = vor.u32 %v2488_v15, %v2487_v36  ;;  %v2508_v25 = vrot.slane %v8577_v28, 3  ;;  %v8579_v36 = vld [vmem:[#allocation35_spill] sm:$0xff] }
 0x23d   : > { %8570 = vst [vmem:[#allocation45_spill] sm:$0xff] %v6982_v21  ;;  %5177 = vmatprep.mubr.msk.bf16.mxu0 %vm5584_vm0, %v8397_v63  ;;  %v2498_v23 = vsel %vm2335_vm6, %v2485_v24, %v2497_v20 }
 0x23e   : > { %v2209_v19 = vpop.f32.mrb[64].mxu0  ;;  %v2505_v53 = vor.u32 %v2504_v62, %v2503_v61  ;;  %v2490_v24 = vsel %vm2335_vm6, %v2477_v42, %v2489_v3  ;;  %v8581_v61 = vld [vmem:[#allocation74_spill] sm:$0xff]  ;;  %v8582_v62 = vld [vmem:[#allocation75_spill] sm:$0xff]  ;;  %v8584_v42 = vld [vmem:[#allocation76_spill] sm:$0xff] }
 0x23f   : > { %v5055_v27 = vpop.f32.mrb[65].mxu0 }
 0x240   : > { %v2212_v8 = vpop.f32.mrb[66].mxu0  ;;  %v2507_v27 = vrot.slane %v8576_v58, 2 }
 0x241   : > { %2925 = vmatmul.mubr.bf16.gmra.mrb[164].mxu1 %v2478_v60  ;;  %v5056_v26 = vpop.f32.mrb[67].mxu0  ;;  %v2009_v21 = vpop.f32.mrb[60].mxu1 }
 0x242   : > { %2932 = vmatprep.mubr.bf16.mxu1 %v2494_v56  ;;  %v6992_v55 = vadd.f32 %v2209_v19, %v2009_v21  ;;  %v2011_v13 = vpop.f32.mrb[61].mxu1  ;;  %v2499_v21 = vrot.slane %v8579_v36, 2  ;;  %v8580_v19 = vld [vmem:[#allocation34_spill] sm:$0xff]  ;;  %v2509_v26 = vor.u32 %v2508_v25, %v2507_v27  ;;  %v8585_v27 = vld [vmem:[#allocation77_spill] sm:$0xff] }
 0x243   : > { %v2012_v60 = vpop.f32.mrb[62].mxu1  ;;  %v2500_v13 = vrot.slane %v8580_v19, 3  ;;  %v2520_v25 = vrot.slane %v8585_v27, 3 }
 0x244   : > { %8575 = vst [vmem:[#allocation60_spill] sm:$0xff] %v6992_v55  ;;  %5178 = vmatmul.mubr.bf16.gmra.mrb[172].mxu0 %v2498_v23  ;;  %v6997_v1 = vadd.f32 %v2212_v8, %v2012_v60  ;;  %v2014_v46 = vpop.f32.mrb[63].mxu1  ;;  %v2506_v55 = vsel %vm2335_vm6, %v2493_v48, %v2505_v53  ;;  %v2515_v8 = vrot.slane %v8581_v61, 2  ;;  %v2510_v19 = vsel %vm2335_vm6, %v2497_v20, %v2509_v26 }
 0x245   : > { %5181 = vmatprep.mubr.msk.bf16.mxu0 %vm5584_vm0, %v8397_v63  ;;  %v2516_v46 = vrot.slane %v8582_v62, 3  ;;  %v2501_v28 = vor.u32 %v2500_v13, %v2499_v21  ;;  %v8587_v21 = vld [vmem:[#allocation66_spill] sm:$0xff]  ;;  %v8588_v13 = vld [vmem:[#allocation61_spill] sm:$0xff] }
 0x246   : > { %8578 = vst [vmem:[#allocation55_spill] sm:$0xff] %v6997_v1  ;;  %v2511_v20 = vrot.slane %v8587_v21, 2 }
 0x247   : > { %v2217_v56 = vpop.f32.mrb[68].mxu0  ;;  %v2517_v48 = vor.u32 %v2516_v46, %v2515_v8 }
 0x248   : > { %v5059_v15 = vpop.f32.mrb[69].mxu0 }
 0x249   : > { %2933 = vmatmul.mubr.bf16.gmra.mrb[168].mxu1 %v2490_v24  ;;  %v2220_v23 = vpop.f32.mrb[70].mxu0  ;;  %v2017_v1 = vpop.f32.mrb[64].mxu1  ;;  %v2519_v15 = vrot.slane %v8584_v42, 2 }
 0x24a   : > { %2940 = vmatprep.mubr.bf16.mxu1 %v2506_v55  ;;  %v5060_v60 = vpop.f32.mrb[71].mxu0  ;;  %v7007_v58 = vadd.f32 %v2217_v56, %v2017_v1  ;;  %v2019_v36 = vpop.f32.mrb[65].mxu1  ;;  %v2502_v1 = vsel %vm2335_vm6, %v2489_v3, %v2501_v28 }
 0x24b   : > { %v2020_v24 = vpop.f32.mrb[66].mxu1  ;;  %v2521_v36 = vor.u32 %v2520_v25, %v2519_v15  ;;  %v2512_v60 = vrot.slane %v8588_v13, 3  ;;  %v2531_v15 = vrot.slane %v6593_v51, 2  ;;  %v2532_v25 = vrot.slane %v6595_v2, 3 }
 0x24c   : > { %8583 = vst [vmem:[#allocation56_spill] sm:$0xff] %v7007_v58  ;;  %5182 = vmatmul.mubr.bf16.gmra.mrb[176].mxu0 %v2510_v19  ;;  %v7012_v4 = vadd.f32 %v2220_v23, %v2020_v24  ;;  %v2022_v61 = vpop.f32.mrb[67].mxu1  ;;  %v2518_v58 = vsel %vm2335_vm6, %v2505_v53, %v2517_v48  ;;  %v2527_v23 = vrot.slane %v6583_v16, 2  ;;  %v8592_v16 = vld [vmem:[#allocation67_spill] sm:$0xff] }
 0x24d   : > { %5185 = vmatprep.mubr.msk.bf16.mxu0 %vm5584_vm0, %v8397_v63  ;;  %v2528_v61 = vrot.slane %v6585_v33, 3  ;;  %v2522_v24 = vsel %vm2335_vm6, %v2509_v26, %v2521_v36  ;;  %v2513_v3 = vor.u32 %v2512_v60, %v2511_v20  ;;  %v2533_v20 = vor.u32 %v2532_v25, %v2531_v15  ;;  %v8591_v60 = vld [vmem:[#allocation72_spill] sm:$0xff]  ;;  %v8595_v25 = vld [vmem:[#allocation90_spill] sm:$0xff] }
 0x24e   : > { %8586 = vst [vmem:[#allocation75_spill] sm:$0xff] %v7012_v4  ;;  %v2523_v51 = vrot.slane %v8591_v60, 2  ;;  %v2524_v2 = vrot.slane %v8592_v16, 3  ;;  %v2543_v15 = vrot.slane %v6631_v22, 2 }
 0x24f   : > { %v2225_v55 = vpop.f32.mrb[72].mxu0  ;;  %v2529_v53 = vor.u32 %v2528_v61, %v2527_v23  ;;  %v2514_v26 = vsel %vm2335_vm6, %v2501_v28, %v2513_v3  ;;  %v8593_v23 = vld [vmem:[#allocation87_spill] sm:$0xff] }
 0x250   : > { %v5063_v56 = vpop.f32.mrb[73].mxu0  ;;  %v2539_v61 = vrot.slane %v8593_v23, 2  ;;  %v2525_v28 = vor.u32 %v2524_v2, %v2523_v51  ;;  %v8598_v51 = vld [vmem:[#allocation78_spill] sm:$0xff]  ;;  %v8599_v23 = vld [vmem:[#allocation73_spill] sm:$0xff] }
 0x251   : > { %2941 = vmatmul.mubr.bf16.gmra.mrb[172].mxu1 %v2502_v1  ;;  %v2228_v19 = vpop.f32.mrb[74].mxu0  ;;  %v2535_v22 = vrot.slane %v8598_v51, 2 }
 0x252   : > { %2948 = vmatprep.mubr.bf16.mxu1 %v2518_v58  ;;  %v5064_v8 = vpop.f32.mrb[75].mxu0  ;;  %v2025_v46 = vpop.f32.mrb[68].mxu1 }
 0x253   : > { %v7025_v56 = vadd.f32 %v2225_v55, %v2025_v46  ;;  %v2027_v1 = vpop.f32.mrb[69].mxu1  ;;  %v2530_v46 = vsel %vm2335_vm6, %v2517_v48, %v2529_v53 }
 0x254   : > { %5186 = vmatmul.mubr.bf16.gmra.mrb[180].mxu0 %v2522_v24  ;;  %v2028_v4 = vpop.f32.mrb[70].mxu1  ;;  %v8594_v24 = vld [vmem:[#allocation88_spill] sm:$0xff] }
 0x255   : > { %8589 = vst [vmem:[#allocation76_spill] sm:$0xff] %v7025_v56  ;;  %5189 = vmatprep.mubr.msk.bf16.mxu0 %vm5584_vm0, %v8397_v63  ;;  %v7029_v33 = vadd.f32 %v2228_v19, %v2028_v4  ;;  %v2030_v58 = vpop.f32.mrb[71].mxu1  ;;  %v2540_v1 = vrot.slane %v8594_v24, 3  ;;  %v2544_v56 = vrot.slane %v8595_v25, 3  ;;  %v2536_v25 = vrot.slane %v8599_v23, 3 }
 0x257   : > { %8590 = vst [vmem:[#allocation77_spill] sm:$0xff] %v7029_v33  ;;  %v2233_v8 = vpop.f32.mrb[76].mxu0  ;;  %v2534_v33 = vsel %vm2335_vm6, %v2521_v36, %v2533_v20  ;;  %v2541_v48 = vor.u32 %v2540_v1, %v2539_v61  ;;  %v2526_v36 = vsel %vm2335_vm6, %v2513_v3, %v2525_v28  ;;  %v2545_v2 = vor.u32 %v2544_v56, %v2543_v15  ;;  %v8600_v61 = vld [vmem:[#allocation92_spill] sm:$0xff]  ;;  %v8602_v56 = vld [vmem:[#allocation94_spill] sm:$0xff] }
 0x258   : > { %v5067_v55 = vpop.f32.mrb[77].mxu0  ;;  %v2551_v1 = vrot.slane %v8600_v61, 2  ;;  %v2537_v3 = vor.u32 %v2536_v25, %v2535_v22  ;;  %v2555_v15 = vrot.slane %v8602_v56, 2  ;;  %v8606_v25 = vld [vmem:[#allocation85_spill] sm:$0xff]  ;;  %v8607_v61 = vld [vmem:[#allocation79_spill] sm:$0xff] }
 0x259   : > { %2949 = vmatmul.mubr.bf16.gmra.mrb[176].mxu1 %v2514_v26  ;;  %v2236_v4 = vpop.f32.mrb[78].mxu0  ;;  %v2547_v56 = vrot.slane %v8606_v25, 2 }
 0x25a   : > { %2956 = vmatprep.mubr.bf16.mxu1 %v2530_v46  ;;  %v5068_v19 = vpop.f32.mrb[79].mxu0 }
 0x25c   : > { %v2033_v58 = vpop.f32.mrb[72].mxu1  ;;  %5190 = vmatmul.mubr.bf16.gmra.mrb[184].mxu0 %v2534_v33  ;;  %v2542_v33 = vsel %vm2335_vm6, %v2529_v53, %v2541_v48 }
 0x25d   : > { %v7040_v16 = vadd.f32 %v2233_v8, %v2033_v58  ;;  %v2035_v26 = vpop.f32.mrb[73].mxu1  ;;  %5193 = vmatprep.mubr.msk.bf16.mxu0 %vm5584_vm0, %v8397_v63  ;;  %v8601_v58 = vld [vmem:[#allocation93_spill] sm:$0xff] }
 0x25e   : > { %v2036_v55 = vpop.f32.mrb[74].mxu1  ;;  %v2552_v26 = vrot.slane %v8601_v58, 3 }
 0x25f   : > { %8596 = vst [vmem:[#allocation66_spill] sm:$0xff] %v7040_v16  ;;  %v7044_v46 = vadd.f32 %v2236_v4, %v2036_v55  ;;  %v2038_v19 = vpop.f32.mrb[75].mxu1  ;;  %v2241_v24 = vpop.f32.mrb[80].mxu0  ;;  %v8603_v16 = vld [vmem:[#allocation95_spill] sm:$0xff] }
 0x260   : > { %v5071_v8 = vpop.f32.mrb[81].mxu0  ;;  %v2556_v51 = vrot.slane %v8603_v16, 3  ;;  %v2553_v53 = vor.u32 %v2552_v26, %v2551_v1  ;;  %v2548_v16 = vrot.slane %v8607_v61, 3  ;;  %v8608_v1 = vld [vmem:[#allocation98_spill] sm:$0xff] }
 0x261   : > { %8597 = vst [vmem:[#allocation61_spill] sm:$0xff] %v7044_v46  ;;  %2957 = vmatmul.mubr.bf16.gmra.mrb[180].mxu1 %v2526_v36  ;;  %v2244_v4 = vpop.f32.mrb[82].mxu0  ;;  %v2546_v46 = vsel %vm2335_vm6, %v2533_v20, %v2545_v2  ;;  %v2538_v20 = vsel %vm2335_vm6, %v2525_v28, %v2537_v3  ;;  %v2563_v26 = vrot.slane %v8608_v1, 2 }
 0x262   : > { %2964 = vmatprep.mubr.bf16.mxu1 %v2542_v33  ;;  %v5072_v55 = vpop.f32.mrb[83].mxu0  ;;  %v2557_v22 = vor.u32 %v2556_v51, %v2555_v15  ;;  %v2549_v28 = vor.u32 %v2548_v16, %v2547_v56  ;;  %v2567_v51 = vrot.slane %v6695_v43, 2  ;;  %v8610_v15 = vld [vmem:[#allocation101_spill] sm:$0xff]  ;;  %v2559_v56 = vrot.slane %v6636_v14, 2  ;;  %v8613_v43 = vld [vmem:[#allocation86_spill] sm:$0xff] }
 0x264   : > { %v2041_v19 = vpop.f32.mrb[76].mxu1  ;;  %5194 = vmatmul.mubr.bf16.gmra.mrb[188].mxu0 %v2546_v46  ;;  %v2554_v46 = vsel %vm2335_vm6, %v2541_v48, %v2553_v53 }
 0x265   : > { %v7055_v23 = vadd.f32 %v2241_v24, %v2041_v19  ;;  %v2043_v36 = vpop.f32.mrb[77].mxu1  ;;  %5197 = vmatprep.mubr.msk.bf16.mxu0 %vm5584_vm0, %v8397_v63  ;;  %v8609_v19 = vld [vmem:[#allocation99_spill] sm:$0xff] }
 0x266   : > { %v2044_v8 = vpop.f32.mrb[78].mxu1  ;;  %v2564_v36 = vrot.slane %v8609_v19, 3 }
 0x267   : > { %8604 = vst [vmem:[#allocation72_spill] sm:$0xff] %v7055_v23  ;;  %v7059_v33 = vadd.f32 %v2244_v4, %v2044_v8  ;;  %v2046_v55 = vpop.f32.mrb[79].mxu1  ;;  %v2249_v58 = vpop.f32.mrb[84].mxu0  ;;  %v2568_v23 = vrot.slane %v8610_v15, 3  ;;  %v2560_v15 = vrot.slane %v8613_v43, 3 }
 0x268   : > { %v5075_v24 = vpop.f32.mrb[85].mxu0  ;;  %v2565_v48 = vor.u32 %v2564_v36, %v2563_v26  ;;  %v8614_v26 = vld [vmem:[#allocation104_spill] sm:$0xff] }
 0x269   : > { %8605 = vst [vmem:[#allocation111_spill] sm:$0xff] %v7059_v33  ;;  %2965 = vmatmul.mubr.bf16.gmra.mrb[184].mxu1 %v2538_v20  ;;  %v2252_v4 = vpop.f32.mrb[86].mxu0  ;;  %v2558_v33 = vsel %vm2335_vm6, %v2545_v2, %v2557_v22  ;;  %v2550_v2 = vsel %vm2335_vm6, %v2537_v3, %v2549_v28  ;;  %v2569_v16 = vor.u32 %v2568_v23, %v2567_v51  ;;  %v2575_v36 = vrot.slane %v8614_v26, 2 }
 0x26a   : > { %2972 = vmatprep.mubr.bf16.mxu1 %v2554_v46  ;;  %v5076_v8 = vpop.f32.mrb[87].mxu0  ;;  %v2561_v3 = vor.u32 %v2560_v15, %v2559_v56  ;;  %v2579_v23 = vrot.slane %v6744_v11, 2  ;;  %v2580_v51 = vrot.slane %v6746_v17, 3  ;;  %v8618_v15 = vld [vmem:[#allocation96_spill] sm:$0xff]  ;;  %v8619_v11 = vld [vmem:[#allocation91_spill] sm:$0xff] }
 0x26b   : > { %v2571_v56 = vrot.slane %v8618_v15, 2  ;;  %v2572_v17 = vrot.slane %v8619_v11, 3 }
 0x26c   : > { %v2049_v55 = vpop.f32.mrb[80].mxu1  ;;  %5198 = vmatmul.mubr.bf16.gmra.mrb[192].mxu0 %v2558_v33  ;;  %v2566_v33 = vsel %vm2335_vm6, %v2553_v53, %v2565_v48 }
 0x26d   : > { %v7070_v61 = vadd.f32 %v2249_v58, %v2049_v55  ;;  %v2051_v20 = vpop.f32.mrb[81].mxu1  ;;  %5201 = vmatprep.mubr.msk.bf16.mxu0 %vm5584_vm0, %v8397_v63  ;;  %v8615_v55 = vld [vmem:[#allocation105_spill] sm:$0xff]  ;;  %v2573_v15 = vor.u32 %v2572_v17, %v2571_v56  ;;  %v2583_v17 = vrot.slane %v6711_v7, 2 }
 0x26e   : > { %v2052_v24 = vpop.f32.mrb[82].mxu1  ;;  %v2576_v20 = vrot.slane %v8615_v55, 3  ;;  %v2591_v55 = vshll.u32 %v6739_v49, 16 }
 0x26f   : > { %8611 = vst [vmem:[#allocation85_spill] sm:$0xff] %v7070_v61  ;;  %v7074_v46 = vadd.f32 %v2252_v4, %v2052_v24  ;;  %v2054_v8 = vpop.f32.mrb[83].mxu1  ;;  %v2257_v19 = vpop.f32.mrb[88].mxu0 }
 0x270   : > { %v5079_v58 = vpop.f32.mrb[89].mxu0  ;;  %v2577_v53 = vor.u32 %v2576_v20, %v2575_v36  ;;  %v8620_v36 = vld [vmem:[#allocation97_spill] sm:$0xff] }
 0x271   : > { %8612 = vst [vmem:[#allocation98_spill] sm:$0xff] %v7074_v46  ;;  %2973 = vmatmul.mubr.bf16.gmra.mrb[188].mxu1 %v2550_v2  ;;  %v2260_v4 = vpop.f32.mrb[90].mxu0  ;;  %v2570_v46 = vsel %vm2335_vm6, %v2557_v22, %v2569_v16  ;;  %v2588_v58 = vshrl.u32 %v6739_v49, 16  ;;  %v2597_v20 = vshrl.u32 %v8620_v36, 16 }
 0x272   : > { %2980 = vmatprep.mubr.bf16.mxu1 %v2566_v33  ;;  %v5080_v24 = vpop.f32.mrb[91].mxu0 }
 0x273   : > { %v2590_v26 = vrot.slane %v2588_v58, 2  ;;  %v2599_v43 = vrot.slane %v2597_v20, 2  ;;  %v2574_v58 = vsel %vm2335_vm6, %v2561_v3, %v2573_v15 }
 0x274   : > { %v2057_v8 = vpop.f32.mrb[84].mxu1  ;;  %5202 = vmatmul.mubr.bf16.gmra.mrb[196].mxu0 %v2570_v46  ;;  %v2581_v46 = vor.u32 %v2580_v51, %v2579_v23 }
 0x275   : > { %v7085_v61 = vadd.f32 %v2257_v19, %v2057_v8  ;;  %v2059_v2 = vpop.f32.mrb[85].mxu1  ;;  %5205 = vmatprep.mubr.msk.bf16.mxu0 %vm5584_vm0, %v8397_v63  ;;  %v2562_v8 = vsel %vm2335_vm6, %v2549_v28, %v2561_v3 }
 0x276   : > { %v2060_v33 = vpop.f32.mrb[86].mxu1  ;;  %v2600_v2 = vshll.u32 %v8620_v36, 16  ;;  %v2582_v11 = vsel %vm2335_vm6, %v2569_v16, %v2581_v46  ;;  %v2584_v16 = vrot.slane %v6672_v54, 3 }
 0x277   : > { %8616 = vst [vmem:[#allocation112_spill] sm:$0xff] %v7085_v61  ;;  %v7091_v24 = vadd.f32 %v2260_v4, %v2060_v33  ;;  %v2062_v22 = vpop.f32.mrb[87].mxu1  ;;  %v2265_v19 = vpop.f32.mrb[92].mxu0  ;;  %v2578_v61 = vsel %vm2335_vm6, %v2565_v48, %v2577_v53  ;;  %v2593_v4 = vrot.slane %v2591_v55, 3 }
 0x278   : > { %v5083_v49 = vpop.f32.mrb[93].mxu0  ;;  %v2602_v28 = vrot.slane %v2600_v2, 3  ;;  %v2585_v2 = vor.u32 %v2584_v16, %v2583_v17  ;;  %v3273_v17 = vrot.slane %v5936_v44, 5 }
 0x279   : > { %8617 = vst [vmem:[#allocation113_spill] sm:$0xff] %v7091_v24  ;;  %2981 = vmatmul.mubr.bf16.gmra.mrb[192].mxu1 %v2562_v8  ;;  %v2268_v33 = vpop.f32.mrb[94].mxu0  ;;  %v2594_v36 = vor.u32 %v2593_v4, %v2590_v26 }
 0x27a   : > { %2988 = vmatprep.mubr.bf16.mxu1 %v2578_v61  ;;  %v5084_v22 = vpop.f32.mrb[95].mxu0  ;;  %v2603_v49 = vor.u32 %v2602_v28, %v2599_v43 }
 0x27c   : > { %v2065_v24 = vpop.f32.mrb[88].mxu1  ;;  %5206 = vmatmul.mubr.bf16.gmra.mrb[200].mxu0 %v2582_v11  ;;  %v2595_v11 = vsel %vm2335_vm6, %v2577_v53, %v2594_v36  ;;  %v2604_v20 = vsel %vm2335_vm6, %v2581_v46, %v2603_v49  ;;  %v2586_v53 = vsel %vm2335_vm6, %v2573_v15, %v2585_v2  ;;  %v3276_v46 = vrot.slane %v5996_v10, 5 }
 0x27d   : > { %v7100_v23 = vadd.f32 %v2265_v19, %v2065_v24  ;;  %v2067_v51 = vpop.f32.mrb[89].mxu1  ;;  %5209 = vmatprep.mubr.msk.bf16.mxu0 %vm5584_vm0, %v8397_v63  ;;  %v3279_v10 = vrot.slane %v5922_v29, 4  ;;  %v3291_v29 = vrot.slane %v8513_v32, 5 }
 0x27e   : > { %v2068_v8 = vpop.f32.mrb[90].mxu1 }
 0x27f   : > { %v7104_v48 = vadd.f32 %v2268_v33, %v2068_v8  ;;  %v2070_v61 = vpop.f32.mrb[91].mxu1  ;;  %v2273_v55 = vpop.f32.mrb[96].mxu0  ;;  %v3275_v8 = vrot.slane %v5994_v9, 4 }
 0x280   : > { %v5087_v24 = vpop.f32.mrb[97].mxu0 }
 0x281   : > { %2989 = vmatmul.mubr.bf16.gmra.mrb[196].mxu1 %v2574_v58  ;;  %v2276_v26 = vpop.f32.mrb[98].mxu0  ;;  %v3272_v58 = vrot.slane %v5934_v41, 4  ;;  %v3282_v24 = vrot.slane %v5972_v38, 4  ;;  %v3280_v41 = vrot.slane %v5924_v31, 5 }
 0x282   : > { %2996 = vmatprep.mubr.bf16.mxu1 %v2595_v11  ;;  %v5088_v56 = vpop.f32.mrb[99].mxu0  ;;  %v3283_v11 = vrot.slane %v5974_v39, 5  ;;  %v3268_v39 = vrot.slane %v5928_v37, 4 }
 0x283   : > { %v3277_v56 = vor.u32 %v3276_v46, %v3275_v8 }
 0x284   : > { %v2073_v19 = vpop.f32.mrb[92].mxu1  ;;  %5210 = vmatmul.mubr.bf16.gmra.mrb[204].mxu0 %v2604_v20  ;;  %v3284_v20 = vor.u32 %v3283_v11, %v3282_v24 }
 0x285   : > { %v7111_v4 = vadd.f32 %v2273_v55, %v2073_v19  ;;  %v2075_v33 = vpop.f32.mrb[93].mxu1  ;;  %5213 = vmatprep.mubr.msk.bf16.mxu0 %vm5584_vm0, %v8397_v63  ;;  %v3274_v19 = vor.u32 %v3273_v17, %v3272_v58 }
 0x286   : > { %v2076_v43 = vpop.f32.mrb[94].mxu1  ;;  %v3269_v33 = vrot.slane %v8511_v0, 5 }
 0x287   : > { %v7115_v3 = vadd.f32 %v2276_v26, %v2076_v43  ;;  %v2078_v22 = vpop.f32.mrb[95].mxu1  ;;  %v2281_v28 = vpop.f32.mrb[100].mxu0  ;;  %v3278_v43 = vsel %vm3264_vm7, %v3274_v19, %v3277_v56 }
 0x288   : > { %v5091_v51 = vpop.f32.mrb[101].mxu0  ;;  %v3290_v22 = vrot.slane %v8512_v5, 4  ;;  %v3270_v0 = vor.u32 %v3269_v33, %v3268_v39 }
 0x289   : > { %2997 = vmatmul.mubr.bf16.gmra.mrb[200].mxu1 %v2586_v53  ;;  %v2284_v61 = vpop.f32.mrb[102].mxu0  ;;  %v3265_v53 = vrot.slane %v5876_v35, 4  ;;  %v3266_v51 = vrot.slane %v5874_v34, 5 }
 0x28a   : > { %3004 = vmatprep.mubr.bf16.mxu1 %v2594_v36  ;;  %v5092_v55 = vpop.f32.mrb[103].mxu0  ;;  %v3292_v32 = vor.u32 %v3291_v29, %v3290_v22 }
 0x28b   : > { %v3267_v17 = vor.u32 %v3266_v51, %v3265_v53 }
 0x28c   : > { %v2081_v16 = vpop.f32.mrb[96].mxu1  ;;  %5214 = vmatmul.mubr.bf16.gmra.mrb[208].mxu0 %v2603_v49 }
 0x28d   : > { %v7124_v26 = vadd.f32 %v2281_v28, %v2081_v16  ;;  %v2083_v15 = vpop.f32.mrb[97].mxu1  ;;  %5233 = vmatprep.mubr.msk.bf16.mxu0 %vm5584_vm0, %v8397_v63  ;;  %v3281_v28 = vor.u32 %v3280_v41, %v3279_v10  ;;  %v3271_v24 = vsel %vm3264_vm7, %v3267_v17, %v3270_v0  ;;  %v3302_v10 = vrot.slane %v8518_v52, 4  ;;  %v8621_v41 = vld [vmem:[#allocation22_spill] sm:$0xff]  ;;  %v8626_v17 = vld [vmem:[#allocation27_spill] sm:$0xff] }
 0x28e   : > { %v2084_v9 = vpop.f32.mrb[98].mxu1 }
 0x28f   : > { %v7130_v36 = vadd.f32 %v2284_v61, %v2084_v9  ;;  %v2086_v44 = vpop.f32.mrb[99].mxu1  ;;  %v2289_v38 = vpop.f32.mrb[104].mxu0  ;;  %v3285_v37 = vsel %vm3264_vm7, %v3281_v28, %v3284_v20  ;;  %v3295_v61 = vrot.slane %v8515_v12, 5  ;;  %v3287_v12 = vrot.slane %v8517_v50, 5 }
 0x290   : > { %v5095_v49 = vpop.f32.mrb[105].mxu0  ;;  %v3293_v9 = vsel %vm3264_vm7, %v3277_v56, %v3292_v32  ;;  %v3303_v44 = vrot.slane %v8621_v41, 5 }
 0x291   : > { %3005 = vmatmul.mubr.bf16.gmra.mrb[204].mxu1 %v2585_v2  ;;  %v2292_v31 = vpop.f32.mrb[106].mxu0  ;;  %v3294_v2 = vrot.slane %v8514_v30, 4  ;;  %v3286_v30 = vrot.slane %v8516_v57, 4  ;;  %v8623_v57 = vld [vmem:[#allocation20_spill] sm:$0xff] }
 0x292   : > { %3779 = vmatprep.mubr.bf16.mxu1 %v3278_v43  ;;  %v5096_v8 = vpop.f32.mrb[107].mxu0  ;;  %v8622_v43 = vld [vmem:[#allocation19_spill] sm:$0xff]  ;;  %v3307_v29 = vrot.slane %v8623_v57, 5  ;;  %v3304_v56 = vor.u32 %v3303_v44, %v3302_v10  ;;  %v8628_v10 = vld [vmem:[#allocation25_spill] sm:$0xff]  ;;  %v8629_v44 = vld [vmem:[#allocation26_spill] sm:$0xff] }
 0x293   : > { %v3296_v11 = vor.u32 %v3295_v61, %v3294_v2  ;;  %v3288_v49 = vor.u32 %v3287_v12, %v3286_v30  ;;  %v3306_v22 = vrot.slane %v8622_v43, 4  ;;  %v8625_v2 = vld [vmem:[#allocation11_spill] sm:$0xff]  ;;  %v3318_v41 = vrot.slane %v8628_v10, 4 }
 0x294   : > { %v2089_v46 = vpop.f32.mrb[100].mxu1  ;;  %5234 = vmatmul.mubr.bf16.vlgmr.msra.gmra.mrb[212].mxu0 %v3285_v37  ;;  %v3299_v61 = vrot.slane %v8625_v2, 5 }
 0x295   : > { %v7142_v55 = vadd.f32 %v2289_v38, %v2089_v46  ;;  %v2091_v5 = vpop.f32.mrb[101].mxu1  ;;  %5237 = vmatprep.mubr.msk.bf16.mxu0 %vm5584_vm0, %v8397_v63  ;;  %v3297_v33 = vsel %vm3264_vm7, %v3284_v20, %v3296_v11  ;;  %v3289_v20 = vsel %vm3264_vm7, %v3270_v0, %v3288_v49  ;;  %v3308_v8 = vor.u32 %v3307_v29, %v3306_v22  ;;  %v8624_v46 = vld [vmem:[#allocation12_spill] sm:$0xff] }
 0x296   : > { %v2092_v58 = vpop.f32.mrb[102].mxu1  ;;  %v3298_v37 = vrot.slane %v8624_v46, 4 }
 0x297   : > { %v7146_v34 = vadd.f32 %v2292_v31, %v2092_v58  ;;  %v2094_v35 = vpop.f32.mrb[103].mxu1  ;;  %v2297_v16 = vpop.f32.mrb[108].mxu0  ;;  %v3305_v58 = vsel %vm3264_vm7, %v3292_v32, %v3304_v56 }
 0x298   : > { %v5099_v15 = vpop.f32.mrb[109].mxu0  ;;  %v3314_v35 = vrot.slane %v8626_v17, 4  ;;  %v3300_v0 = vor.u32 %v3299_v61, %v3298_v37  ;;  %v8632_v37 = vld [vmem:[#allocation33_spill] sm:$0xff]  ;;  %v8633_v61 = vld [vmem:[#allocation36_spill] sm:$0xff] }
 0x299   : > { %3780 = vmatmul.mubr.bf16.vlgmr.msra.gmra.mrb[208].mxu1 %v3271_v24  ;;  %v2300_v19 = vpop.f32.mrb[110].mxu0  ;;  %v3326_v2 = vrot.slane %v8632_v37, 4 }
 0x29a   : > { %3787 = vmatprep.mubr.bf16.mxu1 %v3293_v9  ;;  %v5100_v38 = vpop.f32.mrb[111].mxu0  ;;  %v3309_v9 = vsel %vm3264_vm7, %v3296_v11, %v3308_v8  ;;  %v3301_v11 = vsel %vm3264_vm7, %v3288_v49, %v3300_v0 }
 0x29c   : > { %v2097_v39 = vpop.f32.mrb[104].mxu1  ;;  %5238 = vmatmul.mubr.bf16.gmra.mrb[216].mxu0 %v3297_v33 }
 0x29d   : > { %v7157_v50 = vadd.f32 %v2297_v16, %v2097_v39  ;;  %v2099_v31 = vpop.f32.mrb[105].mxu1  ;;  %5241 = vmatprep.mubr.msk.bf16.mxu0 %vm5584_vm0, %v8397_v63  ;;  %v8627_v16 = vld [vmem:[#allocation28_spill] sm:$0xff] }
 0x29e   : > { %v2100_v28 = vpop.f32.mrb[106].mxu1  ;;  %v3315_v24 = vrot.slane %v8627_v16, 5  ;;  %v8630_v31 = vld [vmem:[#allocation18_spill] sm:$0xff] }
 0x29f   : > { %v7161_v52 = vadd.f32 %v2300_v19, %v2100_v28  ;;  %v2102_v53 = vpop.f32.mrb[107].mxu1  ;;  %v2305_v51 = vpop.f32.mrb[112].mxu0  ;;  %v3319_v19 = vrot.slane %v8629_v44, 5  ;;  %v3310_v28 = vrot.slane %v8630_v31, 4  ;;  %v8637_v31 = vld [vmem:[#allocation23_spill] sm:$0xff] }
 0x2a0   : > { %v5103_v5 = vpop.f32.mrb[113].mxu0  ;;  %v3316_v32 = vor.u32 %v3315_v24, %v3314_v35  ;;  %v8631_v53 = vld [vmem:[#allocation17_spill] sm:$0xff]  ;;  %v8634_v24 = vld [vmem:[#allocation31_spill] sm:$0xff] }
 0x2a1   : > { %3788 = vmatmul.mubr.bf16.gmra.mrb[212].mxu1 %v3289_v20  ;;  %v2308_v30 = vpop.f32.mrb[114].mxu0  ;;  %v3320_v29 = vor.u32 %v3319_v19, %v3318_v41  ;;  %v3311_v20 = vrot.slane %v8631_v53, 5  ;;  %v3327_v5 = vrot.slane %v8633_v61, 5 }
 0x2a2   : > { %3795 = vmatprep.mubr.bf16.mxu1 %v3305_v58  ;;  %v5104_v12 = vpop.f32.mrb[115].mxu0  ;;  %v3317_v46 = vsel %vm3264_vm7, %v3304_v56, %v3316_v32 }
 0x2a3   : > { %v3321_v16 = vsel %vm3264_vm7, %v3308_v8, %v3320_v29  ;;  %v3312_v49 = vor.u32 %v3311_v20, %v3310_v28  ;;  %v8635_v12 = vld [vmem:[#allocation32_spill] sm:$0xff]  ;;  %v3328_v56 = vor.u32 %v3327_v5, %v3326_v2  ;;  %v3323_v28 = vrot.slane %v8637_v31, 5  ;;  %v8638_v20 = vld [vmem:[#allocation41_spill] sm:$0xff] }
 0x2a4   : > { %v2105_v15 = vpop.f32.mrb[108].mxu1  ;;  %5242 = vmatmul.mubr.bf16.gmra.mrb[220].mxu0 %v3309_v9 }
 0x2a5   : > { %v7172_v38 = vadd.f32 %v2305_v51, %v2105_v15  ;;  %v2107_v39 = vpop.f32.mrb[109].mxu1  ;;  %5245 = vmatprep.mubr.msk.bf16.mxu0 %vm5584_vm0, %v8397_v63  ;;  %v3331_v15 = vrot.slane %v8635_v12, 5  ;;  %v3313_v8 = vsel %vm3264_vm7, %v3300_v0, %v3312_v49  ;;  %v3329_v53 = vsel %vm3264_vm7, %v3316_v32, %v3328_v56 }
 0x2a6   : > { %v2108_v33 = vpop.f32.mrb[110].mxu1 }
 0x2a7   : > { %v7176_v43 = vadd.f32 %v2308_v30, %v2108_v33  ;;  %v2110_v22 = vpop.f32.mrb[111].mxu1  ;;  %v2313_v57 = vpop.f32.mrb[116].mxu0  ;;  %v3330_v30 = vrot.slane %v8634_v24, 4 }
 0x2a8   : > { %v5107_v51 = vpop.f32.mrb[117].mxu0  ;;  %v8636_v22 = vld [vmem:[#allocation24_spill] sm:$0xff] }
 0x2a9   : > { %3796 = vmatmul.mubr.bf16.gmra.mrb[216].mxu1 %v3301_v11  ;;  %v2316_v58 = vpop.f32.mrb[118].mxu0  ;;  %v3332_v33 = vor.u32 %v3331_v15, %v3330_v30  ;;  %v3322_v11 = vrot.slane %v8636_v22, 4  ;;  %v3338_v51 = vrot.slane %v8638_v20, 4  ;;  %v8642_v22 = vld [vmem:[#allocation29_spill] sm:$0xff] }
 0x2aa   : > { %3803 = vmatprep.mubr.bf16.mxu1 %v3317_v46  ;;  %v5108_v17 = vpop.f32.mrb[119].mxu0  ;;  %v8639_v46 = vld [vmem:[#allocation42_spill] sm:$0xff] }
 0x2ab   : > { %v3339_v37 = vrot.slane %v8639_v46, 5  ;;  %v3324_v0 = vor.u32 %v3323_v28, %v3322_v11  ;;  %v3342_v17 = vrot.slane %v8539_v59, 4  ;;  %v3335_v11 = vrot.slane %v8642_v22, 5  ;;  %v8643_v28 = vld [vmem:[#allocation47_spill] sm:$0xff] }
 0x2ac   : > { %v2113_v35 = vpop.f32.mrb[112].mxu1  ;;  %5246 = vmatmul.mubr.bf16.gmra.mrb[224].mxu0 %v3321_v16 }
 0x2ad   : > { %v7187_v9 = vadd.f32 %v2313_v57, %v2113_v35  ;;  %v2115_v10 = vpop.f32.mrb[113].mxu1  ;;  %5249 = vmatprep.mubr.msk.bf16.mxu0 %vm5584_vm0, %v8397_v63  ;;  %v8640_v35 = vld [vmem:[#allocation40_spill] sm:$0xff]  ;;  %v3340_v32 = vor.u32 %v3339_v37, %v3338_v51 }
 0x2ae   : > { %v2116_v41 = vpop.f32.mrb[114].mxu1  ;;  %v3343_v16 = vrot.slane %v8640_v35, 5 }
 0x2af   : > { %v7191_v44 = vadd.f32 %v2316_v58, %v2116_v41  ;;  %v2118_v19 = vpop.f32.mrb[115].mxu1  ;;  %v2321_v39 = vpop.f32.mrb[120].mxu0  ;;  %v3333_v58 = vsel %vm3264_vm7, %v3320_v29, %v3332_v33  ;;  %v3325_v29 = vsel %vm3264_vm7, %v3312_v49, %v3324_v0  ;;  %v3341_v31 = vsel %vm3264_vm7, %v3328_v56, %v3340_v32 }
 0x2b0   : > { %v5111_v57 = vpop.f32.mrb[121].mxu0  ;;  %v3344_v19 = vor.u32 %v3343_v16, %v3342_v17 }
 0x2b1   : > { %3804 = vmatmul.mubr.bf16.gmra.mrb[220].mxu1 %v3313_v8  ;;  %v2324_v2 = vpop.f32.mrb[122].mxu0  ;;  %v8641_v8 = vld [vmem:[#allocation30_spill] sm:$0xff]  ;;  %v3350_v57 = vrot.slane %v8643_v28, 4 }
 0x2b2   : > { %3811 = vmatprep.mubr.bf16.mxu1 %v3329_v53  ;;  %v5112_v61 = vpop.f32.mrb[123].mxu0  ;;  %v3334_v59 = vrot.slane %v8641_v8, 4  ;;  %v8644_v53 = vld [vmem:[#allocation48_spill] sm:$0xff]  ;;  %v8646_v8 = vld [vmem:[#allocation37_spill] sm:$0xff] }
 0x2b3   : > { %v3351_v20 = vrot.slane %v8644_v53, 5  ;;  %v3354_v61 = vrot.slane %v8546_v45, 4  ;;  %v3347_v45 = vrot.slane %v8646_v8, 5 }
 0x2b4   : > { %v2121_v5 = vpop.f32.mrb[116].mxu1  ;;  %5250 = vmatmul.mubr.bf16.gmra.mrb[228].mxu0 %v3333_v58  ;;  %v3336_v49 = vor.u32 %v3335_v11, %v3334_v59  ;;  %v8647_v59 = vld [vmem:[#allocation57_spill] sm:$0xff]  ;;  %v8648_v11 = vld [vmem:[#allocation58_spill] sm:$0xff] }
 0x2b5   : > { %v7202_v24 = vadd.f32 %v2321_v39, %v2121_v5  ;;  %v2123_v30 = vpop.f32.mrb[117].mxu1  ;;  %5253 = vmatprep.mubr.msk.bf16.mxu0 %vm5584_vm0, %v8397_v63  ;;  %v3355_v5 = vrot.slane %v8547_v47, 5  ;;  %v3352_v56 = vor.u32 %v3351_v20, %v3350_v57  ;;  %v3362_v22 = vrot.slane %v8647_v59, 4  ;;  %v8649_v20 = vld [vmem:[#allocation53_spill] sm:$0xff] }
 0x2b6   : > { %v2124_v12 = vpop.f32.mrb[118].mxu1 }
 0x2b7   : > { %v7206_v15 = vadd.f32 %v2324_v2, %v2124_v12  ;;  %v2126_v10 = vpop.f32.mrb[119].mxu1  ;;  %v2329_v41 = vpop.f32.mrb[124].mxu0  ;;  %v3345_v2 = vsel %vm3264_vm7, %v3332_v33, %v3344_v19  ;;  %v3337_v12 = vsel %vm3264_vm7, %v3324_v0, %v3336_v49  ;;  %v8645_v33 = vld [vmem:[#allocation38_spill] sm:$0xff] }
 0x2b8   : > { %v5115_v39 = vpop.f32.mrb[125].mxu0  ;;  %v3356_v10 = vor.u32 %v3355_v5, %v3354_v61 }
 0x2b9   : > { %3812 = vmatmul.mubr.bf16.gmra.mrb[224].mxu1 %v3325_v29  ;;  %v2332_v51 = vpop.f32.mrb[126].mxu0  ;;  %v3346_v29 = vrot.slane %v8645_v33, 4  ;;  %v3363_v39 = vrot.slane %v8648_v11, 5 }
 0x2ba   : > { %3819 = vmatprep.mubr.bf16.mxu1 %v3341_v31  ;;  %v5116_v46 = vpop.f32.mrb[127].mxu0  ;;  %v3357_v53 = vsel %vm3264_vm7, %v3344_v19, %v3356_v10  ;;  %v3366_v51 = vrot.slane %v8649_v20, 4 }
 0x2bb   : > { %v3348_v0 = vor.u32 %v3347_v45, %v3346_v29  ;;  %v8650_v46 = vld [vmem:[#allocation54_spill] sm:$0xff] }
 0x2bc   : > { %v2129_v37 = vpop.f32.mrb[120].mxu1  ;;  %5254 = vmatmul.mubr.bf16.gmra.mrb[232].mxu0 %v3345_v2  ;;  %v8651_v2 = vld [vmem:[#allocation8_spill] sm:$0xff]  ;;  %v8653_v45 = vld [vmem:[#allocation46_spill] sm:$0xff] }
 0x2bd   : > { %v7217_v58 = vadd.f32 %v2329_v41, %v2129_v37  ;;  %v2131_v17 = vpop.f32.mrb[121].mxu1  ;;  %5257 = vmatprep.mubr.msk.bf16.mxu0 %vm5584_vm0, %v8397_v63  ;;  %v3353_v41 = vsel %vm3264_vm7, %v3340_v32, %v3352_v56  ;;  %v3367_v37 = vrot.slane %v8650_v46, 5  ;;  %v3364_v32 = vor.u32 %v3363_v39, %v3362_v22 }
 0x2be   : > { %v2132_v35 = vpop.f32.mrb[122].mxu1  ;;  %v3349_v29 = vsel %vm3264_vm7, %v3336_v49, %v3348_v0 }
 0x2bf   : > { %v2133_v16 = vpop.f32.mrb[123].mxu1  ;;  %v3046_v30 = vpop.f32.mrb[128].mxu0  ;;  %v3368_v8 = vor.u32 %v3367_v37, %v3366_v51  ;;  %v3365_v39 = vsel %vm3264_vm7, %v3352_v56, %v3364_v32  ;;  %v3378_v37 = vrot.slane %v8560_v18, 4 }
 0x2c0   : > { %v5135_v47 = vpop.f32.mrb[129].mxu0  ;;  %v8652_v16 = vld [vmem:[#allocation15_spill] sm:$0xff] }
 0x2c1   : > { %3820 = vmatmul.mubr.bf16.gmra.mrb[228].mxu1 %v3337_v12  ;;  %v3049_v31 = vpop.f32.mrb[130].mxu0  ;;  %v3358_v47 = vrot.slane %v8653_v45, 4  ;;  %v3369_v49 = vsel %vm3264_vm7, %v3356_v10, %v3368_v8  ;;  %v8658_v45 = vld [vmem:[#allocation51_spill] sm:$0xff] }
 0x2c2   : > { %3827 = vmatprep.mubr.bf16.mxu1 %v3353_v41  ;;  %v5136_v28 = vpop.f32.mrb[131].mxu0  ;;  %v8654_v41 = vld [vmem:[#allocation43_spill] sm:$0xff] }
 0x2c3   : > { %v3359_v59 = vrot.slane %v8654_v41, 5  ;;  %v8655_v28 = vld [vmem:[#allocation59_spill] sm:$0xff] }
 0x2c4   : > { %v2846_v57 = vpop.f32.mrb[124].mxu1  ;;  %5258 = vmatmul.mubr.bf16.gmra.mrb[236].mxu0 %v3357_v53 }
 0x2c5   : > { %v2847_v61 = vadd.f32 %v2846_v57, %v8651_v2  ;;  %v2848_v5 = vpop.f32.mrb[125].mxu1  ;;  %5261 = vmatprep.mubr.msk.bf16.mxu0 %vm5584_vm0, %v8397_v63  ;;  %v3375_v57 = vrot.slane %v8558_v6, 5  ;;  %v3360_v51 = vor.u32 %v3359_v59, %v3358_v47  ;;  %v8656_v2 = vld [vmem:[#allocation16_spill] sm:$0xff]  ;;  %v8659_v47 = vld [vmem:[#allocation49_spill] sm:$0xff] }
 0x2c6   : > { %v2849_v17 = vpop.f32.mrb[126].mxu1  ;;  %v3371_v41 = vrot.slane %v8659_v47, 5 }
 0x2c7   : > { %v7233_v35 = vadd.f32 %v3046_v30, %v2847_v61  ;;  %v2850_v12 = vadd.f32 %v2849_v17, %v8652_v16  ;;  %v2851_v33 = vpop.f32.mrb[127].mxu1  ;;  %v3054_v19 = vpop.f32.mrb[132].mxu0  ;;  %v3374_v30 = vrot.slane %v8655_v28, 4  ;;  %v8657_v16 = vld [vmem:[#allocation13_spill] sm:$0xff]  ;;  %v8660_v28 = vld [vmem:[#allocation62_spill] sm:$0xff] }
 0x2c8   : > { %v5139_v22 = vpop.f32.mrb[133].mxu0 }
 0x2c9   : > { %v7239_v11 = vadd.f32 %v3049_v31, %v2850_v12  ;;  %3828 = vmatmul.mubr.bf16.gmra.mrb[232].mxu1 %v3349_v29  ;;  %v3057_v53 = vpop.f32.mrb[134].mxu0  ;;  %v3379_v31 = vrot.slane %v8561_v40, 5  ;;  %v3376_v56 = vor.u32 %v3375_v57, %v3374_v30  ;;  %v3361_v29 = vsel %vm3264_vm7, %v3348_v0, %v3360_v51  ;;  %v8661_v30 = vld [vmem:[#allocation63_spill] sm:$0xff] }
 0x2ca   : > { %3835 = vmatprep.mubr.bf16.mxu1 %v3365_v39  ;;  %v5140_v20 = vpop.f32.mrb[135].mxu0  ;;  %v3370_v40 = vrot.slane %v8658_v45, 4  ;;  %v3387_v57 = vrot.slane %v8661_v30, 5 }
 0x2cb   : > { %v3380_v18 = vor.u32 %v3379_v31, %v3378_v37  ;;  %v3377_v39 = vsel %vm3264_vm7, %v3364_v32, %v3376_v56  ;;  %v8662_v31 = vld [vmem:[#allocation64_spill] sm:$0xff] }
 0x2cc   : > { %v2854_v46 = vpop.f32.mrb[128].mxu1  ;;  %5262 = vmatmul.mubr.bf16.gmra.mrb[240].mxu0 %v3369_v49  ;;  %v3372_v37 = vor.u32 %v3371_v41, %v3370_v40 }
 0x2cd   : > { %v2855_v61 = vadd.f32 %v2854_v46, %v8656_v2  ;;  %v2856_v5 = vpop.f32.mrb[129].mxu1  ;;  %5265 = vmatprep.mubr.msk.bf16.mxu0 %vm5584_vm0, %v8397_v63  ;;  %v3381_v0 = vsel %vm3264_vm7, %v3368_v8, %v3380_v18  ;;  %v3390_v2 = vrot.slane %v8662_v31, 4 }
 0x2ce   : > { %v2857_v17 = vpop.f32.mrb[130].mxu1  ;;  %v8664_v5 = vld [vmem:[#allocation14_spill] sm:$0xff]  ;;  %v3373_v40 = vsel %vm3264_vm7, %v3360_v51, %v3372_v37 }
 0x2cf   : > { %v7250_v6 = vadd.f32 %v3054_v19, %v2855_v61  ;;  %v2858_v12 = vadd.f32 %v2857_v17, %v8657_v16  ;;  %v2859_v33 = vpop.f32.mrb[131].mxu1  ;;  %v3062_v10 = vpop.f32.mrb[136].mxu0  ;;  %v3386_v19 = vrot.slane %v8660_v28, 4  ;;  %v8663_v61 = vld [vmem:[#allocation65_spill] sm:$0xff]  ;;  %v8667_v28 = vld [vmem:[#allocation50_spill] sm:$0xff] }
 0x2d0   : > { %v5143_v22 = vpop.f32.mrb[137].mxu0  ;;  %v3383_v30 = vrot.slane %v8667_v28, 5  ;;  %v8673_v28 = vld [vmem:[#allocation21_spill] sm:$0xff] }
 0x2d1   : > { %v7256_v59 = vadd.f32 %v3057_v53, %v2858_v12  ;;  %3836 = vmatmul.mubr.bf16.gmra.mrb[236].mxu1 %v3361_v29  ;;  %v3065_v20 = vpop.f32.mrb[138].mxu0  ;;  %v3391_v53 = vrot.slane %v8663_v61, 5  ;;  %v3388_v32 = vor.u32 %v3387_v57, %v3386_v19  ;;  %v8665_v29 = vld [vmem:[#allocation10_spill] sm:$0xff]  ;;  %v8666_v22 = vld [vmem:[#allocation52_spill] sm:$0xff] }
 0x2d2   : > { %3843 = vmatprep.mubr.bf16.mxu1 %v3377_v39  ;;  %v5144_v46 = vpop.f32.mrb[139].mxu0  ;;  %v3382_v39 = vrot.slane %v8666_v22, 4 }
 0x2d3   : > { %v3392_v41 = vor.u32 %v3391_v53, %v3390_v2  ;;  %v3389_v57 = vsel %vm3264_vm7, %v3376_v56, %v3388_v32  ;;  %v8670_v53 = vld [vmem:[#allocation70_spill] sm:$0xff] }
 0x2d4   : > { %v2862_v49 = vpop.f32.mrb[132].mxu1  ;;  %5266 = vmatmul.mubr.bf16.gmra.mrb[244].mxu0 %v3381_v0  ;;  %v8669_v0 = vld [vmem:[#allocation69_spill] sm:$0xff]  ;;  %v3384_v2 = vor.u32 %v3383_v30, %v3382_v39 }
 0x2d5   : > { %v2863_v17 = vadd.f32 %v2862_v49, %v8664_v5  ;;  %v2864_v16 = vpop.f32.mrb[133].mxu1  ;;  %5269 = vmatprep.mubr.msk.bf16.mxu0 %vm5584_vm0, %v8397_v63  ;;  %v8668_v49 = vld [vmem:[#allocation68_spill] sm:$0xff]  ;;  %v3399_v31 = vrot.slane %v8669_v0, 5  ;;  %v3393_v51 = vsel %vm3264_vm7, %v3380_v18, %v3392_v41 }
 0x2d6   : > { %v2865_v12 = vpop.f32.mrb[134].mxu1  ;;  %v3402_v16 = vrot.slane %v8670_v53, 4  ;;  %v3385_v39 = vsel %vm3264_vm7, %v3372_v37, %v3384_v2 }
 0x2d7   : > { %v7267_v33 = vadd.f32 %v3062_v10, %v2863_v17  ;;  %v2866_v45 = vadd.f32 %v2865_v12, %v8665_v29  ;;  %v2867_v47 = vpop.f32.mrb[135].mxu1  ;;  %v3070_v8 = vpop.f32.mrb[140].mxu0  ;;  %v3398_v10 = vrot.slane %v8668_v49, 4  ;;  %v8671_v12 = vld [vmem:[#allocation71_spill] sm:$0xff]  ;;  %v8672_v29 = vld [vmem:[#allocation9_spill] sm:$0xff] }
 0x2d8   : > { %v5147_v19 = vpop.f32.mrb[141].mxu0  ;;  %v8674_v49 = vld [vmem:[#allocation35_spill] sm:$0xff] }
 0x2d9   : > { %v7273_v46 = vadd.f32 %v3065_v20, %v2866_v45  ;;  %3844 = vmatmul.mubr.bf16.gmra.mrb[240].mxu1 %v3373_v40  ;;  %v3073_v61 = vpop.f32.mrb[142].mxu0  ;;  %v3403_v20 = vrot.slane %v8671_v12, 5  ;;  %v3400_v56 = vor.u32 %v3399_v31, %v3398_v10  ;;  %v3394_v0 = vrot.slane %v8674_v49, 4 }
 0x2da   : > { %3851 = vmatprep.mubr.bf16.mxu1 %v3389_v57  ;;  %v5148_v5 = vpop.f32.mrb[143].mxu0  ;;  %v3411_v12 = vrot.slane %v8582_v62, 5 }
 0x2db   : > { %v3404_v30 = vor.u32 %v3403_v20, %v3402_v16  ;;  %v8675_v5 = vld [vmem:[#allocation34_spill] sm:$0xff]  ;;  %v3401_v31 = vsel %vm3264_vm7, %v3388_v32, %v3400_v56  ;;  %v3414_v16 = vrot.slane %v8584_v42, 4  ;;  %v3415_v20 = vrot.slane %v8585_v27, 5 }
 0x2dc   : > { %v2870_v17 = vpop.f32.mrb[136].mxu1  ;;  %5270 = vmatmul.mubr.bf16.gmra.mrb[248].mxu0 %v3393_v51  ;;  %v8676_v51 = vld [vmem:[#allocation74_spill] sm:$0xff]  ;;  %v3406_v27 = vrot.slane %v8587_v21, 4 }
 0x2dd   : > { %v2871_v45 = vadd.f32 %v2870_v17, %v8672_v29  ;;  %v2872_v47 = vpop.f32.mrb[137].mxu1  ;;  %5273 = vmatprep.mubr.msk.bf16.mxu0 %vm5584_vm0, %v8397_v63  ;;  %v3395_v17 = vrot.slane %v8675_v5, 5  ;;  %v3405_v37 = vsel %vm3264_vm7, %v3392_v41, %v3404_v30  ;;  %v3416_v41 = vor.u32 %v3415_v20, %v3414_v16  ;;  %v8681_v16 = vld [vmem:[#allocation82_spill] sm:$0xff] }
 0x2de   : > { %v2873_v40 = vpop.f32.mrb[138].mxu1  ;;  %v3426_v20 = vrot.slane %v8681_v16, 4  ;;  %v8686_v16 = vld [vmem:[#allocation87_spill] sm:$0xff] }
 0x2df   : > { %v7284_v22 = vadd.f32 %v3070_v8, %v2871_v45  ;;  %v2874_v19 = vadd.f32 %v2873_v40, %v8673_v28  ;;  %v2875_v57 = vpop.f32.mrb[139].mxu1  ;;  %v3078_v18 = vpop.f32.mrb[144].mxu0  ;;  %v3410_v8 = vrot.slane %v8676_v51, 4  ;;  %v8677_v40 = vld [vmem:[#allocation44_spill] sm:$0xff]  ;;  %v3417_v21 = vsel %vm3264_vm7, %v3404_v30, %v3416_v41 }
 0x2e0   : > { %v5151_v10 = vpop.f32.mrb[145].mxu0  ;;  %v3418_v30 = vrot.slane %v8591_v60, 4 }
 0x2e1   : > { %v7290_v53 = vadd.f32 %v3073_v61, %v2874_v19  ;;  %3852 = vmatmul.mubr.bf16.gmra.mrb[244].mxu1 %v3385_v39  ;;  %v3081_v29 = vpop.f32.mrb[146].mxu0  ;;  %v3396_v61 = vor.u32 %v3395_v17, %v3394_v0  ;;  %v3412_v32 = vor.u32 %v3411_v12, %v3410_v8  ;;  %v8678_v39 = vld [vmem:[#allocation45_spill] sm:$0xff]  ;;  %v3407_v0 = vrot.slane %v8588_v13, 5  ;;  %v8679_v8 = vld [vmem:[#allocation80_spill] sm:$0xff] }
 0x2e2   : > { %3859 = vmatprep.mubr.bf16.mxu1 %v3401_v31  ;;  %v5152_v45 = vpop.f32.mrb[147].mxu0  ;;  %v8680_v12 = vld [vmem:[#allocation81_spill] sm:$0xff] }
 0x2e3   : > { %v3397_v42 = vsel %vm3264_vm7, %v3384_v2, %v3396_v61  ;;  %v3413_v51 = vsel %vm3264_vm7, %v3400_v56, %v3412_v32  ;;  %v3423_v45 = vrot.slane %v8680_v12, 5  ;;  %v8682_v2 = vld [vmem:[#allocation83_spill] sm:$0xff] }
 0x2e4   : > { %v2878_v47 = vpop.f32.mrb[140].mxu1  ;;  %5274 = vmatmul.mubr.bf16.gmra.mrb[252].mxu0 %v3405_v37 }
 0x2e5   : > { %v2879_v28 = vadd.f32 %v2878_v47, %v8677_v40  ;;  %v2880_v19 = vpop.f32.mrb[141].mxu1  ;;  %5277 = vmatprep.mubr.msk.bf16.mxu0 %vm5584_vm0, %v8397_v63  ;;  %v3427_v40 = vrot.slane %v8682_v2, 5  ;;  %v8687_v2 = vld [vmem:[#allocation88_spill] sm:$0xff] }
 0x2e6   : > { %v2881_v57 = vpop.f32.mrb[142].mxu1 }
 0x2e7   : > { %v7301_v62 = vadd.f32 %v3078_v18, %v2879_v28  ;;  %v2882_v49 = vadd.f32 %v2881_v57, %v8678_v39  ;;  %v2883_v5 = vpop.f32.mrb[143].mxu1  ;;  %v3086_v10 = vpop.f32.mrb[148].mxu0  ;;  %v3422_v18 = vrot.slane %v8679_v8, 4  ;;  %v8683_v28 = vld [vmem:[#allocation60_spill] sm:$0xff]  ;;  %v3428_v12 = vor.u32 %v3427_v40, %v3426_v20 }
 0x2e8   : > { %v5155_v31 = vpop.f32.mrb[149].mxu0  ;;  %v8684_v5 = vld [vmem:[#allocation55_spill] sm:$0xff]  ;;  %v8690_v20 = vld [vmem:[#allocation56_spill] sm:$0xff] }
 0x2e9   : > { %v7307_v17 = vadd.f32 %v3081_v29, %v2882_v49  ;;  %3860 = vmatmul.mubr.bf16.gmra.mrb[248].mxu1 %v3397_v42  ;;  %v3089_v47 = vpop.f32.mrb[150].mxu0  ;;  %v3408_v29 = vor.u32 %v3407_v0, %v3406_v27  ;;  %v3424_v56 = vor.u32 %v3423_v45, %v3422_v18  ;;  %v8685_v27 = vld [vmem:[#allocation67_spill] sm:$0xff] }
 0x2ea   : > { %3867 = vmatprep.mubr.bf16.mxu1 %v3413_v51  ;;  %v5156_v37 = vpop.f32.mrb[151].mxu0  ;;  %v3419_v0 = vrot.slane %v8685_v27, 5  ;;  %v8691_v27 = vld [vmem:[#allocation75_spill] sm:$0xff] }
 0x2eb   : > { %v3409_v8 = vsel %vm3264_vm7, %v3396_v61, %v3408_v29  ;;  %v3425_v45 = vsel %vm3264_vm7, %v3412_v32, %v3424_v56 }
 0x2ec   : > { %v2886_v13 = vpop.f32.mrb[144].mxu1  ;;  %5278 = vmatmul.mubr.bf16.gmra.mrb[0].mxu0 %v3417_v21  ;;  %v3435_v21 = vrot.slane %v8687_v2, 5  ;;  %v8692_v2 = vld [vmem:[#allocation78_spill] sm:$0xff] }
 0x2ed   : > { %v2887_v19 = vadd.f32 %v2886_v13, %v8683_v28  ;;  %v2888_v57 = vpop.f32.mrb[145].mxu1  ;;  %5281 = vmatprep.mubr.msk.bf16.mxu0 %vm5584_vm0, %v8397_v63 }
 0x2ee   : > { %v2889_v39 = vpop.f32.mrb[146].mxu1  ;;  %v8689_v57 = vld [vmem:[#allocation90_spill] sm:$0xff] }
 0x2ef   : > { %v7318_v49 = vadd.f32 %v3086_v10, %v2887_v19  ;;  %v2890_v42 = vadd.f32 %v2889_v39, %v8684_v5  ;;  %v2891_v31 = vpop.f32.mrb[147].mxu1  ;;  %v3094_v51 = vpop.f32.mrb[152].mxu0  ;;  %v3434_v10 = vrot.slane %v8686_v16, 4  ;;  %v8688_v19 = vld [vmem:[#allocation89_spill] sm:$0xff]  ;;  %v3439_v60 = vrot.slane %v8689_v57, 5 }
 0x2f0   : > { %v5159_v18 = vpop.f32.mrb[153].mxu0  ;;  %v3438_v61 = vrot.slane %v8688_v19, 4  ;;  %v3420_v39 = vor.u32 %v3419_v0, %v3418_v30 }
 0x2f1   : > { %v7324_v37 = vadd.f32 %v3089_v47, %v2890_v42  ;;  %3868 = vmatmul.mubr.bf16.gmra.mrb[252].mxu1 %v3409_v8  ;;  %v3097_v13 = vpop.f32.mrb[154].mxu0  ;;  %v3429_v47 = vsel %vm3264_vm7, %v3416_v41, %v3428_v12  ;;  %v3436_v32 = vor.u32 %v3435_v21, %v3434_v10  ;;  %v3430_v41 = vrot.slane %v8692_v2, 4 }
 0x2f2   : > { %3875 = vmatprep.mubr.bf16.mxu1 %v3425_v45  ;;  %v5160_v28 = vpop.f32.mrb[155].mxu0  ;;  %v3421_v16 = vsel %vm3264_vm7, %v3408_v29, %v3420_v39  ;;  %v3440_v0 = vor.u32 %v3439_v60, %v3438_v61  ;;  %v8696_v29 = vld [vmem:[#allocation94_spill] sm:$0xff]  ;;  %v8697_v61 = vld [vmem:[#allocation95_spill] sm:$0xff] }
 0x2f3   : > { %v8693_v28 = vld [vmem:[#allocation73_spill] sm:$0xff]  ;;  %v3437_v21 = vsel %vm3264_vm7, %v3424_v56, %v3436_v32  ;;  %v3451_v60 = vrot.slane %v8697_v61, 5 }
 0x2f4   : > { %v2894_v5 = vpop.f32.mrb[148].mxu1  ;;  %5282 = vmatmul.mubr.bf16.gmra.mrb[4].mxu0 %v3429_v47  ;;  %v3431_v19 = vrot.slane %v8693_v28, 5  ;;  %v8695_v47 = vld [vmem:[#allocation93_spill] sm:$0xff] }
 0x2f5   : > { %v2895_v40 = vadd.f32 %v2894_v5, %v8690_v20  ;;  %v2896_v42 = vpop.f32.mrb[149].mxu1  ;;  %5285 = vmatprep.mubr.msk.bf16.mxu0 %vm5584_vm0, %v8397_v63  ;;  %v8694_v5 = vld [vmem:[#allocation92_spill] sm:$0xff]  ;;  %v3447_v20 = vrot.slane %v8695_v47, 5 }
 0x2f6   : > { %v2897_v31 = vpop.f32.mrb[150].mxu1 }
 0x2f7   : > { %v7335_v8 = vadd.f32 %v3094_v51, %v2895_v40  ;;  %v2898_v18 = vadd.f32 %v2897_v31, %v8691_v27  ;;  %v2899_v45 = vpop.f32.mrb[151].mxu1  ;;  %v3102_v30 = vpop.f32.mrb[156].mxu0  ;;  %v3446_v51 = vrot.slane %v8694_v5, 4  ;;  %v3450_v31 = vrot.slane %v8696_v29, 4 }
 0x2f8   : > { %v5163_v10 = vpop.f32.mrb[157].mxu0  ;;  %v3441_v45 = vsel %vm3264_vm7, %v3428_v12, %v3440_v0  ;;  %v3442_v12 = vrot.slane %v8606_v25, 4 }
 0x2f9   : > { %v7341_v57 = vadd.f32 %v3097_v13, %v2898_v18  ;;  %3876 = vmatmul.mubr.bf16.gmra.mrb[0].mxu1 %v3421_v16  ;;  %v3105_v40 = vpop.f32.mrb[158].mxu0  ;;  %v3432_v13 = vor.u32 %v3431_v19, %v3430_v41  ;;  %v8698_v18 = vld [vmem:[#allocation76_spill] sm:$0xff]  ;;  %v3448_v56 = vor.u32 %v3447_v20, %v3446_v51  ;;  %v3452_v61 = vor.u32 %v3451_v60, %v3450_v31  ;;  %v8700_v41 = vld [vmem:[#allocation79_spill] sm:$0xff]  ;;  %v8703_v31 = vld [vmem:[#allocation101_spill] sm:$0xff] }
 0x2fa   : > { %3883 = vmatprep.mubr.bf16.mxu1 %v3437_v21  ;;  %v5164_v42 = vpop.f32.mrb[159].mxu0  ;;  %v8699_v21 = vld [vmem:[#allocation77_spill] sm:$0xff]  ;;  %v3443_v19 = vrot.slane %v8700_v41, 5  ;;  %v3463_v60 = vrot.slane %v8703_v31, 5 }
 0x2fb   : > { %v3433_v29 = vsel %vm3264_vm7, %v3420_v39, %v3432_v13  ;;  %v3449_v20 = vsel %vm3264_vm7, %v3436_v32, %v3448_v56 }
 0x2fc   : > { %v2902_v27 = vpop.f32.mrb[152].mxu1  ;;  %5286 = vmatmul.mubr.bf16.gmra.mrb[8].mxu0 %v3441_v45  ;;  %v8701_v45 = vld [vmem:[#allocation99_spill] sm:$0xff] }
 0x2fd   : > { %v2903_v16 = vadd.f32 %v2902_v27, %v8698_v18  ;;  %v2904_v2 = vpop.f32.mrb[153].mxu1  ;;  %5289 = vmatprep.mubr.msk.bf16.mxu0 %vm5584_vm0, %v8397_v63  ;;  %v3459_v18 = vrot.slane %v8701_v45, 5 }
 0x2fe   : > { %v2905_v28 = vpop.f32.mrb[154].mxu1 }
 0x2ff   : > { %v7352_v10 = vadd.f32 %v3102_v30, %v2903_v16  ;;  %v2906_v5 = vadd.f32 %v2905_v28, %v8699_v21  ;;  %v2907_v47 = vpop.f32.mrb[155].mxu1  ;;  %v3110_v42 = vpop.f32.mrb[160].mxu0  ;;  %v3458_v30 = vrot.slane %v8608_v1, 4  ;;  %v8702_v28 = vld [vmem:[#allocation100_spill] sm:$0xff]  ;;  %v3453_v21 = vsel %vm3264_vm7, %v3440_v0, %v3452_v61 }
 0x300   : > { %v5167_v51 = vpop.f32.mrb[161].mxu0  ;;  %v3462_v39 = vrot.slane %v8702_v28, 4  ;;  %v3454_v0 = vrot.slane %v6636_v14, 4 }
 0x301   : > { %v7358_v27 = vadd.f32 %v3105_v40, %v2906_v5  ;;  %3884 = vmatmul.mubr.bf16.gmra.mrb[4].mxu1 %v3433_v29  ;;  %v3113_v16 = vpop.f32.mrb[162].mxu0  ;;  %v3444_v40 = vor.u32 %v3443_v19, %v3442_v12  ;;  %v8704_v5 = vld [vmem:[#allocation66_spill] sm:$0xff]  ;;  %v3460_v32 = vor.u32 %v3459_v18, %v3458_v30  ;;  %v8705_v51 = vld [vmem:[#allocation61_spill] sm:$0xff] }
 0x302   : > { %3891 = vmatprep.mubr.bf16.mxu1 %v3449_v20  ;;  %v5168_v2 = vpop.f32.mrb[163].mxu0  ;;  %v3464_v31 = vor.u32 %v3463_v60, %v3462_v39  ;;  %v8706_v12 = vld [vmem:[#allocation86_spill] sm:$0xff]  ;;  %v8711_v39 = vld [vmem:[#allocation107_spill] sm:$0xff] }
 0x303   : > { %v3445_v28 = vsel %vm3264_vm7, %v3432_v13, %v3444_v40  ;;  %v3455_v19 = vrot.slane %v8706_v12, 5  ;;  %v3461_v18 = vsel %vm3264_vm7, %v3448_v56, %v3460_v32  ;;  %v3475_v60 = vrot.slane %v8711_v39, 5 }
 0x304   : > { %v2910_v25 = vpop.f32.mrb[156].mxu1  ;;  %5290 = vmatmul.mubr.bf16.gmra.mrb[12].mxu0 %v3453_v21  ;;  %v8708_v21 = vld [vmem:[#allocation104_spill] sm:$0xff] }
 0x305   : > { %v2911_v47 = vadd.f32 %v2910_v25, %v8704_v5  ;;  %v2912_v29 = vpop.f32.mrb[157].mxu1  ;;  %5293 = vmatprep.mubr.msk.bf16.mxu0 %vm5584_vm0, %v8397_v63  ;;  %v8709_v5 = vld [vmem:[#allocation105_spill] sm:$0xff] }
 0x306   : > { %v2913_v41 = vpop.f32.mrb[158].mxu1 }
 0x307   : > { %v7369_v1 = vadd.f32 %v3110_v42, %v2911_v47  ;;  %v2914_v20 = vadd.f32 %v2913_v41, %v8705_v51  ;;  %v2915_v45 = vpop.f32.mrb[159].mxu1  ;;  %v3118_v2 = vpop.f32.mrb[164].mxu0  ;;  %v3470_v42 = vrot.slane %v8708_v21, 4  ;;  %v3471_v47 = vrot.slane %v8709_v5, 5  ;;  %v8710_v51 = vld [vmem:[#allocation106_spill] sm:$0xff]  ;;  %v8714_v21 = vld [vmem:[#allocation111_spill] sm:$0xff] }
 0x308   : > { %v5171_v30 = vpop.f32.mrb[165].mxu0  ;;  %v3474_v13 = vrot.slane %v8710_v51, 4  ;;  %v3465_v45 = vsel %vm3264_vm7, %v3452_v61, %v3464_v31  ;;  %v8715_v61 = vld [vmem:[#allocation96_spill] sm:$0xff] }
 0x309   : > { %v7375_v25 = vadd.f32 %v3113_v16, %v2914_v20  ;;  %3892 = vmatmul.mubr.bf16.gmra.mrb[8].mxu1 %v3445_v28  ;;  %v3121_v29 = vpop.f32.mrb[166].mxu0  ;;  %v3456_v16 = vor.u32 %v3455_v19, %v3454_v0  ;;  %v8712_v20 = vld [vmem:[#allocation72_spill] sm:$0xff]  ;;  %v3472_v56 = vor.u32 %v3471_v47, %v3470_v42  ;;  %v3466_v0 = vrot.slane %v8715_v61, 4  ;;  %v8716_v19 = vld [vmem:[#allocation91_spill] sm:$0xff] }
 0x30a   : > { %3899 = vmatprep.mubr.bf16.mxu1 %v3461_v18  ;;  %v5172_v41 = vpop.f32.mrb[167].mxu0 }
 0x30b   : > { %8707 = vst [vmem:[#allocation97_spill] sm:$0xff] %v7375_v25  ;;  %v3457_v39 = vsel %vm3264_vm7, %v3444_v40, %v3456_v16  ;;  %v3476_v25 = vor.u32 %v3475_v60, %v3474_v13  ;;  %v3473_v47 = vsel %vm3264_vm7, %v3460_v32, %v3472_v56  ;;  %v8721_v40 = vld [vmem:[#allocation102_spill] sm:$0xff] }
 0x30c   : > { %v2918_v14 = vpop.f32.mrb[160].mxu1  ;;  %5294 = vmatmul.mubr.bf16.gmra.mrb[16].mxu0 %v3465_v45  ;;  %v8718_v45 = vld [vmem:[#allocation108_spill] sm:$0xff]  ;;  %v8722_v13 = vld [vmem:[#allocation110_spill] sm:$0xff] }
 0x30d   : > { %v2919_v28 = vadd.f32 %v2918_v14, %v8712_v20  ;;  %v2920_v12 = vpop.f32.mrb[161].mxu1  ;;  %5297 = vmatprep.mubr.msk.bf16.mxu0 %vm5584_vm0, %v8397_v63  ;;  %v3467_v14 = vrot.slane %v8716_v19, 5  ;;  %v3212_v60 = vsel %vm950_vm4, %v8722_v13, %v8721_v40 }
 0x30e   : > { %v2921_v30 = vpop.f32.mrb[162].mxu1  ;;  %v8720_v12 = vshll.u32 %v8718_v45, 16 }
 0x30f   : > { %v7386_v18 = vadd.f32 %v3118_v2, %v2919_v28  ;;  %v2922_v5 = vadd.f32 %v2921_v30, %v8714_v21  ;;  %v2923_v41 = vpop.f32.mrb[163].mxu1  ;;  %v3126_v51 = vpop.f32.mrb[168].mxu0  ;;  %v8719_v2 = vshrl.u32 %v8718_v45, 16 }
 0x310   : > { %v5175_v42 = vpop.f32.mrb[169].mxu0  ;;  %v3483_v30 = vrot.slane %v8720_v12, 5  ;;  %v8724_v12 = vld [vmem:[#allocation98_spill] sm:$0xff] }
 0x311   : > { %8713 = vst [vmem:[#allocation22_spill] sm:$0xff] %v7386_v18  ;;  %v7392_v20 = vadd.f32 %v3121_v29, %v2922_v5  ;;  %3900 = vmatmul.mubr.bf16.gmra.mrb[12].mxu1 %v3457_v39  ;;  %v3482_v28 = vrot.slane %v8719_v2, 4  ;;  %v3129_v21 = vpop.f32.mrb[170].mxu0  ;;  %v3477_v29 = vsel %vm3264_vm7, %v3464_v31, %v3476_v25  ;;  %v3468_v5 = vor.u32 %v3467_v14, %v3466_v0  ;;  %v8723_v39 = vld [vmem:[#allocation85_spill] sm:$0xff] }
 0x312   : > { %3907 = vmatprep.mubr.bf16.mxu1 %v3473_v47  ;;  %v5176_v41 = vpop.f32.mrb[171].mxu0  ;;  %v3495_v2 = vshrl.u32 %v3212_v60, 16  ;;  %v3478_v0 = vrot.slane %v6711_v7, 4  ;;  %v3479_v14 = vrot.slane %v6672_v54, 5 }
 0x313   : > { %8717 = vst [vmem:[#allocation19_spill] sm:$0xff] %v7392_v20  ;;  %v3484_v42 = vor.u32 %v3483_v30, %v3482_v28  ;;  %v3498_v20 = vshll.u32 %v3212_v60, 16  ;;  %v3469_v31 = vsel %vm3264_vm7, %v3456_v16, %v3468_v5 }
 0x314   : > { %v2926_v61 = vpop.f32.mrb[164].mxu1  ;;  %5298 = vmatmul.mubr.bf16.gmra.mrb[20].mxu0 %v3477_v29  ;;  %v3497_v60 = vrot.slane %v3495_v2, 4  ;;  %v3480_v16 = vor.u32 %v3479_v14, %v3478_v0 }
 0x315   : > { %v2927_v19 = vadd.f32 %v2926_v61, %v8723_v39  ;;  %v2928_v32 = vpop.f32.mrb[165].mxu1  ;;  %5301 = vmatprep.mubr.msk.bf16.mxu0 %vm5584_vm0, %v8397_v63  ;;  %v3485_v30 = vsel %vm3264_vm7, %v3472_v56, %v3484_v42  ;;  %v3500_v29 = vrot.slane %v3498_v20, 5  ;;  %v8727_v20 = vld [vmem:[#allocation113_spill] sm:$0xff] }
 0x316   : > { %v2929_v45 = vpop.f32.mrb[166].mxu1  ;;  %v8725_v32 = vld [vmem:[#allocation103_spill] sm:$0xff]  ;;  %v3481_v0 = vsel %vm3264_vm7, %v3468_v5, %v3480_v16 }
 0x317   : > { %v7406_v47 = vadd.f32 %v3126_v51, %v2927_v19  ;;  %v2930_v13 = vadd.f32 %v2929_v45, %v8724_v12  ;;  %v2931_v41 = vpop.f32.mrb[167].mxu1  ;;  %v3134_v18 = vpop.f32.mrb[172].mxu0  ;;  %v3489_v45 = vsel %vm3264_vm7, %v3476_v25, %v8725_v32  ;;  %v8726_v12 = vld [vmem:[#allocation112_spill] sm:$0xff]  ;;  %v3501_v54 = vor.u32 %v3500_v29, %v3497_v60 }
 0x318   : > { %v5179_v28 = vpop.f32.mrb[173].mxu0 }
 0x319   : > { %v7412_v61 = vadd.f32 %v3129_v21, %v2930_v13  ;;  %3908 = vmatmul.mubr.bf16.gmra.mrb[16].mxu1 %v3469_v31  ;;  %v3137_v51 = vpop.f32.mrb[174].mxu0  ;;  %v3512_v31 = vshrl.u32 %v8721_v40, 16  ;;  %v3515_v28 = vshll.u32 %v8721_v40, 16  ;;  %v3502_v60 = vsel %vm3264_vm7, %v3484_v42, %v3501_v54 }
 0x31a   : > { %3915 = vmatprep.mubr.bf16.mxu1 %v3485_v30  ;;  %v5180_v39 = vpop.f32.mrb[175].mxu0 }
 0x31b   : > { %v3514_v39 = vrot.slane %v3512_v31, 4 }
 0x31c   : > { %v2934_v19 = vpop.f32.mrb[168].mxu1  ;;  %5302 = vmatmul.mubr.bf16.gmra.mrb[24].mxu0 %v3489_v45 }
 0x31d   : > { %v2935_v7 = vadd.f32 %v2934_v19, %v8726_v12  ;;  %v2936_v41 = vpop.f32.mrb[169].mxu1  ;;  %5305 = vmatprep.mubr.msk.bf16.mxu0 %vm5584_vm0, %v8397_v63  ;;  %v3517_v19 = vrot.slane %v3515_v28, 5 }
 0x31e   : > { %v2937_v21 = vpop.f32.mrb[170].mxu1 }
 0x31f   : > { %v7420_v56 = vadd.f32 %v3134_v18, %v2935_v7  ;;  %v2938_v2 = vadd.f32 %v2937_v21, %v8727_v20  ;;  %v2939_v13 = vpop.f32.mrb[171].mxu1  ;;  %v3142_v25 = vpop.f32.mrb[176].mxu0  ;;  %v8728_v7 = vld [vmem:[#allocation39_spill] sm:$0xff]  ;;  %v3518_v41 = vor.u32 %v3517_v19, %v3514_v39  ;;  %v8729_v20 = vld [vmem:[#allocation84_spill] sm:$0xff] }
 0x320   : > { %v5183_v30 = vpop.f32.mrb[177].mxu0  ;;  %v8730_v13 = vmov 0  }
 0x321   : > { %v7426_v14 = vadd.f32 %v3137_v51, %v2938_v2  ;;  %3916 = vmatmul.mubr.bf16.gmra.mrb[20].mxu1 %v3481_v0  ;;  %v3145_v29 = vpop.f32.mrb[178].mxu0  ;;  %v3493_v2 = vsel %vm3264_vm7, %v3480_v16, %v8729_v20  ;;  %v3507_v31 = vrot.slane %v8730_v13, 4  ;;  %v3519_v30 = vsel %vm3264_vm7, %v3501_v54, %v3518_v41 }
 0x322   : > { %3923 = vmatprep.mubr.bf16.mxu1 %v3502_v60  ;;  %v5184_v18 = vpop.f32.mrb[179].mxu0 }
 0x323   : > { %v8731_v18 = vld [vmem:[#allocation109_spill] sm:$0xff] }
 0x324   : > { %v2942_v32 = vpop.f32.mrb[172].mxu1  ;;  %5306 = vmatmul.mubr.bf16.gmra.mrb[28].mxu0 %v8728_v7  ;;  %v3528_v39 = vsel %vm3264_vm7, %v8731_v18, %v3518_v41 }
 0x325   : > { %v2943_v45 = vadd.f32 %v2942_v32, %v7100_v23  ;;  %v2944_v12 = vpop.f32.mrb[173].mxu1  ;;  %5309 = vmatprep.mubr.msk.bf16.mxu0 %vm5584_vm0, %v8397_v63  ;;  %v3508_v23 = vrot.slane %v8730_v13, 5 }
 0x326   : > { %v2945_v40 = vpop.f32.mrb[174].mxu1 }
 0x327   : > { %v7433_v5 = vadd.f32 %v3142_v25, %v2943_v45  ;;  %v2946_v51 = vadd.f32 %v2945_v40, %v7104_v48  ;;  %v2947_v42 = vpop.f32.mrb[175].mxu1  ;;  %v3150_v21 = vpop.f32.mrb[180].mxu0  ;;  %v3509_v32 = vor.u32 %v3508_v23, %v3507_v31  ;;  %v3534_v40 = vsel %vm3264_vm7, %v3518_v41, %v3508_v23 }
 0x328   : > { %v5187_v0 = vpop.f32.mrb[181].mxu0  ;;  %v3539_v31 = vsel %vm3264_vm7, %v3518_v41, %v3517_v19 }
 0x329   : > { %v7440_v28 = vadd.f32 %v3145_v29, %v2946_v51  ;;  %3924 = vmatmul.mubr.bf16.gmra.mrb[24].mxu1 %v3493_v2  ;;  %v3153_v25 = vpop.f32.mrb[182].mxu0  ;;  %v3510_v42 = vsel %vm3264_vm7, %v8729_v20, %v3509_v32 }
 0x32a   : > { %3931 = vmatprep.mubr.bf16.mxu1 %v3519_v30  ;;  %v5188_v60 = vpop.f32.mrb[183].mxu0 }
 0x32b   : > { %v3529_v60 = vsel %vm3264_vm7, %v3509_v32, %v3508_v23 }
 0x32c   : > { %v2950_v48 = vpop.f32.mrb[176].mxu1  ;;  %5310 = vmatmul.mubr.bf16.gmra.mrb[32].mxu0 %v3528_v39 }
 0x32d   : > { %v2951_v16 = vadd.f32 %v2950_v48, %v7111_v4  ;;  %v2952_v45 = vpop.f32.mrb[177].mxu1  ;;  %5313 = vmatprep.mubr.msk.bf16.mxu0 %vm5584_vm0, %v8397_v63 }
 0x32e   : > { %v2953_v12 = vpop.f32.mrb[178].mxu1 }
 0x32f   : > { %v7448_v29 = vadd.f32 %v3150_v21, %v2951_v16  ;;  %v2954_v54 = vadd.f32 %v2953_v12, %v7115_v3  ;;  %v2955_v7 = vpop.f32.mrb[179].mxu1  ;;  %v3158_v51 = vpop.f32.mrb[184].mxu0 }
 0x330   : > { %v5191_v4 = vpop.f32.mrb[185].mxu0 }
 0x331   : > { %v7454_v2 = vadd.f32 %v3153_v25, %v2954_v54  ;;  %3932 = vmatmul.mubr.bf16.gmra.mrb[28].mxu1 %v3510_v42  ;;  %v3161_v13 = vpop.f32.mrb[186].mxu0 }
 0x332   : > { %3939 = vmatprep.mubr.bf16.mxu1 %v3534_v40  ;;  %v5192_v63 = vpop.f32.mrb[187].mxu0 }
 0x334   : > { %v2958_v21 = vpop.f32.mrb[180].mxu1  ;;  %5314 = vmatmul.mubr.bf16.gmra.mrb[36].mxu0 %v3539_v31 }
 0x335   : > { %v2959_v0 = vadd.f32 %v2958_v21, %v7124_v26  ;;  %v2960_v3 = vpop.f32.mrb[181].mxu1 }
 0x336   : > { %v2961_v30 = vpop.f32.mrb[182].mxu1 }
 0x337   : > { %v7459_v48 = vadd.f32 %v3158_v51, %v2959_v0  ;;  %v2962_v20 = vadd.f32 %v2961_v30, %v7130_v36  ;;  %v2963_v25 = vpop.f32.mrb[183].mxu1  ;;  %v3166_v18 = vpop.f32.mrb[188].mxu0 }
 0x338   : > { %v5195_v19 = vpop.f32.mrb[189].mxu0 }
 0x339   : > { %v7462_v39 = vadd.f32 %v3161_v13, %v2962_v20  ;;  %3940 = vmatmul.mubr.bf16.gmra.mrb[32].mxu1 %v3529_v60  ;;  %v3169_v41 = vpop.f32.mrb[190].mxu0 }
 0x33a   : > { %v5196_v16 = vpop.f32.mrb[191].mxu0 }
 0x33c   : > { %v2966_v45 = vpop.f32.mrb[184].mxu1 }
 0x33d   : > { %v2967_v26 = vadd.f32 %v2966_v45, %v7142_v55  ;;  %v2968_v12 = vpop.f32.mrb[185].mxu1 }
 0x33e   : > { %v2969_v54 = vpop.f32.mrb[186].mxu1 }
 0x33f   : > { %v7465_v7 = vadd.f32 %v3166_v18, %v2967_v26  ;;  %v2970_v23 = vadd.f32 %v2969_v54, %v7146_v34  ;;  %v2971_v32 = vpop.f32.mrb[187].mxu1  ;;  %v3174_v40 = vpop.f32.mrb[192].mxu0 }
 0x340   : > { %v5199_v51 = vpop.f32.mrb[193].mxu0 }
 0x341   : > { %v7468_v36 = vadd.f32 %v3169_v41, %v2970_v23  ;;  %v3177_v42 = vpop.f32.mrb[194].mxu0 }
 0x342   : > { %v5200_v4 = vpop.f32.mrb[195].mxu0 }
 0x344   : > { %v2974_v13 = vpop.f32.mrb[188].mxu1 }
 0x345   : > { %v2975_v31 = vadd.f32 %v2974_v13, %v7157_v50  ;;  %v2976_v63 = vpop.f32.mrb[189].mxu1 }
 0x346   : > { %v2977_v21 = vpop.f32.mrb[190].mxu1 }
 0x347   : > { %v7471_v0 = vadd.f32 %v3174_v40, %v2975_v31  ;;  %v2978_v55 = vadd.f32 %v2977_v21, %v7161_v52  ;;  %v2979_v3 = vpop.f32.mrb[191].mxu1  ;;  %v3182_v30 = vpop.f32.mrb[196].mxu0 }
 0x348   : > { %v5203_v34 = vpop.f32.mrb[197].mxu0 }
 0x349   : > { %v7474_v60 = vadd.f32 %v3177_v42, %v2978_v55  ;;  %v3185_v20 = vpop.f32.mrb[198].mxu0 }
 0x34a   : > { %v5204_v25 = vpop.f32.mrb[199].mxu0 }
 0x34c   : > { %v2982_v18 = vpop.f32.mrb[192].mxu1 }
 0x34d   : > { %v2983_v19 = vadd.f32 %v2982_v18, %v7172_v38  ;;  %v2984_v41 = vpop.f32.mrb[193].mxu1 }
 0x34e   : > { %v2985_v16 = vpop.f32.mrb[194].mxu1 }
 0x34f   : > { %v7477_v45 = vadd.f32 %v3182_v30, %v2983_v19  ;;  %v2986_v50 = vadd.f32 %v2985_v16, %v7176_v43  ;;  %v2987_v26 = vpop.f32.mrb[195].mxu1  ;;  %v3190_v12 = vpop.f32.mrb[200].mxu0 }
 0x350   : > { %v5207_v52 = vpop.f32.mrb[201].mxu0 }
 0x351   : > { %v7480_v54 = vadd.f32 %v3185_v20, %v2986_v50  ;;  %v3193_v23 = vpop.f32.mrb[202].mxu0 }
 0x352   : > { %v5208_v32 = vpop.f32.mrb[203].mxu0 }
 0x354   : > { %v2990_v40 = vpop.f32.mrb[196].mxu1 }
 0x355   : > { %v2991_v51 = vadd.f32 %v2990_v40, %v7187_v9  ;;  %v2992_v42 = vpop.f32.mrb[197].mxu1 }
 0x356   : > { %v2993_v4 = vpop.f32.mrb[198].mxu1 }
 0x357   : > { %v7483_v13 = vadd.f32 %v3190_v12, %v2991_v51  ;;  %v2994_v38 = vadd.f32 %v2993_v4, %v7191_v44  ;;  %v2995_v31 = vpop.f32.mrb[199].mxu1  ;;  %v3198_v63 = vpop.f32.mrb[204].mxu0 }
 0x358   : > { %v5211_v43 = vpop.f32.mrb[205].mxu0 }
 0x359   : > { %v7486_v21 = vadd.f32 %v3193_v23, %v2994_v38  ;;  %v3201_v55 = vpop.f32.mrb[206].mxu0 }
 0x35a   : > { %v5212_v3 = vpop.f32.mrb[207].mxu0 }
 0x35c   : > { %v2998_v30 = vpop.f32.mrb[200].mxu1 }
 0x35d   : > { %v2999_v34 = vadd.f32 %v2998_v30, %v7202_v24  ;;  %v3000_v20 = vpop.f32.mrb[201].mxu1 }
 0x35e   : > { %v3001_v25 = vpop.f32.mrb[202].mxu1 }
 0x35f   : > { %v7489_v18 = vadd.f32 %v3198_v63, %v2999_v34  ;;  %v3002_v9 = vadd.f32 %v3001_v25, %v7206_v15  ;;  %v3003_v19 = vpop.f32.mrb[203].mxu1  ;;  %v3206_v41 = vpop.f32.mrb[208].mxu0 }
 0x360   : > { %v5215_v44 = vpop.f32.mrb[209].mxu0 }
 0x361   : > { %v7492_v16 = vadd.f32 %v3201_v55, %v3002_v9  ;;  %v3209_v50 = vpop.f32.mrb[210].mxu0  ;;  %v7500_v55 = vld [vmem:[%s8117_s6] ss:$0 sm:$0xff] }
 0x362   : > { %v5216_v26 = vpop.f32.mrb[211].mxu0 }
 0x364   : > { %v3006_v12 = vpop.f32.mrb[204].mxu1 }
 0x365   : > { %v3007_v52 = vadd.f32 %v3006_v12, %v7217_v58  ;;  %v3008_v23 = vpop.f32.mrb[205].mxu1 }
 0x366   : > { %v3009_v32 = vpop.f32.mrb[206].mxu1 }
 0x367   : > { %v7495_v40 = vadd.f32 %v3206_v41, %v3007_v52  ;;  %v3010_v24 = vpop.f32.mrb[207].mxu1  ;;  %v3981_v51 = vpop.f32.mrb[212].mxu0 }
 0x368   : > { %v5235_v42 = vpop.f32.mrb[213].mxu0 }
 0x369   : > { %v3984_v4 = vpop.f32.mrb[214].mxu0 }
 0x36a   : > { %v5236_v38 = vpop.f32.mrb[215].mxu0 }
 0x36c   : > { %v3781_v15 = vpop.f32.mrb[208].mxu1 }
 0x36d   : > { %v3982_v31 = vadd.f32 %v3981_v51, %v3781_v15  ;;  %v3783_v63 = vpop.f32.mrb[209].mxu1 }
 0x36e   : > { %v3784_v43 = vpop.f32.mrb[210].mxu1 }
 0x36f   : > { %v4147_v58 = vadd.f32 %v3982_v31, %v7233_v35  ;;  %v3985_v3 = vadd.f32 %v3984_v4, %v3784_v43  ;;  %v3786_v30 = vpop.f32.mrb[211].mxu1  ;;  %v3989_v34 = vpop.f32.mrb[216].mxu0 }
 0x370   : > { %v5239_v25 = vpop.f32.mrb[217].mxu0 }
 0x371   : > { %v4148_v20 = vadd.f32 %v3985_v3, %v7239_v11  ;;  %v7505_v9 = vadd.f32 %v7500_v55, %v4147_v58  ;;  %v3992_v19 = vpop.f32.mrb[218].mxu0 }
 0x372   : > { %v5240_v41 = vpop.f32.mrb[219].mxu0 }
 0x373   : > { %v4236_v44 = vmax.f32 %v7505_v9, 0.0  ;;  %v7509_v50 = vadd.f32 %v7500_v55, %v4148_v20  ;;  %v4442_v9 = vld [vmem:[%s8114_s3 + $0x8] sm:$0xff] }
 0x374   : > { %v3789_v26 = vpop.f32.mrb[212].mxu1 }
 0x375   : > { %v3990_v12 = vadd.f32 %v3989_v34, %v3789_v26  ;;  %v3791_v52 = vpop.f32.mrb[213].mxu1  ;;  %4277 = vrot.lane.b32.xlu0 %v4236_v44, %s5586_s16  ;;  %v4237_v24 = vmax.f32 %v7509_v50, 0.0 }
 0x376   : > { %v3792_v35 = vpop.f32.mrb[214].mxu1 }
 0x377   : > { %v4149_v11 = vadd.f32 %v3990_v12, %v7250_v6  ;;  %v3993_v23 = vadd.f32 %v3992_v19, %v3792_v35  ;;  %v3794_v32 = vpop.f32.mrb[215].mxu1  ;;  %v3997_v51 = vpop.f32.mrb[220].mxu0 }
 0x378   : > { %v5243_v4 = vpop.f32.mrb[221].mxu0 }
 0x379   : > { %v4150_v42 = vadd.f32 %v3993_v23, %v7256_v59  ;;  %4279 = vrot.lane.b32.xlu0 %v4237_v24, %s5586_s16  ;;  %v7521_v38 = vadd.f32 %v7500_v55, %v4149_v11  ;;  %v4000_v15 = vpop.f32.mrb[222].mxu0 }
 0x37a   : > { %v5244_v31 = vpop.f32.mrb[223].mxu0 }
 0x37b   : > { %v4238_v63 = vmax.f32 %v7521_v38, 0.0  ;;  %v7525_v6 = vadd.f32 %v7500_v55, %v4150_v42 }
 0x37c   : > { %v3797_v43 = vpop.f32.mrb[216].mxu1 }
 0x37d   : > { %v3998_v58 = vadd.f32 %v3997_v51, %v3797_v43  ;;  %v3799_v3 = vpop.f32.mrb[217].mxu1  ;;  %4281 = vrot.lane.b32.xlu1 %v4238_v63, %s5586_s16  ;;  %v4239_v25 = vmax.f32 %v7525_v6, 0.0 }
 0x37e   : > { %v3800_v59 = vpop.f32.mrb[218].mxu1 }
 0x37f   : > { %v4151_v30 = vadd.f32 %v3998_v58, %v7267_v33  ;;  %v4001_v34 = vadd.f32 %v4000_v15, %v3800_v59  ;;  %v3802_v20 = vpop.f32.mrb[219].mxu1  ;;  %v4005_v19 = vpop.f32.mrb[224].mxu0 }
 0x380   : > { %v5247_v26 = vpop.f32.mrb[225].mxu0 }
 0x381   : > { %v4152_v41 = vadd.f32 %v4001_v34, %v7273_v46  ;;  %4283 = vrot.lane.b32.xlu1 %v4239_v25, %s5586_s16  ;;  %v7537_v12 = vadd.f32 %v7500_v55, %v4151_v30  ;;  %v4008_v52 = vpop.f32.mrb[226].mxu0 }
 0x382   : > { %v5248_v35 = vpop.f32.mrb[227].mxu0 }
 0x383   : > { %v4240_v11 = vmax.f32 %v7537_v12, 0.0  ;;  %v7541_v33 = vadd.f32 %v7500_v55, %v4152_v41 }
 0x384   : > { %v3805_v23 = vpop.f32.mrb[220].mxu1 }
 0x385   : > { %v4006_v32 = vadd.f32 %v4005_v19, %v3805_v23  ;;  %v3807_v51 = vpop.f32.mrb[221].mxu1  ;;  %4285 = vrot.lane.b32.xlu0 %v4240_v11, %s5586_s16  ;;  %v4241_v46 = vmax.f32 %v7541_v33, 0.0 }
 0x386   : > { %v3808_v42 = vpop.f32.mrb[222].mxu1 }
 0x387   : > { %v4153_v4 = vadd.f32 %v4006_v32, %v7284_v22  ;;  %v4009_v15 = vadd.f32 %v4008_v52, %v3808_v42  ;;  %v3810_v31 = vpop.f32.mrb[223].mxu1  ;;  %4287 = vrot.lane.b32.xlu1 %v4241_v46, %s5586_s16  ;;  %v4013_v43 = vpop.f32.mrb[228].mxu0 }
 0x388   : > { %v5251_v3 = vpop.f32.mrb[229].mxu0 }
 0x389   : > { %v4154_v58 = vadd.f32 %v4009_v15, %v7290_v53  ;;  %v7553_v59 = vadd.f32 %v7500_v55, %v4153_v4  ;;  %v4016_v30 = vpop.f32.mrb[230].mxu0 }
 0x38a   : > { %v5252_v34 = vpop.f32.mrb[231].mxu0 }
 0x38b   : > { %v8365_v20 = vmax.f32 %v7553_v59, 0.0  ;;  %v7557_v19 = vadd.f32 %v7500_v55, %v4154_v58 }
 0x38c   : > { %v3813_v22 = vpop.f32.mrb[224].mxu1 }
 0x38d   : > { %v4014_v41 = vadd.f32 %v4013_v43, %v3813_v22  ;;  %v3815_v26 = vpop.f32.mrb[225].mxu1  ;;  %4289 = vrot.lane.b32.xlu0 %v8365_v20, %s5586_s16  ;;  %v8344_v53 = vmax.f32 %v7557_v19, 0.0 }
 0x38e   : > { %v3816_v52 = vpop.f32.mrb[226].mxu1 }
 0x38f   : > { %v4155_v35 = vadd.f32 %v4014_v41, %v7301_v62  ;;  %v4017_v23 = vadd.f32 %v4016_v30, %v3816_v52  ;;  %v3818_v32 = vpop.f32.mrb[227].mxu1  ;;  %4291 = vrot.lane.b32.xlu1 %v8344_v53, %s5586_s16  ;;  %v4021_v51 = vpop.f32.mrb[232].mxu0 }
 0x390   : > { %v5255_v4 = vpop.f32.mrb[233].mxu0 }
 0x391   : > { %v4156_v42 = vadd.f32 %v4017_v23, %v7307_v17  ;;  %v7569_v15 = vadd.f32 %v7500_v55, %v4155_v35  ;;  %v4024_v31 = vpop.f32.mrb[234].mxu0 }
 0x392   : > { %v5256_v43 = vpop.f32.mrb[235].mxu0 }
 0x393   : > { %v8343_v58 = vmax.f32 %v7569_v15, 0.0  ;;  %v7573_v3 = vadd.f32 %v7500_v55, %v4156_v42 }
 0x394   : > { %v3821_v62 = vpop.f32.mrb[228].mxu1 }
 0x395   : > { %v4022_v30 = vadd.f32 %v4021_v51, %v3821_v62  ;;  %v3823_v34 = vpop.f32.mrb[229].mxu1  ;;  %4293 = vrot.lane.b32.xlu0 %v8343_v58, %s5586_s16  ;;  %v8340_v17 = vmax.f32 %v7573_v3, 0.0 }
 0x396   : > { %v3824_v22 = vpop.f32.mrb[230].mxu1 }
 0x397   : > { %v4157_v41 = vadd.f32 %v4022_v30, %v7318_v49  ;;  %v4025_v26 = vadd.f32 %v4024_v31, %v3824_v22  ;;  %v3826_v52 = vpop.f32.mrb[231].mxu1  ;;  %4295 = vrot.lane.b32.xlu1 %v8340_v17, %s5586_s16  ;;  %v4029_v35 = vpop.f32.mrb[236].mxu0 }
 0x398   : > { %v5259_v32 = vpop.f32.mrb[237].mxu0 }
 0x399   : > { %v4158_v23 = vadd.f32 %v4025_v26, %v7324_v37  ;;  %v7585_v51 = vadd.f32 %v7500_v55, %v4157_v41  ;;  %v4032_v42 = vpop.f32.mrb[238].mxu0 }
 0x39a   : > { %v5260_v4 = vpop.f32.mrb[239].mxu0 }
 0x39b   : > { %v8335_v43 = vmax.f32 %v7585_v51, 0.0  ;;  %v7589_v62 = vadd.f32 %v7500_v55, %v4158_v23 }
 0x39c   : > { %v3829_v49 = vpop.f32.mrb[232].mxu1 }
 0x39d   : > { %v4030_v31 = vadd.f32 %v4029_v35, %v3829_v49  ;;  %v3831_v30 = vpop.f32.mrb[233].mxu1  ;;  %4297 = vrot.lane.b32.xlu0 %v8335_v43, %s5586_s16  ;;  %v8337_v37 = vmax.f32 %v7589_v62, 0.0 }
 0x39e   : > { %v3832_v34 = vpop.f32.mrb[234].mxu1 }
 0x39f   : > { %v4159_v22 = vadd.f32 %v4030_v31, %v7335_v8  ;;  %v4033_v41 = vadd.f32 %v4032_v42, %v3832_v34  ;;  %v3834_v26 = vpop.f32.mrb[235].mxu1  ;;  %4299 = vrot.lane.b32.xlu1 %v8337_v37, %s5586_s16  ;;  %v4037_v52 = vpop.f32.mrb[240].mxu0 }
 0x3a0   : > { %v5263_v35 = vpop.f32.mrb[241].mxu0 }
 0x3a1   : > { %v4160_v23 = vadd.f32 %v4033_v41, %v7341_v57  ;;  %v7601_v32 = vadd.f32 %v7500_v55, %v4159_v22  ;;  %v4040_v4 = vpop.f32.mrb[242].mxu0 }
 0x3a2   : > { %v5264_v49 = vpop.f32.mrb[243].mxu0 }
 0x3a3   : > { %v8336_v30 = vmax.f32 %v7601_v32, 0.0  ;;  %v7605_v43 = vadd.f32 %v7500_v55, %v4160_v23 }
 0x3a4   : > { %v3837_v8 = vpop.f32.mrb[236].mxu1 }
 0x3a5   : > { %v4038_v42 = vadd.f32 %v4037_v52, %v3837_v8  ;;  %v3839_v31 = vpop.f32.mrb[237].mxu1  ;;  %4301 = vrot.lane.b32.xlu0 %v8336_v30, %s5586_s16  ;;  %v8339_v57 = vmax.f32 %v7605_v43, 0.0 }
 0x3a6   : > { %v3840_v34 = vpop.f32.mrb[238].mxu1 }
 0x3a7   : > { %v4161_v22 = vadd.f32 %v4038_v42, %v7352_v10  ;;  %v4041_v41 = vadd.f32 %v4040_v4, %v3840_v34  ;;  %v3842_v26 = vpop.f32.mrb[239].mxu1  ;;  %4303 = vrot.lane.b32.xlu1 %v8339_v57, %s5586_s16  ;;  %v4045_v23 = vpop.f32.mrb[244].mxu0 }
 0x3a8   : > { %v5267_v52 = vpop.f32.mrb[245].mxu0 }
 0x3a9   : > { %v4162_v35 = vadd.f32 %v4041_v41, %v7358_v27  ;;  %v7617_v49 = vadd.f32 %v7500_v55, %v4161_v22  ;;  %v4048_v8 = vpop.f32.mrb[246].mxu0  ;;  %v8732_v52 = vld [vmem:[#allocation97_spill] sm:$0xff] }
 0x3aa   : > { %v5268_v31 = vpop.f32.mrb[247].mxu0 }
 0x3ab   : > { %v8338_v30 = vmax.f32 %v7617_v49, 0.0  ;;  %v7621_v37 = vadd.f32 %v7500_v55, %v4162_v35 }
 0x3ac   : > { %v3845_v10 = vpop.f32.mrb[240].mxu1 }
 0x3ad   : > { %v4046_v4 = vadd.f32 %v4045_v23, %v3845_v10  ;;  %v3847_v42 = vpop.f32.mrb[241].mxu1  ;;  %4305 = vrot.lane.b32.xlu0 %v8338_v30, %s5586_s16  ;;  %v8341_v27 = vmax.f32 %v7621_v37, 0.0 }
 0x3ae   : > { %v3848_v34 = vpop.f32.mrb[242].mxu1 }
 0x3af   : > { %v4163_v22 = vadd.f32 %v4046_v4, %v7369_v1  ;;  %v4049_v41 = vadd.f32 %v4048_v8, %v3848_v34  ;;  %v3850_v26 = vpop.f32.mrb[243].mxu1  ;;  %4307 = vrot.lane.b32.xlu1 %v8341_v27, %s5586_s16  ;;  %v4053_v35 = vpop.f32.mrb[248].mxu0 }
 0x3b0   : > { %v5271_v23 = vpop.f32.mrb[249].mxu0  ;;  %v8733_v26 = vld [vmem:[#allocation22_spill] sm:$0xff] }
 0x3b1   : > { %v4164_v31 = vadd.f32 %v4049_v41, %v8732_v52  ;;  %v7633_v10 = vadd.f32 %v7500_v55, %v4163_v22  ;;  %v4056_v42 = vpop.f32.mrb[250].mxu0 }
 0x3b2   : > { %v5272_v30 = vpop.f32.mrb[251].mxu0 }
 0x3b3   : > { %v8342_v57 = vmax.f32 %v7633_v10, 0.0  ;;  %v7637_v17 = vadd.f32 %v7500_v55, %v4164_v31  ;;  %v8734_v31 = vld [vmem:[#allocation19_spill] sm:$0xff] }
 0x3b4   : > { %v3853_v1 = vpop.f32.mrb[244].mxu1 }
 0x3b5   : > { %v4054_v8 = vadd.f32 %v4053_v35, %v3853_v1  ;;  %v3855_v4 = vpop.f32.mrb[245].mxu1  ;;  %4309 = vrot.lane.b32.xlu0 %v8342_v57, %s5586_s16  ;;  %v8346_v34 = vmax.f32 %v7637_v17, 0.0 }
 0x3b6   : > { %v3856_v41 = vpop.f32.mrb[246].mxu1 }
 0x3b7   : > { %v4165_v22 = vadd.f32 %v4054_v8, %v8733_v26  ;;  %v4057_v52 = vadd.f32 %v4056_v42, %v3856_v41  ;;  %v3858_v23 = vpop.f32.mrb[247].mxu1  ;;  %4311 = vrot.lane.b32.xlu1 %v8346_v34, %s5586_s16  ;;  %v4061_v30 = vpop.f32.mrb[252].mxu0 }
 0x3b8   : > { %v5275_v35 = vpop.f32.mrb[253].mxu0 }
 0x3b9   : > { %v4166_v27 = vadd.f32 %v4057_v52, %v8734_v31  ;;  %v7649_v1 = vadd.f32 %v7500_v55, %v4165_v22  ;;  %v4064_v4 = vpop.f32.mrb[254].mxu0 }
 0x3ba   : > { %v5276_v57 = vpop.f32.mrb[255].mxu0 }
 0x3bb   : > { %v8345_v58 = vmax.f32 %v7649_v1, 0.0  ;;  %v7653_v53 = vadd.f32 %v7500_v55, %v4166_v27 }
 0x3bc   : > { %v3861_v42 = vpop.f32.mrb[248].mxu1 }
 0x3bd   : > { %v4062_v8 = vadd.f32 %v4061_v30, %v3861_v42  ;;  %v3863_v41 = vpop.f32.mrb[249].mxu1  ;;  %4313 = vrot.lane.b32.xlu0 %v8345_v58, %s5586_s16  ;;  %v8348_v26 = vmax.f32 %v7653_v53, 0.0 }
 0x3be   : > { %v3864_v52 = vpop.f32.mrb[250].mxu1 }
 0x3bf   : > { %v4167_v22 = vadd.f32 %v4062_v8, %v7406_v47  ;;  %v4065_v23 = vadd.f32 %v4064_v4, %v3864_v52  ;;  %v3866_v31 = vpop.f32.mrb[251].mxu1  ;;  %4315 = vrot.lane.b32.xlu1 %v8348_v26, %s5586_s16  ;;  %v4069_v57 = vpop.f32.mrb[0].mxu0 }
 0x3c0   : > { %v5279_v30 = vpop.f32.mrb[1].mxu0 }
 0x3c1   : > { %v4168_v27 = vadd.f32 %v4065_v23, %v7412_v61  ;;  %v7665_v35 = vadd.f32 %v7500_v55, %v4167_v22  ;;  %v4072_v42 = vpop.f32.mrb[2].mxu0 }
 0x3c2   : > { %v5280_v41 = vpop.f32.mrb[3].mxu0 }
 0x3c3   : > { %v8347_v58 = vmax.f32 %v7665_v35, 0.0  ;;  %v7669_v34 = vadd.f32 %v7500_v55, %v4168_v27 }
 0x3c4   : > { %v3869_v47 = vpop.f32.mrb[252].mxu1 }
 0x3c5   : > { %v4070_v4 = vadd.f32 %v4069_v57, %v3869_v47  ;;  %v3871_v8 = vpop.f32.mrb[253].mxu1  ;;  %4317 = vrot.lane.b32.xlu0 %v8347_v58, %s5586_s16  ;;  %v8350_v61 = vmax.f32 %v7669_v34, 0.0 }
 0x3c6   : > { %v3872_v52 = vpop.f32.mrb[254].mxu1 }
 0x3c7   : > { %v4169_v22 = vadd.f32 %v4070_v4, %v7420_v56  ;;  %v4073_v23 = vadd.f32 %v4072_v42, %v3872_v52  ;;  %v3874_v31 = vpop.f32.mrb[255].mxu1  ;;  %4319 = vrot.lane.b32.xlu1 %v8350_v61, %s5586_s16  ;;  %v4077_v27 = vpop.f32.mrb[4].mxu0 }
 0x3c8   : > { %v5283_v57 = vpop.f32.mrb[5].mxu0 }
 0x3c9   : > { %v4170_v30 = vadd.f32 %v4073_v23, %v7426_v14  ;;  %v7681_v41 = vadd.f32 %v7500_v55, %v4169_v22  ;;  %v4080_v47 = vpop.f32.mrb[6].mxu0 }
 0x3ca   : > { %v5284_v8 = vpop.f32.mrb[7].mxu0 }
 0x3cb   : > { %v8349_v58 = vmax.f32 %v7681_v41, 0.0  ;;  %v7685_v26 = vadd.f32 %v7500_v55, %v4170_v30 }
 0x3cc   : > { %v3877_v56 = vpop.f32.mrb[0].mxu1 }
 0x3cd   : > { %v4078_v42 = vadd.f32 %v4077_v27, %v3877_v56  ;;  %v3879_v4 = vpop.f32.mrb[1].mxu1  ;;  %4321 = vrot.lane.b32.xlu0 %v8349_v58, %s5586_s16  ;;  %v8352_v14 = vmax.f32 %v7685_v26, 0.0 }
 0x3ce   : > { %v3880_v52 = vpop.f32.mrb[2].mxu1 }
 0x3cf   : > { %v4171_v22 = vadd.f32 %v4078_v42, %v7433_v5  ;;  %v4081_v23 = vadd.f32 %v4080_v47, %v3880_v52  ;;  %v3882_v31 = vpop.f32.mrb[3].mxu1  ;;  %4323 = vrot.lane.b32.xlu1 %v8352_v14, %s5586_s16  ;;  %v4085_v30 = vpop.f32.mrb[8].mxu0 }
 0x3d0   : > { %v5287_v27 = vpop.f32.mrb[9].mxu0 }
 0x3d1   : > { %v4172_v57 = vadd.f32 %v4081_v23, %v7440_v28  ;;  %v7697_v8 = vadd.f32 %v7500_v55, %v4171_v22  ;;  %v4088_v56 = vpop.f32.mrb[10].mxu0 }
 0x3d2   : > { %v5288_v4 = vpop.f32.mrb[11].mxu0 }
 0x3d3   : > { %v8351_v58 = vmax.f32 %v7697_v8, 0.0  ;;  %v7701_v61 = vadd.f32 %v7500_v55, %v4172_v57 }
 0x3d4   : > { %v3885_v5 = vpop.f32.mrb[4].mxu1 }
 0x3d5   : > { %v4086_v47 = vadd.f32 %v4085_v30, %v3885_v5  ;;  %v3887_v42 = vpop.f32.mrb[5].mxu1  ;;  %4325 = vrot.lane.b32.xlu0 %v8351_v58, %s5586_s16  ;;  %v8354_v28 = vmax.f32 %v7701_v61, 0.0 }
 0x3d6   : > { %v3888_v52 = vpop.f32.mrb[6].mxu1 }
 0x3d7   : > { %v4173_v22 = vadd.f32 %v4086_v47, %v7448_v29  ;;  %v4089_v23 = vadd.f32 %v4088_v56, %v3888_v52  ;;  %v3890_v31 = vpop.f32.mrb[7].mxu1  ;;  %4327 = vrot.lane.b32.xlu1 %v8354_v28, %s5586_s16  ;;  %v4093_v57 = vpop.f32.mrb[12].mxu0 }
 0x3d8   : > { %v5291_v30 = vpop.f32.mrb[13].mxu0 }
 0x3d9   : > { %v4174_v27 = vadd.f32 %v4089_v23, %v7454_v2  ;;  %v7713_v4 = vadd.f32 %v7500_v55, %v4173_v22  ;;  %v4096_v5 = vpop.f32.mrb[14].mxu0 }
 0x3da   : > { %v5292_v42 = vpop.f32.mrb[15].mxu0 }
 0x3db   : > { %v8353_v58 = vmax.f32 %v7713_v4, 0.0  ;;  %v7717_v14 = vadd.f32 %v7500_v55, %v4174_v27 }
 0x3dc   : > { %v3893_v29 = vpop.f32.mrb[8].mxu1 }
 0x3dd   : > { %v4094_v56 = vadd.f32 %v4093_v57, %v3893_v29  ;;  %v3895_v47 = vpop.f32.mrb[9].mxu1  ;;  %4329 = vrot.lane.b32.xlu0 %v8353_v58, %s5586_s16  ;;  %v8356_v2 = vmax.f32 %v7717_v14, 0.0 }
 0x3de   : > { %v3896_v52 = vpop.f32.mrb[10].mxu1 }
 0x3df   : > { %v4175_v22 = vadd.f32 %v4094_v56, %v7459_v48  ;;  %v4097_v23 = vadd.f32 %v4096_v5, %v3896_v52  ;;  %v3898_v31 = vpop.f32.mrb[11].mxu1  ;;  %4331 = vrot.lane.b32.xlu1 %v8356_v2, %s5586_s16  ;;  %v4101_v27 = vpop.f32.mrb[16].mxu0 }
 0x3e0   : > { %v5295_v57 = vpop.f32.mrb[17].mxu0 }
 0x3e1   : > { %v4176_v30 = vadd.f32 %v4097_v23, %v7462_v39  ;;  %v7729_v42 = vadd.f32 %v7500_v55, %v4175_v22  ;;  %v4104_v29 = vpop.f32.mrb[18].mxu0 }
 0x3e2   : > { %v5296_v47 = vpop.f32.mrb[19].mxu0 }
 0x3e3   : > { %v8355_v58 = vmax.f32 %v7729_v42, 0.0  ;;  %v7733_v28 = vadd.f32 %v7500_v55, %v4176_v30 }
 0x3e4   : > { %v3901_v48 = vpop.f32.mrb[12].mxu1 }
 0x3e5   : > { %v4102_v5 = vadd.f32 %v4101_v27, %v3901_v48  ;;  %v3903_v56 = vpop.f32.mrb[13].mxu1  ;;  %4333 = vrot.lane.b32.xlu0 %v8355_v58, %s5586_s16  ;;  %v8358_v39 = vmax.f32 %v7733_v28, 0.0 }
 0x3e6   : > { %v3904_v52 = vpop.f32.mrb[14].mxu1 }
 0x3e7   : > { %v4177_v22 = vadd.f32 %v4102_v5, %v7465_v7  ;;  %v4105_v23 = vadd.f32 %v4104_v29, %v3904_v52  ;;  %v3906_v31 = vpop.f32.mrb[15].mxu1  ;;  %4335 = vrot.lane.b32.xlu1 %v8358_v39, %s5586_s16  ;;  %v4109_v30 = vpop.f32.mrb[20].mxu0 }
 0x3e8   : > { %v5299_v27 = vpop.f32.mrb[21].mxu0 }
 0x3e9   : > { %v4178_v57 = vadd.f32 %v4105_v23, %v7468_v36  ;;  %v7745_v47 = vadd.f32 %v7500_v55, %v4177_v22  ;;  %v4112_v48 = vpop.f32.mrb[22].mxu0 }
 0x3ea   : > { %v5300_v56 = vpop.f32.mrb[23].mxu0 }
 0x3eb   : > { %v8357_v58 = vmax.f32 %v7745_v47, 0.0  ;;  %v7749_v2 = vadd.f32 %v7500_v55, %v4178_v57 }
 0x3ec   : > { %v3909_v7 = vpop.f32.mrb[16].mxu1 }
 0x3ed   : > { %v4110_v29 = vadd.f32 %v4109_v30, %v3909_v7  ;;  %v3911_v5 = vpop.f32.mrb[17].mxu1  ;;  %4337 = vrot.lane.b32.xlu0 %v8357_v58, %s5586_s16  ;;  %v8360_v36 = vmax.f32 %v7749_v2, 0.0 }
 0x3ee   : > { %v3912_v52 = vpop.f32.mrb[18].mxu1 }
 0x3ef   : > { %v4179_v22 = vadd.f32 %v4110_v29, %v7471_v0  ;;  %v4113_v23 = vadd.f32 %v4112_v48, %v3912_v52  ;;  %v3914_v31 = vpop.f32.mrb[19].mxu1  ;;  %4339 = vrot.lane.b32.xlu1 %v8360_v36, %s5586_s16  ;;  %v4117_v57 = vpop.f32.mrb[24].mxu0 }
 0x3f0   : > { %v5303_v30 = vpop.f32.mrb[25].mxu0 }
 0x3f1   : > { %v4180_v27 = vadd.f32 %v4113_v23, %v7474_v60  ;;  %v7761_v56 = vadd.f32 %v7500_v55, %v4179_v22  ;;  %v4120_v7 = vpop.f32.mrb[26].mxu0 }
 0x3f2   : > { %v5304_v5 = vpop.f32.mrb[27].mxu0 }
 0x3f3   : > { %v8359_v58 = vmax.f32 %v7761_v56, 0.0  ;;  %v7765_v39 = vadd.f32 %v7500_v55, %v4180_v27 }
 0x3f4   : > { %v3917_v0 = vpop.f32.mrb[20].mxu1 }
 0x3f5   : > { %v4118_v48 = vadd.f32 %v4117_v57, %v3917_v0  ;;  %v3919_v29 = vpop.f32.mrb[21].mxu1  ;;  %4341 = vrot.lane.b32.xlu0 %v8359_v58, %s5586_s16  ;;  %v8362_v60 = vmax.f32 %v7765_v39, 0.0 }
 0x3f6   : > { %v3920_v52 = vpop.f32.mrb[22].mxu1 }
 0x3f7   : > { %v4181_v22 = vadd.f32 %v4118_v48, %v7477_v45  ;;  %v4121_v23 = vadd.f32 %v4120_v7, %v3920_v52  ;;  %v3922_v31 = vpop.f32.mrb[23].mxu1  ;;  %4343 = vrot.lane.b32.xlu1 %v8362_v60, %s5586_s16  ;;  %v4125_v27 = vpop.f32.mrb[28].mxu0 }
 0x3f8   : > { %v5307_v57 = vpop.f32.mrb[29].mxu0 }
 0x3f9   : > { %v4182_v30 = vadd.f32 %v4121_v23, %v7480_v54  ;;  %v7777_v5 = vadd.f32 %v7500_v55, %v4181_v22  ;;  %v4128_v0 = vpop.f32.mrb[30].mxu0 }
 0x3fa   : > { %v5308_v29 = vpop.f32.mrb[31].mxu0 }
 0x3fb   : > { %v8361_v58 = vmax.f32 %v7777_v5, 0.0  ;;  %v7781_v36 = vadd.f32 %v7500_v55, %v4182_v30 }
 0x3fc   : > { %v3925_v45 = vpop.f32.mrb[24].mxu1 }
 0x3fd   : > { %v4126_v7 = vadd.f32 %v4125_v27, %v3925_v45  ;;  %v3927_v48 = vpop.f32.mrb[25].mxu1  ;;  %4345 = vrot.lane.b32.xlu0 %v8361_v58, %s5586_s16  ;;  %v8364_v54 = vmax.f32 %v7781_v36, 0.0 }
 0x3fe   : > { %v3928_v52 = vpop.f32.mrb[26].mxu1 }
 0x3ff   : > { %v4183_v22 = vadd.f32 %v4126_v7, %v7483_v13  ;;  %v4129_v23 = vadd.f32 %v4128_v0, %v3928_v52  ;;  %v3930_v31 = vpop.f32.mrb[27].mxu1  ;;  %4347 = vrot.lane.b32.xlu1 %v8364_v54, %s5586_s16  ;;  %v4133_v30 = vpop.f32.mrb[32].mxu0 }
 0x400   : > { %v5311_v27 = vpop.f32.mrb[33].mxu0  ;;  %v4278_v52 = vpop.permute.xlu0 %4277 }
 0x401   : > { %v4184_v57 = vadd.f32 %v4129_v23, %v7486_v21  ;;  %v7793_v29 = vadd.f32 %v7500_v55, %v4183_v22  ;;  %v4136_v45 = vpop.f32.mrb[34].mxu0 }
 0x402   : > { %v5312_v48 = vpop.f32.mrb[35].mxu0 }
 0x403   : > { %v8363_v58 = vmax.f32 %v7793_v29, 0.0  ;;  %v7797_v60 = vadd.f32 %v7500_v55, %v4184_v57 }
 0x404   : > { %v3933_v13 = vpop.f32.mrb[28].mxu1 }
 0x405   : > { %v4134_v0 = vadd.f32 %v4133_v30, %v3933_v13  ;;  %v3935_v7 = vpop.f32.mrb[29].mxu1  ;;  %4349 = vrot.lane.b32.xlu0 %v8363_v58, %s5586_s16  ;;  %v8366_v21 = vmax.f32 %v7797_v60, 0.0 }
 0x406   : > { %v3936_v23 = vpop.f32.mrb[30].mxu1  ;;  %v4282_v7 = vpop.permute.xlu1 %4281 }
 0x407   : > { %v4185_v22 = vadd.f32 %v4134_v0, %v7489_v18  ;;  %v4137_v31 = vadd.f32 %v4136_v45, %v3936_v23  ;;  %v3938_v27 = vpop.f32.mrb[31].mxu1  ;;  %4351 = vrot.lane.b32.xlu1 %v8366_v21, %s5586_s16  ;;  %v4141_v57 = vpop.f32.mrb[36].mxu0  ;;  %v331_v23 = vlaneseq  ;;  %v4361_v50 = vsub.f32 %v4238_v63, %v4282_v7 }
 0x408   : > { %v5315_v48 = vpop.f32.mrb[37].mxu0  ;;  %v4280_v45 = vpop.permute.xlu0 %4279 }
 0x409   : > { %v4186_v30 = vadd.f32 %v4137_v31, %v7492_v16  ;;  %v7809_v13 = vadd.f32 %v7500_v55, %v4185_v22  ;;  %v4144_v58 = vpop.f32.mrb[38].mxu0  ;;  %v326_v31 = vld [vmem:[%s315_s21] sm:$0x3f]  ;;  %s5516_s21 = sshll.u32 %s5587_s20, 4  ;;  %s5517_s21 = int_to_ptr.vmem [resolvable:$false] %s5516_s21 }
 0x40a   : > { %v5316_v54 = vpop.f32.mrb[39].mxu0  ;;  %v4360_v58 = vsub.f32 %v4237_v24, %v4280_v45  ;;  %v4284_v48 = vpop.permute.xlu1 %4283  ;;  %s5518_s22 = scalar_lea.vmem %s5517_s21, 32  ;;  %p5519_p2 = scmp.lt.s32.totalorder %s8071_s17, %s5517_s21 }
 0x40b   : > { %v4274_v20 = vmax.f32 %v7809_v13, 0.0  ;;  %v7813_v18 = vadd.f32 %v7500_v55, %v4186_v30  ;;  %v4359_v30 = vsub.f32 %v4236_v44, %v4278_v52  ;;  %v4402_v52 = vmul.f32 %v4361_v50, %v4361_v50 }
 0x40c   : > { %v3941_v0 = vpop.f32.mrb[32].mxu1  ;;  %v4401_v45 = vmul.f32 %v4360_v58, %v4360_v58 }
 0x40d   : > { %v4142_v27 = vadd.f32 %v4141_v57, %v3941_v0  ;;  %v3943_v21 = vpop.f32.mrb[33].mxu1  ;;  %4353 = vrot.lane.b32.xlu0 %v4274_v20, %s5586_s16  ;;  %v8367_v16 = vmax.f32 %v7813_v18, 0.0  ;;  %v327_v57 = vld [vmem:[%s319_s29] sm:$0x3f] }
 0x40e   : > { %v3944_v22 = vpop.f32.mrb[34].mxu1  ;;  %v328_v0 = vsub.f32 %v326_v31, %v327_v57  ;;  %v4288_v7 = vpop.permute.xlu1 %4287  ;;  %v4444_v31 = vld [vmem:[%s8114_s3 + $0x18] sm:$0xff] }
 0x40f   : > { %v4187_v54 = vadd.f32 %v4142_v27, %v7495_v40  ;;  %v3945_v21 = vpop.f32.mrb[35].mxu1  ;;  %4355 = vrot.lane.b32.xlu1 %v8367_v16, %s5586_s16  ;;  %v7834_v22 = vshrl.u32 %v331_v23, 7  ;;  %v4286_v40 = vpop.permute.xlu0 %4285  ;;  %v4362_v27 = vsub.f32 %v4239_v25, %v4284_v48  ;;  %v4400_v16 = vmul.f32 %v4359_v30, %v4359_v30  ;;  %v4443_v25 = vld [vmem:[%s8114_s3 + $0x10] sm:$0xff] }
 0x410   : > { %v7847_v44 = vand.u32 2147483647, %v328_v0  ;;  %v4363_v6 = vsub.f32 %v4240_v11, %v4286_v40  ;;  %v4483_v23 = vmul.f32 %v4442_v9, %v4401_v45  ;;  %v4484_v48 = vmul.f32 %v4443_v25, %v4402_v52 }
 0x411   : > { %v7839_v24 = vadd.f32 %v7500_v55, %v4187_v54  ;;  %v333_v38 = vsub.s32 0, %v7834_v22  ;;  %v337_v63 = vsub.s32 1, %v7834_v22  ;;  %v4441_v55 = vld [vmem:[%s8114_s3] sm:$0xff]  ;;  %v4403_v58 = vmul.f32 %v4362_v27, %v4362_v27 }
 0x412   : > { %v4482_v54 = vmul.f32 %v4441_v55, %v4400_v16  ;;  %v341_v30 = vsub.s32 2, %v7834_v22  ;;  %v4404_v0 = vmul.f32 %v4363_v6, %v4363_v6  ;;  %v4364_v50 = vsub.f32 %v4241_v46, %v4288_v7  ;;  %v4445_v16 = vld [vmem:[%s8114_s3 + $0x20] sm:$0xff]  ;;  %v4292_v25 = vpop.permute.xlu1 %4291  ;;  %v4446_v7 = vld [vmem:[%s8114_s3 + $0x28] sm:$0xff] }
 0x413   : > { %v4276_v21 = vmax.f32 %v7839_v24, 0.0  ;;  %v4290_v57 = vpop.permute.xlu0 %4289  ;;  %v334_v12 = vrot.slane %v7847_v44, %v333_v38  ;;  %v338_v11 = vrot.slane %v7847_v44, %v337_v63  ;;  %v4485_v45 = vmul.f32 %v4444_v31, %v4403_v58  ;;  %v4447_v31 = vld [vmem:[%s8114_s3 + $0x30] sm:$0xff] }
 0x414   : > { %v4523_v40 = vadd.f32 %v4483_v23, %v4482_v54  ;;  %v8735_v27 = vmax.f32 %v7553_v59, 0.0  ;;  %v342_v38 = vrot.slane %v7847_v44, %v341_v30  ;;  %v345_v63 = vsub.s32 3, %v7834_v22 }
 0x415   : > { %4357 = vrot.lane.b32.xlu0 %v4276_v21, %s5586_s16  ;;  %v362_v55 = vsel %vm361_vm8, %v334_v12, 0.0  ;;  %v363_v52 = vsel %vm361_vm8, %v338_v11, 0.0  ;;  %v4486_v46 = vmul.f32 %v4445_v16, %v4404_v0  ;;  %v4405_v6 = vmul.f32 %v4364_v50, %v4364_v50  ;;  %s5512_s16 = scalar_lea.vmem %s8071_s17, 16 }
 0x416   : > { %v4365_v9 = vsub.f32 %v8735_v27, %v4290_v57  ;;  %v4524_v33 = vadd.f32 %v4523_v40, %v4484_v48  ;;  %v364_v54 = vadd.f32 %v363_v52, %v362_v55  ;;  %v8736_v57 = vmax.f32 %v7557_v19, 0.0  ;;  %v4296_v27 = vpop.permute.xlu1 %4295  ;;  %p5513_p6 = scmp.ne.s32.totalorder %s8071_s17, %s5512_s16  ;;  %p5520_p3 = scmp.lt.s32.totalorder %s5518_s22, %s5512_s16 }
 0x417   : > { %v4294_v59 = vpop.permute.xlu0 %4293  ;;  %v346_v11 = vrot.slane %v7847_v44, %v345_v63  ;;  %v349_v30 = vsub.s32 4, %v7834_v22  ;;  %v365_v48 = vsel %vm361_vm8, %v342_v38, 0.0  ;;  %v4487_v50 = vmul.f32 %v4446_v7, %v4405_v6  ;;  %v4448_v38 = vld [vmem:[%s8114_s3 + $0x38] sm:$0xff] }
 0x418   : > { %v4525_v23 = vadd.f32 %v4524_v33, %v4485_v45  ;;  %v4406_v58 = vmul.f32 %v4365_v9, %v4365_v9  ;;  %v4366_v12 = vsub.f32 %v8736_v57, %v4292_v25  ;;  %v8737_v16 = vmax.f32 %v7569_v15, 0.0  ;;  %p5514_p10 = pnand %p5513_p6, %p8768_p9  ;;  %p5521_p4 = por %p5520_p3, %p5519_p2 }
 0x419   : > { %v366_v9 = vadd.f32 %v365_v48, %v364_v54  ;;  %v350_v52 = vrot.slane %v7847_v44, %v349_v30  ;;  %v353_v19 = vsub.s32 5, %v7834_v22  ;;  %v367_v33 = vsel %vm361_vm8, %v346_v11, 0.0 }
 0x41a   : > { %v4526_v0 = vadd.f32 %v4525_v23, %v4486_v46  ;;  %v4367_v40 = vsub.f32 %v8737_v16, %v4294_v59  ;;  %v4488_v45 = vmul.f32 %v4447_v31, %v4406_v58  ;;  %v4407_v55 = vmul.f32 %v4366_v12, %v4366_v12  ;;  %v4449_v23 = vld [vmem:[%s8114_s3 + $0x40] sm:$0xff]  ;;  %v4300_v12 = vpop.permute.xlu1 %4299  ;;  %p5515_p12 = pneg %p5514_p10 }
 0x41b   : > { %v4298_v46 = vpop.permute.xlu0 %4297  ;;  %v8738_v15 = vmax.f32 %v7573_v3, 0.0  ;;  %v368_v58 = vadd.f32 %v367_v33, %v366_v9  ;;  %v8739_v22 = vmax.f32 %v7585_v51, 0.0  ;;  %v354_v31 = vrot.slane %v7847_v44, %v353_v19  ;;  %v4450_v3 = vld [vmem:[%s8114_s3 + $0x48] sm:$0xff]  ;;  %v4451_v44 = vld [vmem:[%s8114_s3 + $0x50] sm:$0xff] }
 0x41c   : > { %v4527_v63 = vadd.f32 %v4526_v0, %v4487_v50  ;;  %v4408_v6 = vmul.f32 %v4367_v40, %v4367_v40  ;;  %v4489_v59 = vmul.f32 %v4448_v38, %v4407_v55  ;;  %v369_v57 = vsel %vm361_vm8, %v350_v52, 0.0  ;;  %p5522_p7 = pnand %p5521_p4, %p5515_p12 }
 0x41d   : > { %v4368_v25 = vsub.f32 %v8738_v15, %v4296_v27  ;;  %v4369_v54 = vsub.f32 %v8739_v22, %v4298_v46  ;;  %v370_v0 = vadd.f32 %v369_v57, %v368_v58  ;;  %v8740_v40 = vmax.f32 %v7589_v62, 0.0  ;;  %v4452_v62 = vld [vmem:[%s8114_s3 + $0x58] sm:$0xff] }
 0x41e   : > { %v4528_v7 = vadd.f32 %v4527_v63, %v4488_v45  ;;  %v4490_v11 = vmul.f32 %v4449_v23, %v4408_v6  ;;  %v371_v51 = vsel %vm361_vm8, %v354_v31, 0.0  ;;  %v8741_v55 = vmax.f32 %v7601_v32, 0.0  ;;  %v4304_v19 = vpop.permute.xlu1 %4303  ;;  %v4453_v23 = vld [vmem:[%s8114_s3 + $0x60] sm:$0xff] }
 0x41f   : > { %v4409_v30 = vmul.f32 %v4368_v25, %v4368_v25  ;;  %v4302_v48 = vpop.permute.xlu0 %4301  ;;  %v4410_v16 = vmul.f32 %v4369_v54, %v4369_v54  ;;  %v4370_v45 = vsub.f32 %v8740_v40, %v4300_v12  ;;  %v372_v33 = vadd.f32 %v371_v51, %v370_v0  ;;  %v4454_v12 = vld [vmem:[%s8114_s3 + $0x68] sm:$0xff]  ;;  %v4455_v0 = vld [vmem:[%s8114_s3 + $0x70] sm:$0xff] }
 0x420   : > { %v4529_v50 = vadd.f32 %v4528_v7, %v4489_v59  ;;  %v4371_v52 = vsub.f32 %v8741_v55, %v4302_v48  ;;  %v8742_v25 = vmax.f32 %v7605_v43, 0.0  ;;  %v8743_v59 = vmax.f32 %v7617_v49, 0.0 }
 0x421   : > { %v4491_v9 = vmul.f32 %v4450_v3, %v4409_v30  ;;  %v4492_v63 = vmul.f32 %v4451_v44, %v4410_v16  ;;  %v4411_v38 = vmul.f32 %v4370_v45, %v4370_v45  ;;  %v8744_v3 = vmax.f32 %v7621_v37, 0.0 }
 0x422   : > { %v4530_v27 = vadd.f32 %v4529_v50, %v4490_v11  ;;  %v4412_v15 = vmul.f32 %v4371_v52, %v4371_v52  ;;  %v4372_v7 = vsub.f32 %v8742_v25, %v4304_v19  ;;  %v4308_v54 = vpop.permute.xlu1 %4307  ;;  %v8745_v16 = vmax.f32 %v7633_v10, 0.0  ;;  %v4458_v25 = vld [vmem:[%s8114_s3 + $0x88] sm:$0xff] }
 0x423   : > { %v4306_v46 = vpop.permute.xlu0 %4305  ;;  %v4493_v58 = vmul.f32 %v4452_v62, %v4411_v38  ;;  %v4374_v48 = vsub.f32 %v8744_v3, %v4308_v54  ;;  %v8746_v52 = vmax.f32 %v7637_v17, 0.0  ;;  %v8747_v38 = vmax.f32 %v7649_v1, 0.0 }
 0x424   : > { %v4531_v6 = vadd.f32 %v4530_v27, %v4491_v9  ;;  %v4373_v22 = vsub.f32 %v8743_v59, %v4306_v46  ;;  %v4494_v31 = vmul.f32 %v4453_v23, %v4412_v15  ;;  %v4413_v57 = vmul.f32 %v4372_v7, %v4372_v7  ;;  %v4456_v27 = vld [vmem:[%s8114_s3 + $0x78] sm:$0xff]  ;;  %v4459_v59 = vld [vmem:[%s8114_s3 + $0x90] sm:$0xff] }
 0x425   : > { %v4415_v44 = vmul.f32 %v4374_v48, %v4374_v48  ;;  %v8749_v54 = vmax.f32 %v7665_v35, 0.0  ;;  %v8750_v48 = vmax.f32 %v7669_v34, 0.0 }
 0x426   : > { %v4532_v32 = vadd.f32 %v4531_v6, %v4492_v63  ;;  %v4414_v30 = vmul.f32 %v4373_v22, %v4373_v22  ;;  %v4495_v49 = vmul.f32 %v4454_v12, %v4413_v57 }
 0x427   : > { %v4310_v11 = vpop.permute.xlu0 %4309  ;;  %v4497_v10 = vmul.f32 %v4456_v27, %v4415_v44  ;;  %v4462_v27 = vld [vmem:[%s8114_s3 + $0xa8] sm:$0xff] }
 0x428   : > { %v4533_v43 = vadd.f32 %v4532_v32, %v4493_v58  ;;  %v4375_v40 = vsub.f32 %v8745_v16, %v4310_v11  ;;  %v4496_v51 = vmul.f32 %v4455_v0, %v4414_v30  ;;  %v8748_v32 = vmax.f32 %v7653_v53, 0.0 }
 0x429   : > { %v4312_v45 = vpop.permute.xlu1 %4311  ;;  %v8751_v16 = vmax.f32 %v7681_v41, 0.0 }
 0x42a   : > { %v4534_v50 = vadd.f32 %v4533_v43, %v4494_v31  ;;  %v4416_v37 = vmul.f32 %v4375_v40, %v4375_v40  ;;  %v4376_v19 = vsub.f32 %v8746_v52, %v4312_v45  ;;  %v4460_v43 = vld [vmem:[%s8114_s3 + $0x98] sm:$0xff] }
 0x42c   : > { %v4535_v55 = vadd.f32 %v4534_v50, %v4495_v49  ;;  %v4417_v15 = vmul.f32 %v4376_v19, %v4376_v19  ;;  %v4461_v50 = vld [vmem:[%s8114_s3 + $0xa0] sm:$0xff]  ;;  %v4463_v19 = vld [vmem:[%s8114_s3 + $0xb0] sm:$0xff] }
 0x42e   : > { %v4536_v63 = vadd.f32 %v4535_v55, %v4496_v51  ;;  %v4499_v1 = vmul.f32 %v4458_v25, %v4417_v15 }
 0x42f   : > { %v4314_v9 = vpop.permute.xlu0 %4313 }
 0x430   : > { %v4377_v62 = vsub.f32 %v8747_v38, %v4314_v9  ;;  %v4537_v23 = vadd.f32 %v4536_v63, %v4497_v10  ;;  %v8753_v63 = vmax.f32 %v7697_v8, 0.0 }
 0x431   : > { %v4316_v46 = vpop.permute.xlu1 %4315 }
 0x432   : > { %v4418_v17 = vmul.f32 %v4377_v62, %v4377_v62  ;;  %v4378_v58 = vsub.f32 %v8748_v32, %v4316_v46 }
 0x433   : > { %373 = vadd.xlane.f32.xlu1 %v372_v33  ;;  %v4457_v33 = vld [vmem:[%s8114_s3 + $0x80] sm:$0xff] }
 0x434   : > { %v4498_v6 = vmul.f32 %v4457_v33, %v4416_v37  ;;  %v4500_v12 = vmul.f32 %v4459_v59, %v4418_v17  ;;  %v4419_v11 = vmul.f32 %v4378_v58, %v4378_v58  ;;  %v8752_v37 = vmax.f32 %v7685_v26, 0.0  ;;  %v4465_v17 = vld [vmem:[%s8114_s3 + $0xc0] sm:$0xff] }
 0x435   : > { %v8755_v58 = vmax.f32 %v7713_v4, 0.0 }
 0x436   : > { %v4538_v22 = vadd.f32 %v4537_v23, %v4498_v6  ;;  %v4501_v35 = vmul.f32 %v4460_v43, %v4419_v11  ;;  %v4464_v6 = vld [vmem:[%s8114_s3 + $0xb8] sm:$0xff]  ;;  %v8756_v11 = vmax.f32 %v7717_v14, 0.0 }
 0x437   : > { %v4318_v7 = vpop.permute.xlu0 %4317 }
 0x438   : > { %v4379_v31 = vsub.f32 %v8749_v54, %v4318_v7  ;;  %v4539_v3 = vadd.f32 %v4538_v22, %v4499_v1  ;;  %v8754_v7 = vmax.f32 %v7701_v61, 0.0 }
 0x439   : > { %v4320_v57 = vpop.permute.xlu1 %4319 }
 0x43a   : > { %v4420_v53 = vmul.f32 %v4379_v31, %v4379_v31  ;;  %v4380_v0 = vsub.f32 %v8750_v48, %v4320_v57  ;;  %v4540_v49 = vadd.f32 %v4539_v3, %v4500_v12  ;;  %v4466_v31 = vld [vmem:[%s8114_s3 + $0xc8] sm:$0xff] }
 0x43c   : > { %v4502_v51 = vmul.f32 %v4461_v50, %v4420_v53  ;;  %v4421_v44 = vmul.f32 %v4380_v0, %v4380_v0  ;;  %v4541_v55 = vadd.f32 %v4540_v49, %v4501_v35  ;;  %v8757_v53 = vmax.f32 %v7729_v42, 0.0  ;;  %v4468_v35 = vld [vmem:[%s8114_s3 + $0xd8] sm:$0xff] }
 0x43e   : > { %v4542_v33 = vadd.f32 %v4541_v55, %v4502_v51  ;;  %v4503_v41 = vmul.f32 %v4462_v27, %v4421_v44  ;;  %v4469_v44 = vld [vmem:[%s8114_s3 + $0xe0] sm:$0xff] }
 0x43f   : > { %v4322_v30 = vpop.permute.xlu0 %4321 }
 0x440   : > { %v4381_v40 = vsub.f32 %v8751_v16, %v4322_v30  ;;  %v4543_v25 = vadd.f32 %v4542_v33, %v4503_v41  ;;  %v4467_v30 = vld [vmem:[%s8114_s3 + $0xd0] sm:$0xff] }
 0x441   : > { %v4324_v45 = vpop.permute.xlu1 %4323 }
 0x442   : > { %v4422_v34 = vmul.f32 %v4381_v40, %v4381_v40  ;;  %v4382_v52 = vsub.f32 %v8752_v37, %v4324_v45  ;;  %v8758_v45 = vmax.f32 %v7733_v28, 0.0 }
 0x444   : > { %v4504_v62 = vmul.f32 %v4463_v19, %v4422_v34  ;;  %v4423_v46 = vmul.f32 %v4382_v52, %v4382_v52  ;;  %v4470_v19 = vld [vmem:[%s8114_s3 + $0xe8] sm:$0xff] }
 0x446   : > { %v4544_v32 = vadd.f32 %v4543_v25, %v4504_v62  ;;  %v4505_v8 = vmul.f32 %v4464_v6, %v4423_v46  ;;  %v8761_v46 = vmax.f32 %v7761_v56, 0.0 }
 0x447   : > { %v4326_v9 = vpop.permute.xlu0 %4325 }
 0x448   : > { %v4383_v10 = vsub.f32 %v8753_v63, %v4326_v9  ;;  %v4545_v12 = vadd.f32 %v4544_v32, %v4505_v8  ;;  %v8759_v9 = vmax.f32 %v7745_v47, 0.0  ;;  %v8760_v63 = vmax.f32 %v7749_v2, 0.0  ;;  %v4473_v8 = vld [vmem:[%s8114_s3 + $0x100] sm:$0xff] }
 0x449   : > { %v4328_v38 = vpop.permute.xlu1 %4327  ;;  %v8762_v2 = vmax.f32 %v7765_v39, 0.0 }
 0x44a   : > { %v4424_v26 = vmul.f32 %v4383_v10, %v4383_v10  ;;  %v4384_v23 = vsub.f32 %v8754_v7, %v4328_v38  ;;  %v4471_v38 = vld [vmem:[%s8114_s3 + $0xf0] sm:$0xff]  ;;  %v4472_v7 = vld [vmem:[%s8114_s3 + $0xf8] sm:$0xff] }
 0x44c   : > { %v4506_v1 = vmul.f32 %v4465_v17, %v4424_v26  ;;  %v4425_v54 = vmul.f32 %v4384_v23, %v4384_v23 }
 0x44e   : > { %v4546_v3 = vadd.f32 %v4545_v12, %v4506_v1  ;;  %v4507_v4 = vmul.f32 %v4466_v31, %v4425_v54  ;;  %v4474_v12 = vld [vmem:[%s8114_s3 + $0x108] sm:$0xff] }
 0x44f   : > { %v4330_v15 = vpop.permute.xlu0 %4329 }
 0x450   : > { %v4385_v59 = vsub.f32 %v8755_v58, %v4330_v15  ;;  %v4547_v40 = vadd.f32 %v4546_v3, %v4507_v4 }
 0x451   : > { %v4332_v22 = vpop.permute.xlu1 %4331 }
 0x452   : > { %v4426_v61 = vmul.f32 %v4385_v59, %v4385_v59  ;;  %v4386_v43 = vsub.f32 %v8756_v11, %v4332_v22  ;;  %v8763_v22 = vmax.f32 %v7777_v5, 0.0  ;;  %v8764_v11 = vmax.f32 %v7781_v36, 0.0 }
 0x454   : > { %v4508_v50 = vmul.f32 %v4467_v30, %v4426_v61  ;;  %v4427_v49 = vmul.f32 %v4386_v43, %v4386_v43  ;;  %v4475_v30 = vld [vmem:[%s8114_s3 + $0x110] sm:$0xff] }
 0x456   : > { %v4548_v27 = vadd.f32 %v4547_v40, %v4508_v50  ;;  %v4509_v42 = vmul.f32 %v4468_v35, %v4427_v49  ;;  %v4476_v49 = vld [vmem:[%s8114_s3 + $0x118] sm:$0xff]  ;;  %v8766_v40 = vmax.f32 %v7797_v60, 0.0  ;;  %v4479_v60 = vld [vmem:[%s8114_s3 + $0x130] sm:$0xff] }
 0x457   : > { %v4334_v57 = vpop.permute.xlu0 %4333 }
 0x458   : > { %v4387_v48 = vsub.f32 %v8757_v53, %v4334_v57  ;;  %v4549_v41 = vadd.f32 %v4548_v27, %v4509_v42 }
 0x459   : > { %v4336_v0 = vpop.permute.xlu1 %4335 }
 0x45a   : > { %v4428_v14 = vmul.f32 %v4387_v48, %v4387_v48  ;;  %v4388_v51 = vsub.f32 %v8758_v45, %v4336_v0  ;;  %v8765_v0 = vmax.f32 %v7793_v29, 0.0  ;;  %v4477_v45 = vld [vmem:[%s8114_s3 + $0x120] sm:$0xff]  ;;  %v4478_v29 = vld [vmem:[%s8114_s3 + $0x128] sm:$0xff] }
 0x45c   : > { %v4510_v37 = vmul.f32 %v4469_v44, %v4428_v14  ;;  %v4429_v52 = vmul.f32 %v4388_v51, %v4388_v51 }
 0x45e   : > { %v4550_v62 = vadd.f32 %v4549_v41, %v4510_v37  ;;  %v4511_v47 = vmul.f32 %v4470_v19, %v4429_v52  ;;  %v8767_v41 = vmax.f32 %v7813_v18, 0.0 }
 0x45f   : > { %v4338_v16 = vpop.permute.xlu0 %4337 }
 0x460   : > { %v4389_v55 = vsub.f32 %v8759_v9, %v4338_v16  ;;  %v4551_v23 = vadd.f32 %v4550_v62, %v4511_v47 }
 0x461   : > { %v4340_v34 = vpop.permute.xlu1 %4339 }
 0x462   : > { %v4430_v28 = vmul.f32 %v4389_v55, %v4389_v55  ;;  %v4390_v10 = vsub.f32 %v8760_v63, %v4340_v34 }
 0x464   : > { %v4512_v25 = vmul.f32 %v4471_v38, %v4430_v28  ;;  %v4431_v26 = vmul.f32 %v4390_v10, %v4390_v10  ;;  %v4480_v38 = vld [vmem:[%s8114_s3 + $0x138] sm:$0xff] }
 0x466   : > { %v4552_v59 = vadd.f32 %v4551_v23, %v4512_v25  ;;  %v4513_v56 = vmul.f32 %v4472_v7, %v4431_v26 }
 0x467   : > { %v4342_v33 = vpop.permute.xlu0 %4341 }
 0x468   : > { %v4391_v6 = vsub.f32 %v8761_v46, %v4342_v33  ;;  %v4553_v61 = vadd.f32 %v4552_v59, %v4513_v56 }
 0x469   : > { %v4344_v15 = vpop.permute.xlu1 %4343 }
 0x46a   : > { %v4432_v17 = vmul.f32 %v4391_v6, %v4391_v6  ;;  %v4392_v32 = vsub.f32 %v8762_v2, %v4344_v15  ;;  %v4481_v6 = vld [vmem:[%s8114_s3 + $0x140] sm:$0xff] }
 0x46c   : > { %v4514_v31 = vmul.f32 %v4473_v8, %v4432_v17  ;;  %v4433_v57 = vmul.f32 %v4392_v32, %v4392_v32 }
 0x46e   : > { %v4554_v3 = vadd.f32 %v4553_v61, %v4514_v31  ;;  %v4515_v4 = vmul.f32 %v4474_v12, %v4433_v57 }
 0x46f   : > { %v4346_v58 = vpop.permute.xlu0 %4345 }
 0x470   : > { %v4393_v1 = vsub.f32 %v8763_v22, %v4346_v58  ;;  %v4555_v16 = vadd.f32 %v4554_v3, %v4515_v4 }
 0x471   : > { %v4348_v54 = vpop.permute.xlu1 %4347 }
 0x472   : > { %v4434_v39 = vmul.f32 %v4393_v1, %v4393_v1  ;;  %v4394_v43 = vsub.f32 %v8764_v11, %v4348_v54 }
 0x474   : > { %v4516_v53 = vmul.f32 %v4475_v30, %v4434_v39  ;;  %v4435_v48 = vmul.f32 %v4394_v43, %v4394_v43 }
 0x476   : > { %v4556_v51 = vadd.f32 %v4555_v16, %v4516_v53  ;;  %v4517_v44 = vmul.f32 %v4476_v49, %v4435_v48 }
 0x477   : > { %v4350_v5 = vpop.permute.xlu0 %4349 }
 0x478   : > { %v4395_v50 = vsub.f32 %v8765_v0, %v4350_v5  ;;  %v4557_v55 = vadd.f32 %v4556_v51, %v4517_v44 }
 0x479   : > { %v4352_v35 = vpop.permute.xlu1 %4351 }
 0x47a   : > { %v4436_v36 = vmul.f32 %v4395_v50, %v4395_v50  ;;  %v4396_v14 = vsub.f32 %v8766_v40, %v4352_v35 }
 0x47c   : > { %v4518_v27 = vmul.f32 %v4477_v45, %v4436_v36  ;;  %v4437_v42 = vmul.f32 %v4396_v14, %v4396_v14 }
 0x47e   : > { %v4558_v52 = vadd.f32 %v4557_v55, %v4518_v27  ;;  %v4519_v19 = vmul.f32 %v4478_v29, %v4437_v42 }
 0x47f   : > { %v4354_v9 = vpop.permute.xlu0 %4353 }
 0x480   : > { %v4397_v34 = vsub.f32 %v4274_v20, %v4354_v9  ;;  %v4559_v62 = vadd.f32 %v4558_v52, %v4519_v19 }
 0x481   : > { %v4356_v37 = vpop.permute.xlu1 %4355 }
 0x482   : > { %v4438_v33 = vmul.f32 %v4397_v34, %v4397_v34  ;;  %v4398_v28 = vsub.f32 %v8767_v41, %v4356_v37 }
 0x484   : > { %v4520_v63 = vmul.f32 %v4479_v60, %v4438_v33  ;;  %v4439_v10 = vmul.f32 %v4398_v28, %v4398_v28 }
 0x486   : > { %v4560_v20 = vadd.f32 %v4559_v62, %v4520_v63  ;;  %v4521_v47 = vmul.f32 %v4480_v38, %v4439_v10 }
 0x487   : > { %v4358_v13 = vpop.permute.xlu0 %4357 }
 0x488   : > { %v4399_v46 = vsub.f32 %v4276_v21, %v4358_v13  ;;  %v4561_v25 = vadd.f32 %v4560_v20, %v4521_v47 }
 0x48a   : > { %v4440_v15 = vmul.f32 %v4399_v46, %v4399_v46 }
 0x48c   : > { %v4522_v18 = vmul.f32 %v4481_v6, %v4440_v15 }
 0x48e   : > { %v4562_v26 = vadd.f32 %v4561_v25, %v4522_v18 }
 0x490   : > { %4563 = vadd.xlane.f32.xlu0 %v4562_v26 }
 0x4c0   : > { %v374_v7 = vpop.xlane.xlu1 %373 }
 0x4c1   : > { %v375_v23 = vrot.slane %v374_v7, 4 }
 0x4c3   : > { %v376_v17 = vadd.f32 %v375_v23, %v374_v7 }
 0x4c5   : > { %v377_v2 = vrot.slane %v376_v17, 2 }
 0x4c7   : > { %v378_v32 = vadd.f32 %v377_v2, %v376_v17 }
 0x4c9   : > { %v379_v8 = vrot.slane %v378_v32, 1 }
 0x4cb   : > { %v380_v58 = vadd.f32 %v379_v8, %v378_v32 }
 0x4cd   : > { %5327 = vpush %v380_v58 }
 0x4fe   : > { %s5328_s29 = spop %5327 }
 0x4ff   : > { %v4573_v31 = vstv %s5328_s29 }
 0x51d   : > { %v4564_v24 = vpop.xlane.xlu0 %4563 }
 0x51e   : > { %v4565_v21 = vrot.slane %v4564_v24, 4 }
 0x520   : > { %v4566_v59 = vadd.f32 %v4565_v21, %v4564_v24 }
 0x522   : > { %v4567_v56 = vrot.slane %v4566_v59, 2 }
 0x524   : > { %v4568_v22 = vadd.f32 %v4567_v56, %v4566_v59 }
 0x526   : > { %v4569_v1 = vrot.slane %v4568_v22, 1 }
 0x528   : > { %v4570_v54 = vadd.f32 %v4569_v1, %v4568_v22 }
 0x52a   : > { %5329 = vpush %v4570_v54 }
 0x55b   : > { %s5330_s15 = spop %5329 }
 0x55c   : > { %s4572_s9 = smul.f32 0.5, %s5330_s15 }
 0x55e   : > { %v4574_v57 = vstv %s4572_s9 }
 0x55f   : > { %v4576_v12 = vsel %vm4575_vm9, %v4573_v31, %v4574_v57 }
 0x560   : > { %v4578_v61 = vsel %vm4577_vm10, %v4576_v12, 0.0 }
 0x561   : > { %4579 = vst [vmem:[%s311_s14] sm:$0x1] %v4578_v61 }
 0x562   : > { %5525 = shalt.err (!%p5522_p7)
}
 0x563   : > { %s5526_s23 = scalar_lea.hbm %s8069_s19, 16  ;;  %s5530_s8 = scalar_lea.hbm %s8118_s7, 32 }
 0x564   : > { %p5527_p8 = scmp.ne.s32.totalorder %s8069_s19, %s5526_s23  ;;  %p5531_p1 = scmp.lt.u32.totalorder %s8069_s19, %s8118_s7 }
 0x565   : > { %p5532_p0 = scmp.lt.u32.totalorder %s5530_s8, %s5526_s23  ;;  %p5534_p6 = scmp.lt.u32.totalorder %s5526_s23, %s8069_s19 }
 0x566   : > { %p5528_p11 = pnand %p5527_p8, %p8768_p9 }
 0x567   : > { %p5533_p5 = por %p5532_p0, %p5531_p1 }
 0x568   : > { %p5529_p13 = pneg %p5528_p11 }
 0x569   : > { %p5535_p10 = por %p5534_p6, %p5533_p5 }
 0x56b   : > { %p5536_p12 = pnand %p5535_p10, %p5529_p13 }
 0x56d   : > { %5539 = shalt.err (!%p5536_p12)
}
 0x56e   : > { %5335 = dma.vmem_to_hbm [thread:$0]  (%p8768_p9), %s8071_s17, 16, %s8069_s19, %s4581_s28  }
 0x56f PF: > { %p5347_p2 = scmp.ge.s32.totalorder %s5578_s27, 2  ;;  %s4605_s13 = sand.u32 1, %s5566_s24  }
 0x570   : > { %p8769_p3 = scmp.ne.s32.totalorder %s8369_s12, 0  ;;  %s4606_s18 = scalar_lea.sflag [#allocation4], %s4605_s13 }
 0x572   : > { %p5342_p4 = pnand %p5347_p2, %p8769_p3 }
 0x574   : > { %5561 = dma.done.wait (!%p5342_p4), %s4606_s18, 16  }
 0x575   : > { %5563 = vsyncadd (!%p5342_p4), %s4606_s18, 4294967280  ;;  %p18_p7 = scmp.ge.s32.totalorder %s5653_s30, 4   ;;  %s8770_s24 = smov %s5570_s25 }
 0x576   : > { %s8771_s25 = smov %s5574_s26  ;;  %s8772_s26 = smov %s5664_s10 }
 0x577   : > { %s8773_s27 = smov %s5653_s30  ;;  %20 = sbr.rel (!%p18_p7) target bundleno = 4 (0x4), region = 96 }
 0x57e   :  { %4610 = vsyncpa [#allocation3], 1 }
 0x57f   :  { %4612 = vsyncpa [#allocation3 + $0x1], 1 }
 0x580   :  { %4613 = vsyncpa [#allocation4], 1 }
 0x581   :  { %4615 = vsyncpa [#allocation4 + $0x1], 1 }

</bundles_post_ra>
